<compile_context>
chip_gen: v5e
topology: v5e:2x2
jax: 0.10.0
libtpu: 0.0.40
codegen_flags: <defaults>
</compile_context>

<pallas_src>
import math

import jax
import jax.numpy as jnp
from jax.experimental import pallas as pl
from jax.experimental.pallas import tpu as pltpu


# ---------------------------------------------------------------------------
# Kernel 1: batch-independent tables (runs once per forward, no grid).
# ---------------------------------------------------------------------------
def pr_tables_kernel(wp_re_ref, wp_im_ref,    # weights_pole    (Ci, Co, M)
                     wr_re_ref, wr_im_ref,    # weights_residue (Ci, Co, M)
                     lam_ref,                 # imag(lambda) = 2*pi*fftfreq (1, 1, 1, T)
                     t_ref,                   # time grid                   (1, 1, 1, T)
                     hw_re_ref, hw_im_ref,    # out: Hw = residue/(j*lam - pole)  (Ci, Co, M, T)
                     g_re_ref, g_im_ref,      # out: G = sum_k Hw                 (Ci, Co, T)
                     e_re_ref, e_im_ref):     # out: term2 = exp(pole * t)        (Ci, Co, M, T)
    wp_re = wp_re_ref[...][:, :, :, None]     # (Ci, Co, M, 1)
    wp_im = wp_im_ref[...][:, :, :, None]
    wr_re = wr_re_ref[...][:, :, :, None]
    wr_im = wr_im_ref[...][:, :, :, None]
    lam = lam_ref[...]                        # (1, 1, 1, T)
    tg = t_ref[...]

    # Hw = residue / (j*lam - pole), complex split into re/im; reciprocal on the EUP.
    den_re = -wp_re                           # (Ci, Co, M, 1)
    den_im = lam - wp_im                      # (Ci, Co, M, T)
    den_sq = den_re * den_re + den_im * den_im
    inv = pl.reciprocal(den_sq, approx=True)  # EUP slot; keeps the VALU free
    inv_re = den_re * inv
    inv_im = -(den_im * inv)
    hw_re = wr_re * inv_re - wr_im * inv_im   # (Ci, Co, M, T)
    hw_im = wr_re * inv_im + wr_im * inv_re
    hw_re_ref[...] = hw_re
    hw_im_ref[...] = hw_im
    g_re_ref[...] = jnp.sum(hw_re, axis=2)    # (Ci, Co, T), sublane (XLU) reduction, once per fwd
    g_im_ref[...] = jnp.sum(hw_im, axis=2)

    # term2 = exp(pole * t) (complex exponential), computed once per forward (EUP-heavy).
    arg_re = wp_re * tg                       # (Ci, Co, M, T)
    arg_im = wp_im * tg
    mag = jnp.exp(arg_re)
    e_re_ref[...] = mag * jnp.cos(arg_im)
    e_im_ref[...] = mag * jnp.sin(arg_im)


# ---------------------------------------------------------------------------
# Kernel 2: per-batch-block apply (gridded, all contractions on the MXU).
# ---------------------------------------------------------------------------
def pr_apply_kernel(a_ref,                    # (TB, 2*Ci*T): [Re(alpha) | Im(alpha)], i-major, t-minor
                    g_re_ref, g_im_ref,       # (Ci, Co, T)
                    h2_ref,                   # (2*Ci*T, 2*Co*M): real block matrix of -Hw
                    t2_ref,                   # (2*Ci*M, Co*T):   real block matrix of term2 / T
                    idft_ref,                 # (2*T, T): rows [cos(2*pi*t*n/T)/T ; -sin(2*pi*t*n/T)/T]
                    out_ref):                 # (TB, Co, T)
    TB = a_ref.shape[0]
    Ci, Co, T = g_re_ref.shape
    dd = idft_ref.dtype                       # MXU operand dtype (f32 here; bf16 optional)

    a = a_ref[...]                            # (TB, 2*Ci*T), loaded once
    g_re = g_re_ref[...]
    g_im = g_im_ref[...]

    # ---- output_residue1[b, o, t] = sum_i alpha[b, i, t] * G[i, o, t]  (tiny i-sum on the VPU)
    or1_re_rows = []
    or1_im_rows = []
    for o in range(Co):
        acc_re = jnp.zeros((TB, T), jnp.float32)
        acc_im = jnp.zeros((TB, T), jnp.float32)
        for i in range(Ci):
            ar = a[:, i * T:(i + 1) * T]                      # (TB, T) static lane-aligned slice
            ai = a[:, (Ci + i) * T:(Ci + i + 1) * T]
            gr = g_re[i, o:o + 1, :]                          # (1, T)
            gi = g_im[i, o:o + 1, :]
            acc_re = acc_re + (ar * gr - ai * gi)
            acc_im = acc_im + (ar * gi + ai * gr)
        or1_re_rows.append(acc_re)
        or1_im_rows.append(acc_im)
    lhs_re = jnp.concatenate(or1_re_rows, axis=0)             # (Co*TB, T), rows = o*TB + b
    lhs_im = jnp.concatenate(or1_im_rows, axis=0)
    lhs = jnp.concatenate([lhs_re, lhs_im], axis=1).astype(dd)  # (Co*TB, 2T)

    # ---- x1 = Re(ifft(output_residue1, n=T)) as ONE iDFT matmul (1/T folded into the table).
    x1 = jnp.dot(lhs, idft_ref[...], preferred_element_type=jnp.float32)          # (Co*TB, T)

    # ---- output_residue2 = einsum('bix,xiok->bok', alpha, -Hw) as ONE MXU dot.
    #      Result columns: [Re(or2) | Im(or2)], each (o-major, k-minor).
    or2 = jnp.dot(a.astype(dd), h2_ref[...], preferred_element_type=jnp.float32)  # (TB, 2*Co*M)

    # ---- x2 = Re(einsum('bik,iokz->boz', or2, term2)) / T as ONE MXU dot (requires Ci == Co).
    x2 = jnp.dot(or2.astype(dd), t2_ref[...], preferred_element_type=jnp.float32)  # (TB, Co*T)

    # ---- out = x1 + x2; lane-dense stores (T on the 128-lane axis -> unmasked vst).
    for o in range(Co):
        out_ref[:, o, :] = x1[o * TB:(o + 1) * TB, :] + x2[:, o * T:(o + 1) * T]


# ---------------------------------------------------------------------------
# Wrapper
# ---------------------------------------------------------------------------
def pr_forward(x, wp_re, wp_im, wr_re, wr_im, t, *, block_b=8, dot_dtype=jnp.float32):
    """Pallas forward of PR.  x: (B, Ci, T) float32, t: (T,) float32.

    dot_dtype=jnp.bfloat16 is the recommended MXU operand dtype on v5e/v6e;
    default is float32 so the demo stays well inside the 1e-2 validation tolerance.
    """
    B, Ci, T = x.shape
    Co, M = wp_re.shape[1], wp_re.shape[2]
    if Ci != Co:
        # The original einsum 'bik,iokz->boz' reuses output_residue2's output-channel axis as an
        # input-channel axis; it is only well defined for in_channels == out_channels.
        raise ValueError(f"PR requires in_channels == out_channels, got {Ci} != {Co}")
    dt = float(t[1] - t[0])                    # mirrors (t[1] - t[0]).item()

    # ---------------- plain-JAX glue: forward FFT + constant inputs ----------------
    alpha = jnp.fft.fft(x.astype(jnp.complex64), axis=-1)
    a_re = jnp.real(alpha).astype(jnp.float32)
    a_im = jnp.imag(alpha).astype(jnp.float32)
    a_flat = jnp.concatenate([a_re.reshape(B, Ci * T), a_im.reshape(B, Ci * T)], axis=1)  # (B, 2*Ci*T)

    lam = (jnp.fft.fftfreq(T, dt) * (2.0 * math.pi)).astype(jnp.float32).reshape(1, 1, 1, T)
    tg = t.astype(jnp.float32).reshape(1, 1, 1, T)

    # ---------------- Pallas kernel 1: Hw / G / term2 (batch independent) ----------------
    vmem = pl.BlockSpec(memory_space=pltpu.MemorySpace.VMEM)
    f32 = jnp.float32
    hw_re, hw_im, g_re, g_im, e_re, e_im = pl.pallas_call(
        pr_tables_kernel,
        out_shape=(jax.ShapeDtypeStruct((Ci, Co, M, T), f32),
                   jax.ShapeDtypeStruct((Ci, Co, M, T), f32),
                   jax.ShapeDtypeStruct((Ci, Co, T), f32),
                   jax.ShapeDtypeStruct((Ci, Co, T), f32),
                   jax.ShapeDtypeStruct((Ci, Co, M, T), f32),
                   jax.ShapeDtypeStruct((Ci, Co, M, T), f32)),
        in_specs=[vmem] * 6,
        out_specs=(vmem,) * 6,
    )(wp_re, wp_im, wr_re, wr_im, lam, tg)

    # ---------------- layout plumbing (XLA, batch independent; done once) ----------------
    # H2: real block matrix for or2 = alpha @ (-Hw); rows (i, t) x {re, im}, cols (o, k) x {re, im}.
    hn_re = -jnp.transpose(hw_re, (0, 3, 1, 2)).reshape(Ci * T, Co * M)
    hn_im = -jnp.transpose(hw_im, (0, 3, 1, 2)).reshape(Ci * T, Co * M)
    h2 = jnp.concatenate(
        [jnp.concatenate([hn_re, hn_im], axis=1),
         jnp.concatenate([-hn_im, hn_re], axis=1)], axis=0).astype(dot_dtype)   # (2*Ci*T, 2*Co*M)

    # T2: real block matrix for x2 = Re(or2 @ term2) / T; rows (i, k) x {re, im}, cols (o, z).
    t2r = jnp.transpose(e_re, (0, 2, 1, 3)).reshape(Ci * M, Co * T) / T
    t2i = jnp.transpose(e_im, (0, 2, 1, 3)).reshape(Ci * M, Co * T) / T
    t2 = jnp.concatenate([t2r, -t2i], axis=0).astype(dot_dtype)                 # (2*Ci*M, Co*T)

    # Fused iDFT table with the 1/T normalisation folded in: rows [cos/T ; -sin/T].
    n = jnp.arange(T, dtype=jnp.float32)
    ang = (2.0 * math.pi / T) * jnp.outer(n, n)
    idft = jnp.concatenate([jnp.cos(ang) / T, -jnp.sin(ang) / T], axis=0).astype(dot_dtype)  # (2T, T)

    # ---------------- Pallas kernel 2: gridded batched apply ----------------
    if B % block_b != 0 or (block_b % 8 != 0 and block_b != B):
        block_b = B                            # fall back to a single batch block
    nb = B // block_b

    itm = jnp.finfo(dot_dtype).bits // 8
    table_bytes = (2 * Ci * Co * T * 4                     # g_re / g_im
                   + (2 * Ci * T) * (2 * Co * M) * itm     # h2
                   + (2 * Ci * M) * (Co * T) * itm         # t2
                   + (2 * T) * T * itm)                    # fused iDFT table
    step_bytes = 2 * (block_b * 2 * Ci * T * 4             # double-buffered alpha block
                      + block_b * Co * T * 4)              # double-buffered output block
    vmem_limit = int(max(16 * 2 ** 20, min(96 * 2 ** 20, 4 * (table_bytes + step_bytes))))

    out = pl.pallas_call(
        pr_apply_kernel,
        out_shape=jax.ShapeDtypeStruct((B, Co, T), jnp.float32),
        grid=(nb,),
        in_specs=[
            pl.BlockSpec((block_b, 2 * Ci * T), lambda b: (b, 0)),          # alpha block (pipelined)
            pl.BlockSpec((Ci, Co, T), lambda b: (0, 0, 0)),                 # G (resident)
            pl.BlockSpec((Ci, Co, T), lambda b: (0, 0, 0)),
            pl.BlockSpec((2 * Ci * T, 2 * Co * M), lambda b: (0, 0)),       # H2 (resident)
            pl.BlockSpec((2 * Ci * M, Co * T), lambda b: (0, 0)),           # T2 (resident)
            pl.BlockSpec((2 * T, T), lambda b: (0, 0)),                     # iDFT table (resident)
        ],
        out_specs=pl.BlockSpec((block_b, Co, T), lambda b: (b, 0, 0)),
        compiler_params=pltpu.CompilerParams(
            dimension_semantics=("parallel",),          # megacore / v7x sharding over batch blocks
            vmem_limit_bytes=vmem_limit),
    )(a_flat, g_re, g_im, h2, t2, idft)
    return out


def pr_reference(x, wp, wr, t):
    """Pure-JAX (complex64) reference matching the PyTorch forward exactly."""
    T = x.shape[-1]
    dt = float(t[1] - t[0])
    alpha = jnp.fft.fft(x.astype(jnp.complex64), axis=-1)
    lam = (jnp.fft.fftfreq(T, dt) * 2.0 * math.pi * 1j).astype(jnp.complex64)
    lam1 = lam[:, None, None, None]
    Hw = wr * (1.0 / (lam1 - wp))                               # (T, Ci, Co, M)
    or1 = jnp.einsum('bix,xiok->box', alpha, Hw)
    or2 = jnp.einsum('bix,xiok->bok', alpha, -Hw)
    x1 = jnp.real(jnp.fft.ifft(or1, n=T, axis=-1))
    term2 = jnp.exp(jnp.einsum('iok,z->iokz', wp, t.astype(jnp.complex64)))
    x2 = jnp.real(jnp.einsum('bik,iokz->boz', or2, term2)) / T
    return x1 + x2


if __name__ == "__main__":
    B, C, T, M = 16, 4, 128, 4        # in_channels == out_channels == C (required by the einsums)
    key = jax.random.PRNGKey(0)
    k1, k2, k3, k4, k5 = jax.random.split(key, 5)

    scale = 1.0 / (C * C)
    # deterministic init mirroring scale * torch.rand(..., dtype=cfloat)
    wp_re = scale * jax.random.uniform(k1, (C, C, M), jnp.float32)
    wp_im = scale * jax.random.uniform(k2, (C, C, M), jnp.float32)
    wr_re = scale * jax.random.uniform(k3, (C, C, M), jnp.float32)
    wr_im = scale * jax.random.uniform(k4, (C, C, M), jnp.float32)

    x = jax.random.normal(k5, (B, C, T), jnp.float32)
    dt = 0.05
    t = jnp.arange(T, dtype=jnp.float32) * dt       # synthetic stand-in for grid_x_train

    out = jax.block_until_ready(
        pr_forward(x, wp_re, wp_im, wr_re, wr_im, t, block_b=8))

    ref = pr_reference(x, (wp_re + 1j * wp_im).astype(jnp.complex64),
                       (wr_re + 1j * wr_im).astype(jnp.complex64), t)
    err = float(jnp.max(jnp.abs(out - ref)))
    mag = float(jnp.max(jnp.abs(ref))) + 1e-6
    assert err <= 1e-2 * mag, f"kernel/reference mismatch: max_err={err}, ref_scale={mag}"

    print("KERNEL_OK")
</pallas_src>

<mosaic_0001>
module attributes {stable_mosaic.version = 11 : i64} {
  func.func @pr_tables_kernel(%arg0: memref<4x4x4xf32, #tpu.memory_space<vmem>>, %arg1: memref<4x4x4xf32, #tpu.memory_space<vmem>>, %arg2: memref<4x4x4xf32, #tpu.memory_space<vmem>>, %arg3: memref<4x4x4xf32, #tpu.memory_space<vmem>>, %arg4: memref<1x1x1x128xf32, #tpu.memory_space<vmem>>, %arg5: memref<1x1x1x128xf32, #tpu.memory_space<vmem>>, %arg6: memref<4x4x4x128xf32, #tpu.memory_space<vmem>>, %arg7: memref<4x4x4x128xf32, #tpu.memory_space<vmem>>, %arg8: memref<4x4x128xf32, #tpu.memory_space<vmem>>, %arg9: memref<4x4x128xf32, #tpu.memory_space<vmem>>, %arg10: memref<4x4x4x128xf32, #tpu.memory_space<vmem>>, %arg11: memref<4x4x4x128xf32, #tpu.memory_space<vmem>>) attributes {dimension_semantics = [], scalar_prefetch = 0 : i64, scratch_operands = 0 : i64, tpu.core_type = #tpu.core_type<tc>} {
    %c0 = arith.constant 0 : index
    %c0_0 = arith.constant 0 : index
    %c0_1 = arith.constant 0 : index
    %0 = vector.load %arg0[%c0, %c0_0, %c0_1] : memref<4x4x4xf32, #tpu.memory_space<vmem>>, vector<4x4x4xf32>
    %1 = vector.shape_cast %0 : vector<4x4x4xf32> to vector<4x4x4x1xf32>
    %c0_2 = arith.constant 0 : index
    %c0_3 = arith.constant 0 : index
    %c0_4 = arith.constant 0 : index
    %2 = vector.load %arg1[%c0_2, %c0_3, %c0_4] : memref<4x4x4xf32, #tpu.memory_space<vmem>>, vector<4x4x4xf32>
    %3 = vector.shape_cast %2 : vector<4x4x4xf32> to vector<4x4x4x1xf32>
    %c0_5 = arith.constant 0 : index
    %c0_6 = arith.constant 0 : index
    %c0_7 = arith.constant 0 : index
    %4 = vector.load %arg2[%c0_5, %c0_6, %c0_7] : memref<4x4x4xf32, #tpu.memory_space<vmem>>, vector<4x4x4xf32>
    %5 = vector.shape_cast %4 : vector<4x4x4xf32> to vector<4x4x4x1xf32>
    %c0_8 = arith.constant 0 : index
    %c0_9 = arith.constant 0 : index
    %c0_10 = arith.constant 0 : index
    %6 = vector.load %arg3[%c0_8, %c0_9, %c0_10] : memref<4x4x4xf32, #tpu.memory_space<vmem>>, vector<4x4x4xf32>
    %7 = vector.shape_cast %6 : vector<4x4x4xf32> to vector<4x4x4x1xf32>
    %c0_11 = arith.constant 0 : index
    %c0_12 = arith.constant 0 : index
    %c0_13 = arith.constant 0 : index
    %c0_14 = arith.constant 0 : index
    %8 = vector.load %arg4[%c0_11, %c0_12, %c0_13, %c0_14] : memref<1x1x1x128xf32, #tpu.memory_space<vmem>>, vector<1x1x1x128xf32>
    %c0_15 = arith.constant 0 : index
    %c0_16 = arith.constant 0 : index
    %c0_17 = arith.constant 0 : index
    %c0_18 = arith.constant 0 : index
    %9 = vector.load %arg5[%c0_15, %c0_16, %c0_17, %c0_18] : memref<1x1x1x128xf32, #tpu.memory_space<vmem>>, vector<1x1x1x128xf32>
    %cst = arith.constant 0.000000e+00 : f32
    %10 = vector.broadcast %cst : f32 to vector<4x4x4x1xf32>
    %11 = arith.subf %10, %1 : vector<4x4x4x1xf32>
    %12 = vector.broadcast %8 : vector<1x1x1x128xf32> to vector<4x4x4x128xf32>
    %13 = vector.broadcast %3 : vector<4x4x4x1xf32> to vector<4x4x4x128xf32>
    %14 = arith.subf %12, %13 : vector<4x4x4x128xf32>
    %15 = arith.mulf %11, %11 : vector<4x4x4x1xf32>
    %16 = arith.mulf %14, %14 : vector<4x4x4x128xf32>
    %17 = vector.broadcast %15 : vector<4x4x4x1xf32> to vector<4x4x4x128xf32>
    %18 = arith.addf %17, %16 : vector<4x4x4x128xf32>
    %19 = tpu.reciprocal %18 {approx = true} : vector<4x4x4x128xf32> -> vector<4x4x4x128xf32>
    %20 = vector.broadcast %11 : vector<4x4x4x1xf32> to vector<4x4x4x128xf32>
    %21 = arith.mulf %20, %19 : vector<4x4x4x128xf32>
    %22 = arith.mulf %14, %19 : vector<4x4x4x128xf32>
    %cst_19 = arith.constant 0.000000e+00 : f32
    %23 = vector.broadcast %cst_19 : f32 to vector<4x4x4x128xf32>
    %24 = arith.subf %23, %22 : vector<4x4x4x128xf32>
    %25 = vector.broadcast %5 : vector<4x4x4x1xf32> to vector<4x4x4x128xf32>
    %26 = arith.mulf %25, %21 : vector<4x4x4x128xf32>
    %27 = vector.broadcast %7 : vector<4x4x4x1xf32> to vector<4x4x4x128xf32>
    %28 = arith.mulf %27, %24 : vector<4x4x4x128xf32>
    %29 = arith.subf %26, %28 : vector<4x4x4x128xf32>
    %30 = vector.broadcast %5 : vector<4x4x4x1xf32> to vector<4x4x4x128xf32>
    %31 = arith.mulf %30, %24 : vector<4x4x4x128xf32>
    %32 = vector.broadcast %7 : vector<4x4x4x1xf32> to vector<4x4x4x128xf32>
    %33 = arith.mulf %32, %21 : vector<4x4x4x128xf32>
    %34 = arith.addf %31, %33 : vector<4x4x4x128xf32>
    %c0_20 = arith.constant 0 : index
    %c0_21 = arith.constant 0 : index
    %c0_22 = arith.constant 0 : index
    %c0_23 = arith.constant 0 : index
    %35 = vector.load %arg6[%c0_20, %c0_21, %c0_22, %c0_23] : memref<4x4x4x128xf32, #tpu.memory_space<vmem>>, vector<4x4x4x128xf32>
    tpu.vector_store %arg6[%c0_20, %c0_21, %c0_22, %c0_23], %29 {strides = array<i32>} : memref<4x4x4x128xf32, #tpu.memory_space<vmem>>, vector<4x4x4x128xf32>,
    %c0_24 = arith.constant 0 : index
    %c0_25 = arith.constant 0 : index
    %c0_26 = arith.constant 0 : index
    %c0_27 = arith.constant 0 : index
    %36 = vector.load %arg7[%c0_24, %c0_25, %c0_26, %c0_27] : memref<4x4x4x128xf32, #tpu.memory_space<vmem>>, vector<4x4x4x128xf32>
    tpu.vector_store %arg7[%c0_24, %c0_25, %c0_26, %c0_27], %34 {strides = array<i32>} : memref<4x4x4x128xf32, #tpu.memory_space<vmem>>, vector<4x4x4x128xf32>,
    %cst_28 = arith.constant dense<0.000000e+00> : vector<4x4x128xf32>
    %37 = vector.multi_reduction <add>, %29, %cst_28 [2] : vector<4x4x4x128xf32> to vector<4x4x128xf32>
    %c0_29 = arith.constant 0 : index
    %c0_30 = arith.constant 0 : index
    %c0_31 = arith.constant 0 : index
    %38 = vector.load %arg8[%c0_29, %c0_30, %c0_31] : memref<4x4x128xf32, #tpu.memory_space<vmem>>, vector<4x4x128xf32>
    tpu.vector_store %arg8[%c0_29, %c0_30, %c0_31], %37 {strides = array<i32>} : memref<4x4x128xf32, #tpu.memory_space<vmem>>, vector<4x4x128xf32>,
    %cst_32 = arith.constant dense<0.000000e+00> : vector<4x4x128xf32>
    %39 = vector.multi_reduction <add>, %34, %cst_32 [2] : vector<4x4x4x128xf32> to vector<4x4x128xf32>
    %c0_33 = arith.constant 0 : index
    %c0_34 = arith.constant 0 : index
    %c0_35 = arith.constant 0 : index
    %40 = vector.load %arg9[%c0_33, %c0_34, %c0_35] : memref<4x4x128xf32, #tpu.memory_space<vmem>>, vector<4x4x128xf32>
    tpu.vector_store %arg9[%c0_33, %c0_34, %c0_35], %39 {strides = array<i32>} : memref<4x4x128xf32, #tpu.memory_space<vmem>>, vector<4x4x128xf32>,
    %41 = vector.broadcast %1 : vector<4x4x4x1xf32> to vector<4x4x4x128xf32>
    %42 = vector.broadcast %9 : vector<1x1x1x128xf32> to vector<4x4x4x128xf32>
    %43 = arith.mulf %41, %42 : vector<4x4x4x128xf32>
    %44 = vector.broadcast %3 : vector<4x4x4x1xf32> to vector<4x4x4x128xf32>
    %45 = vector.broadcast %9 : vector<1x1x1x128xf32> to vector<4x4x4x128xf32>
    %46 = arith.mulf %44, %45 : vector<4x4x4x128xf32>
    %47 = math.exp %43 : vector<4x4x4x128xf32>
    %48 = math.cos %46 : vector<4x4x4x128xf32>
    %49 = arith.mulf %47, %48 : vector<4x4x4x128xf32>
    %c0_36 = arith.constant 0 : index
    %c0_37 = arith.constant 0 : index
    %c0_38 = arith.constant 0 : index
    %c0_39 = arith.constant 0 : index
    %50 = vector.load %arg10[%c0_36, %c0_37, %c0_38, %c0_39] : memref<4x4x4x128xf32, #tpu.memory_space<vmem>>, vector<4x4x4x128xf32>
    tpu.vector_store %arg10[%c0_36, %c0_37, %c0_38, %c0_39], %49 {strides = array<i32>} : memref<4x4x4x128xf32, #tpu.memory_space<vmem>>, vector<4x4x4x128xf32>,
    %51 = math.sin %46 : vector<4x4x4x128xf32>
    %52 = arith.mulf %47, %51 : vector<4x4x4x128xf32>
    %c0_40 = arith.constant 0 : index
    %c0_41 = arith.constant 0 : index
    %c0_42 = arith.constant 0 : index
    %c0_43 = arith.constant 0 : index
    %53 = vector.load %arg11[%c0_40, %c0_41, %c0_42, %c0_43] : memref<4x4x4x128xf32, #tpu.memory_space<vmem>>, vector<4x4x4x128xf32>
    tpu.vector_store %arg11[%c0_40, %c0_41, %c0_42, %c0_43], %52 {strides = array<i32>} : memref<4x4x4x128xf32, #tpu.memory_space<vmem>>, vector<4x4x4x128xf32>,
    return
  }
}

</mosaic_0001>

<bundles_post_ra>
// kernel: tpu_custom_call.1
= control target key start
LH: loop header
LB: loop body
LE: loop exit
PB: predicated region body
PF: predicated region fallthrough
CT: control target
= control target key end

     0   :  { %17 = vsyncpa [#allocation3], 0  ;;  %s9668_s0 = inlined_call_operand.hbm [shape: f32[4,4,4], index: 0, kind: input, shape index: {}]   ;;  %s9669_s1 = inlined_call_operand.hbm [shape: f32[4,4,4], index: 1, kind: input, shape index: {}]   ;;  %s9670_s2 = inlined_call_operand.hbm [shape: f32[4,4,4], index: 2, kind: input, shape index: {}]   ;;  %s9671_s3 = inlined_call_operand.hbm [shape: f32[4,4,4], index: 3, kind: input, shape index: {}]   ;;  %s9672_s4 = inlined_call_operand.vmem [shape: f32[1,1,1,128], index: 4, kind: input, shape index: {}]   ;;  %s9673_s5 = inlined_call_operand.vmem [shape: f32[1,1,1,128], index: 5, kind: input, shape index: {}]   ;;  %s9674_s6 = inlined_call_operand.hbm [shape: f32[4,4,4,128], index: 6, kind: output, shape index: {0}]   ;;  %s9675_s7 = inlined_call_operand.hbm [shape: f32[4,4,4,128], index: 7, kind: output, shape index: {1}]   ;;  %s9676_s8 = inlined_call_operand.hbm [shape: f32[4,4,128], index: 8, kind: output, shape index: {2}]   ;;  %s9677_s9 = inlined_call_operand.hbm [shape: f32[4,4,128], index: 9, kind: output, shape index: {3}]   ;;  %s9678_s10 = inlined_call_operand.hbm [shape: f32[4,4,4,128], index: 10, kind: output, shape index: {4}]   ;;  %s9679_s11 = inlined_call_operand.hbm [shape: f32[4,4,4,128], index: 11, kind: output, shape index: {5}]  }
   0x1   :  { %18 = vsyncpa [#allocation6], 0 }
   0x2   :  { %19 = vsyncpa [#allocation9], 0 }
   0x3   :  { %20 = vsyncpa [#allocation4], 0 }
   0x4   :  { %21 = vsyncpa [#allocation12], 0 }
   0x5   :  { %22 = vsyncpa [#allocation15], 0 }
   0x6   :  { %23 = vsyncpa [#allocation18], 0  ;;  %s41_s19 = sshll.u32 %s9669_s1, 4  ;;  %s6771_s20 = smov [#allocation5]   ;;  %s42_s19 = int_to_ptr.hbm [resolvable:$true] %s41_s19 }
   0x7   :  { %s43_s21 = sshll.u32 %s6771_s20, 4  ;;  %s28_s24 = sshll.u32 %s9668_s0, 4  ;;  %s44_s21 = int_to_ptr.vmem [resolvable:$true] %s43_s21  ;;  %s29_s24 = int_to_ptr.hbm [resolvable:$true] %s28_s24 }
   0x8   :  { %s6772_s25 = smov 64   ;;  %s6773_s26 = smov 4  }
   0x9   :  { %49 = dma.hbm_to_vmem [thread:$0]  %s42_s19, 256, %s44_s21, [#allocation6], %s6772_s25, %s6772_s25, %s6773_s26  }
   0xa   :  { %s6774_s27 = smov [#allocation2]   ;;  %s54_s1 = sshll.u32 %s9670_s2, 4  ;;  %s55_s1 = int_to_ptr.hbm [resolvable:$true] %s54_s1 }
   0xb   :  { %s30_s28 = sshll.u32 %s6774_s27, 4  ;;  %s67_s13 = sshll.u32 %s9671_s3, 4  ;;  %s31_s28 = int_to_ptr.vmem [resolvable:$true] %s30_s28  ;;  %s68_s13 = int_to_ptr.hbm [resolvable:$true] %s67_s13 }
   0xc   :  { %36 = dma.hbm_to_vmem [thread:$0]  %s29_s24, 256, %s31_s28, [#allocation3], %s6772_s25, %s6772_s25, %s6773_s26  }
   0xd   :  { %s6775_s14 = smov [#allocation7]   ;;  %s6776_s16 = smov [#allocation8]  }
   0xe   :  { %s56_s15 = sshll.u32 %s6775_s14, 4  ;;  %s69_s2 = sshll.u32 %s6776_s16, 4  ;;  %s57_s15 = int_to_ptr.vmem [resolvable:$true] %s56_s15  ;;  %s70_s2 = int_to_ptr.vmem [resolvable:$true] %s69_s2 }
   0xf   :  { %62 = dma.hbm_to_vmem [thread:$0]  %s55_s1, 256, %s57_s15, [#allocation6], %s6772_s25, %s6772_s25, %s6773_s26  }
  0x10   :  { %75 = dma.hbm_to_vmem [thread:$0]  %s68_s13, 256, %s70_s2, [#allocation9], %s6772_s25, %s6772_s25, %s6773_s26  }
  0x11   :  { %6757 = dma.done.wait [#allocation3], 256  }
  0x12   :  { %6758 = vsyncadd [#allocation3], 4294967040 }
  0x13   :  { %6759 = dma.done.wait [#allocation6], 512  }
  0x14   :  { %6760 = vsyncadd [#allocation6], 4294966784 }
  0x15   :  { %6761 = dma.done.wait [#allocation9], 256  }
  0x16   :  { %6762 = vsyncadd [#allocation9], 4294967040  ;;  %v101_v0 = vlaneseq  ;;  %v97_v2 = vld [vmem:[#allocation2 + $0x4] sm:$0xf]  ;;  %v96_v3 = vld [vmem:[#allocation2] sm:$0xf] }
  0x17   :  { %v128_v4 = vperm.slane %v97_v2, 0  ;;  %v114_v5 = vperm.slane %v96_v3, 2  ;;  %v100_v6 = vperm.slane %v96_v3, 0  ;;  %v135_v7 = vperm.slane %v97_v2, 1  ;;  %v98_v10 = vld [vmem:[#allocation2 + $0x8] sm:$0xf] }
  0x18   :  { %v102_v1 = vshrl.u32 %v101_v0, 7  ;;  %v121_v8 = vperm.slane %v96_v3, 3  ;;  %v107_v9 = vperm.slane %v96_v3, 1  ;;  %v156_v11 = vperm.slane %v98_v10, 0  ;;  %v99_v17 = vld [vmem:[#allocation2 + $0xc] sm:$0xf] }
  0x19   :  { %v149_v12 = vperm.slane %v97_v2, 3  ;;  %v142_v13 = vperm.slane %v97_v2, 2  ;;  %v177_v14 = vperm.slane %v98_v10, 3  ;;  %v170_v15 = vperm.slane %v98_v10, 2  ;;  %v212_v21 = vld [vmem:[#allocation5] sm:$0xf] }
  0x1a   :  { %6438 = vset.pattern.permute.xlu2 %v102_v1  ;;  %6437 = vset.pattern.permute.xlu1 %v102_v1  ;;  %v163_v16 = vperm.slane %v98_v10, 1  ;;  %v198_v18 = vperm.slane %v99_v17, 2  ;;  %v191_v19 = vperm.slane %v99_v17, 1  ;;  %v184_v20 = vperm.slane %v99_v17, 0  ;;  %v213_v25 = vld [vmem:[#allocation5 + $0x4] sm:$0xf] }
  0x1b   :  { %6436 = vset.pattern.permute.xlu0 %v102_v1  ;;  %v223_v22 = vperm.slane %v212_v21, 1  ;;  %v216_v23 = vperm.slane %v212_v21, 0  ;;  %v205_v24 = vperm.slane %v99_v17, 3  ;;  %v244_v26 = vperm.slane %v213_v25, 0  ;;  %v214_v32 = vld [vmem:[#allocation5 + $0x8] sm:$0xf] }
  0x1c   :  { %v237_v27 = vperm.slane %v212_v21, 3  ;;  %v230_v28 = vperm.slane %v212_v21, 2  ;;  %v265_v29 = vperm.slane %v213_v25, 3  ;;  %v258_v30 = vperm.slane %v213_v25, 2  ;;  %v215_v36 = vld [vmem:[#allocation5 + $0xc] sm:$0xf] }
  0x1d   :  { %v251_v31 = vperm.slane %v213_v25, 1  ;;  %v286_v33 = vperm.slane %v214_v32, 2  ;;  %v279_v34 = vperm.slane %v214_v32, 1  ;;  %v272_v35 = vperm.slane %v214_v32, 0  ;;  %v328_v40 = vld [vmem:[#allocation7] sm:$0xf] }
  0x1e   :  { %v307_v37 = vperm.slane %v215_v36, 1  ;;  %v300_v38 = vperm.slane %v215_v36, 0  ;;  %v293_v39 = vperm.slane %v214_v32, 3  ;;  %v332_v41 = vperm.slane %v328_v40, 0  ;;  %v329_v47 = vld [vmem:[#allocation7 + $0x4] sm:$0xf] }
  0x1f   :  { %v321_v42 = vperm.slane %v215_v36, 3  ;;  %v314_v43 = vperm.slane %v215_v36, 2  ;;  %v353_v44 = vperm.slane %v328_v40, 3  ;;  %v346_v45 = vperm.slane %v328_v40, 2  ;;  %v330_v52 = vld [vmem:[#allocation7 + $0x8] sm:$0xf] }
  0x20   :  { %v339_v46 = vperm.slane %v328_v40, 1  ;;  %v374_v49 = vperm.slane %v329_v47, 2  ;;  %v367_v50 = vperm.slane %v329_v47, 1  ;;  %v360_v51 = vperm.slane %v329_v47, 0  ;;  %v331_v57 = vld [vmem:[#allocation7 + $0xc] sm:$0xf] }
  0x21   :  { %v395_v54 = vperm.slane %v330_v52, 1  ;;  %v388_v55 = vperm.slane %v330_v52, 0  ;;  %v381_v56 = vperm.slane %v329_v47, 3  ;;  %v416_v59 = vperm.slane %v331_v57, 0  ;;  %v444_v3 = vld [vmem:[#allocation8] sm:$0xf] }
  0x22   :  { %133 = vperm.xlu2 %6438, %v128_v4   ;;  %119 = vperm.xlu1 %6437, %v114_v5   ;;  %v409_v60 = vperm.slane %v330_v52, 3  ;;  %v402_v61 = vperm.slane %v330_v52, 2  ;;  %v437_v0 = vperm.slane %v331_v57, 3  ;;  %v430_v1 = vperm.slane %v331_v57, 2  ;;  %v6896_v10 = vld [vmem:[%s9673_s5] ss:$0 sm:$0xff] }
  0x23   :  { %105 = vperm.xlu0 %6436, %v100_v6   ;;  %v423_v2 = vperm.slane %v331_v57, 1  ;;  %v462_v5 = vperm.slane %v444_v3, 2  ;;  %v455_v6 = vperm.slane %v444_v3, 1  ;;  %s6283_s19 = sshll.u32 %s9679_s11, 4  ;;  %s6785_s11 = smov [#allocation10]   ;;  %s6284_s19 = int_to_ptr.hbm [resolvable:$true] %s6283_s19 }
  0x24   :  { %s9596_s20 = sshll.u32 %s6785_s11, 4  ;;  %s6218_s23 = sshll.u32 %s9674_s6, 4  ;;  %s6217_s20 = int_to_ptr.vmem [resolvable:$true] %s9596_s20  ;;  %s6219_s23 = int_to_ptr.hbm [resolvable:$true] %s6218_s23 }
  0x25   :  { %s6786_s24 = smov [#allocation11]   ;;  %s6231_s29 = sshll.u32 %s9675_s7, 4  ;;  %s6232_s29 = int_to_ptr.hbm [resolvable:$true] %s6231_s29 }
  0x26   :  { %s9606_s27 = sshll.u32 %s6786_s24, 4  ;;  %s6787_s7 = smov [#allocation13]   ;;  %s6230_s27 = int_to_ptr.vmem [resolvable:$true] %s9606_s27 }
  0x27   :  { %s6242_s30 = sshll.u32 %s6787_s7, 4  ;;  %s6244_s12 = sshll.u32 %s9676_s8, 4  ;;  %s6243_s30 = int_to_ptr.vmem [resolvable:$true] %s6242_s30  ;;  %s6245_s12 = int_to_ptr.hbm [resolvable:$true] %s6244_s12 }
  0x28   :  { %s6788_s13 = smov [#allocation14]   ;;  %s6789_s2 = smov [#allocation16]  }
  0x29   :  { %s6255_s14 = sshll.u32 %s6788_s13, 4  ;;  %s6270_s18 = sshll.u32 %s9678_s10, 4  ;;  %s6256_s14 = int_to_ptr.vmem [resolvable:$true] %s6255_s14  ;;  %s6271_s18 = int_to_ptr.hbm [resolvable:$true] %s6270_s18 }
  0x2a   :  { %140 = vperm.xlu2 %6438, %v135_v7   ;;  %126 = vperm.xlu1 %6437, %v121_v8   ;;  %v448_v7 = vperm.slane %v444_v3, 0 }
  0x2b   :  { %112 = vperm.xlu0 %6436, %v107_v9   ;;  %v6891_v9 = vld [vmem:[%s9672_s4] ss:$0 sm:$0xff] }
  0x32   :  { %161 = vperm.xlu2 %6438, %v156_v11   ;;  %154 = vperm.xlu1 %6437, %v149_v12   ;;  %v6901_v12 = vld [vmem:[#allocation8 + $0x4] sm:$0xf] }
  0x33   :  { %147 = vperm.xlu0 %6436, %v142_v13   ;;  %v476_v17 = vperm.slane %v6901_v12, 0 }
  0x3a   :  { %182 = vperm.xlu2 %6438, %v177_v14   ;;  %175 = vperm.xlu1 %6437, %v170_v15  }
  0x3b   :  { %168 = vperm.xlu0 %6436, %v163_v16   ;;  %v483_v16 = vperm.slane %v6901_v12, 1 }
  0x42   :  { %203 = vperm.xlu2 %6438, %v198_v18   ;;  %196 = vperm.xlu1 %6437, %v191_v19   ;;  %v469_v18 = vperm.slane %v444_v3, 3 }
  0x43   :  { %189 = vperm.xlu0 %6436, %v184_v20  }
  0x4a   :  { %228 = vperm.xlu2 %6438, %v223_v22   ;;  %221 = vperm.xlu1 %6437, %v216_v23  }
  0x4b   :  { %210 = vperm.xlu0 %6436, %v205_v24  }
  0x52   :  { %249 = vperm.xlu2 %6438, %v244_v26   ;;  %242 = vperm.xlu1 %6437, %v237_v27  }
  0x53   :  { %235 = vperm.xlu0 %6436, %v230_v28  }
  0x5a   :  { %270 = vperm.xlu2 %6438, %v265_v29   ;;  %263 = vperm.xlu1 %6437, %v258_v30  }
  0x5b   :  { %256 = vperm.xlu0 %6436, %v251_v31  }
  0x62   :  { %291 = vperm.xlu2 %6438, %v286_v33   ;;  %284 = vperm.xlu1 %6437, %v279_v34  }
  0x63   :  { %277 = vperm.xlu0 %6436, %v272_v35  }
  0x6a   :  { %312 = vperm.xlu2 %6438, %v307_v37   ;;  %305 = vperm.xlu1 %6437, %v300_v38  }
  0x6b   :  { %298 = vperm.xlu0 %6436, %v293_v39  }
  0x72   :  { %337 = vperm.xlu2 %6438, %v332_v41   ;;  %326 = vperm.xlu1 %6437, %v321_v42  }
  0x73   :  { %319 = vperm.xlu0 %6436, %v314_v43  }
  0x7a   :  { %358 = vperm.xlu2 %6438, %v353_v44   ;;  %351 = vperm.xlu1 %6437, %v346_v45  }
  0x7b   :  { %344 = vperm.xlu0 %6436, %v339_v46  }
  0x7c   :  { %v6874_v48 = vpop.permute.xlu2 %133 }
  0x7d   :  { %v6916_v26 = vsub.f32 0.0, %v6874_v48 }
  0x7f   :  { %9747 = vst [vmem:[#allocation29_spill] sm:$0xff] %v6916_v26  ;;  %v601_v33 = vmul.f32 %v6916_v26, %v6916_v26 }
  0x82   :  { %379 = vperm.xlu2 %6438, %v374_v49   ;;  %372 = vperm.xlu1 %6437, %v367_v50   ;;  %v9689_v49 = vmov 683565275  }
  0x83   :  { %365 = vperm.xlu0 %6436, %v360_v51   ;;  %v9685_v51 = vmov 2475754826  }
  0x84   :  { %v6876_v53 = vpop.permute.xlu2 %140 }
  0x8a   :  { %400 = vperm.xlu2 %6438, %v395_v54   ;;  %393 = vperm.xlu1 %6437, %v388_v55   ;;  %v9691_v54 = vmov 2131351028  }
  0x8b   :  { %386 = vperm.xlu0 %6436, %v381_v56  }
  0x8c   :  { %v6878_v58 = vpop.permute.xlu2 %161 }
  0x92   :  { %421 = vperm.xlu2 %6438, %v416_v59   ;;  %414 = vperm.xlu1 %6437, %v409_v60   ;;  %v9683_v60 = vmov 2102212464  }
  0x93   :  { %407 = vperm.xlu0 %6436, %v402_v61  }
  0x94   :  { %v6880_v62 = vpop.permute.xlu2 %182 }
  0x95   :  { %9744 = vst [vmem:[#allocation26_spill] sm:$0xff] %v6880_v62  ;;  %v6882_v63 = vpop.permute.xlu0 %105 }
  0x9a   :  { %442 = vperm.xlu2 %6438, %v437_v0   ;;  %435 = vperm.xlu1 %6437, %v430_v1   ;;  %v9695_v1 = vmov 920167782  }
  0x9b   :  { %428 = vperm.xlu0 %6436, %v423_v2  }
  0x9c   :  { %v6884_v4 = vpop.permute.xlu2 %203 }
  0x9d   :  { %9745 = vst [vmem:[#allocation27_spill] sm:$0xff] %v6884_v4  ;;  %v6886_v8 = vpop.permute.xlu0 %112 }
  0x9e   :  { %v6899_v11 = vsub.f32 0.0, %v6886_v8 }
  0xa0   :  { %9746 = vst [vmem:[#allocation28_spill] sm:$0xff] %v6899_v11  ;;  %v598_v19 = vmul.f32 %v6899_v11, %v6899_v11 }
  0xa2   :  { %467 = vperm.xlu2 %6438, %v462_v5   ;;  %460 = vperm.xlu1 %6437, %v455_v6   ;;  %v9680_v5 = vmov 1326507024  }
  0xa3   :  { %453 = vperm.xlu0 %6436, %v448_v7  }
  0xa4   :  { %v229_v13 = vpop.permute.xlu2 %228 }
  0xa5   :  { %v582_v14 = vsub.f32 %v6891_v9, %v229_v13  ;;  %v6905_v15 = vmul.f32 %v6896_v10, %v229_v13 }
  0xa7   :  { %v614_v20 = vmul.f32 %v582_v14, %v582_v14  ;;  %v1358_v21 = vand.u32 2147483647, %v6905_v15  ;;  %v1361_v22 = vand.u32 2139095040, %v6905_v15 }
  0xa9   :  { %v630_v23 = vadd.f32 %v614_v20, %v598_v19  ;;  %v1362_v24 = vshrl.u32 %v1361_v22, 23  ;;  %v1365_v25 = vand.u32 8388607, %v1358_v21 }
  0xaa   :  { %488 = vperm.xlu2 %6438, %v483_v16   ;;  %481 = vperm.xlu1 %6437, %v476_v17  }
  0xab   :  { %6441 = vrcp.f32 %v630_v23  ;;  %v6324_v27 = vadd.s32 4294967169, %v1362_v24  ;;  %v1366_v28 = vor.u32 8388608, %v1365_v25  ;;  %474 = vperm.xlu0 %6436, %v469_v18  }
  0xac   :  { %v250_v29 = vpop.permute.xlu2 %249 }
  0xad   :  { %v1368_v30 = vadd.s32 1, %v6324_v27  ;;  %v6919_v31 = vsub.f32 %v6891_v9, %v250_v29  ;;  %v6922_v32 = vmul.f32 %v6896_v10, %v250_v29  ;;  %v6926_v34 = vshll.u32 %v1366_v28, 8 }
  0xaf   :  { %vm1369_vm0 = vcmp.gt.s32.totalorder %v1368_v30, 0  ;;  %v617_v35 = vmul.f32 %v6919_v31, %v6919_v31  ;;  %v1820_v37 = vand.u32 2147483647, %v6922_v32  ;;  %v1823_v38 = vand.u32 2139095040, %v6922_v32 }
  0xb0   :  { %v1370_v36 = vsel %vm1369_vm0, %v1368_v30, 0  ;;  %v1407_v45 = vand.u32 65535, %v6926_v34  ;;  %v1408_v46 = vshrl.u32 %v6926_v34, 16 }
  0xb1   :  { %v6932_v39 = vpop.eup %6441  ;;  %v1372_v40 = vand.u32 31, %v1370_v36  ;;  %v633_v41 = vadd.f32 %v617_v35, %v601_v33  ;;  %v1371_v43 = vshrl.u32 %v1370_v36, 5  ;;  %v1824_v47 = vshrl.u32 %v1823_v38, 23 }
  0xb2   :  { %9748 = vst [vmem:[#allocation30_spill] sm:$0xff] %v6932_v39  ;;  %v6935_v42 = vmul.f32 %v6932_v39, %v582_v14  ;;  %v6944_v56 = vand.u32 8388607, %v1820_v37 }
  0xb3   :  { %v1373_v44 = vsub.s32 32, %v1372_v40  ;;  %v1375_v50 = vshll.u32 %v9689_v49, %v1372_v40  ;;  %v1378_v52 = vshll.u32 %v9685_v51, %v1372_v40  ;;  %v1381_v55 = vshll.u32 %v9691_v54, %v1372_v40 }
  0xb4   :  { %9749 = vst [vmem:[#allocation31_spill] sm:$0xff] %v6935_v42  ;;  %v1384_v0 = vshll.u32 %v9683_v60, %v1372_v40  ;;  %v1387_v3 = vshll.u32 %v9695_v1, %v1372_v40  ;;  %vm1390_vm1 = vcmp.lt.s32.totalorder %v1371_v43, 1  ;;  %6443 = vrcp.f32 %v633_v41 }
  0xb5   :  { %v1376_v57 = vshrl.u32 %v9685_v51, %v1373_v44  ;;  %v1379_v59 = vshrl.u32 %v9691_v54, %v1373_v44  ;;  %v1382_v61 = vshrl.u32 %v9683_v60, %v1373_v44  ;;  %v1385_v2 = vshrl.u32 %v9695_v1, %v1373_v44 }
  0xb6   :  { %v1388_v6 = vshrl.u32 %v9680_v5, %v1373_v44  ;;  %vm1393_vm2 = vcmp.lt.s32.totalorder %v1371_v43, 4  ;;  %v6333_v18 = vadd.s32 4294967169, %v1824_v47  ;;  %v1374_v19 = vshrl.u32 %v9689_v49, %v1373_v44 }
  0xb7   :  { %v1377_v7 = vor.u32 %v1376_v57, %v1375_v50  ;;  %v1380_v13 = vor.u32 %v1379_v59, %v1378_v52  ;;  %v1383_v14 = vor.u32 %v1382_v61, %v1381_v55  ;;  %v1386_v16 = vor.u32 %v1385_v2, %v1384_v0 }
  0xb8   :  { %v1389_v17 = vor.u32 %v1388_v6, %v1387_v3  ;;  %vm1392_vm3 = vcmp.lt.s32.totalorder %v1371_v43, 3  ;;  %v1830_v27 = vadd.s32 1, %v6333_v18  ;;  %vm1391_vm4 = vcmp.lt.s32.totalorder %v1371_v43, 2 }
  0xb9   :  { %v1395_v20 = vsel %vm1393_vm2, %v1383_v14, 2102212464  ;;  %v1398_v22 = vsel %vm1390_vm1, %v1377_v7, %v1380_v13  ;;  %v1402_v23 = vsel %vm1390_vm1, %v1380_v13, %v1383_v14  ;;  %v1399_v24 = vsel %vm1393_vm2, %v1386_v16, 920167782 }
  0xba   :  { %v1403_v25 = vsel %vm1393_vm2, %v1389_v17, 1326507024  ;;  %v1394_v28 = vsel %vm1390_vm1, %v1374_v19, %v1377_v7  ;;  %v1400_v29 = vsel %vm1392_vm3, %v1383_v14, %v1399_v24  ;;  %v1396_v33 = vsel %vm1392_vm3, %v1380_v13, %v1395_v20  ;;  %v6957_v38 = vpop.eup %6443 }
  0xbb   :  { %v1404_v30 = vsel %vm1392_vm3, %v1386_v16, %v1403_v25  ;;  %v1401_v35 = vsel %vm1391_vm4, %v1398_v22, %v1400_v29  ;;  %vm1831_vm5 = vcmp.gt.s32.totalorder %v1830_v27, 0  ;;  %9750 = vst [vmem:[#allocation32_spill] sm:$0xff] %v6957_v38  ;;  %v6961_v50 = vmul.f32 %v6957_v38, %v6919_v31  ;;  %v6966_v22 = vpop.permute.xlu1 %119 }
  0xbc   :  { %v1405_v36 = vsel %vm1391_vm4, %v1402_v23, %v1404_v30  ;;  %v1431_v44 = vand.u32 65535, %v1401_v35  ;;  %v1432_v47 = vshrl.u32 %v1401_v35, 16  ;;  %v1828_v52 = vor.u32 8388608, %v6944_v56 }
  0xbd   :  { %v1409_v40 = vand.u32 65535, %v1405_v36  ;;  %v1410_v41 = vshrl.u32 %v1405_v36, 16  ;;  %9751 = vst [vmem:[#allocation33_spill] sm:$0xff] %v6961_v50  ;;  %v6964_v43 = vsel %vm1391_vm4, %v1394_v28, %v1396_v33  ;;  %v1832_v59 = vsel %vm1831_vm5, %v1830_v27, 0 }
  0xbe   :  { %v1434_v2 = vmul.u32 %v1432_v47, %v1407_v45  ;;  %v1435_v3 = vmul.u32 %v1431_v44, %v1408_v46  ;;  %v1433_v13 = vmul.u32 %v1431_v44, %v1407_v45  ;;  %v1436_v14 = vmul.u32 %v1432_v47, %v1408_v46 }
  0xbf   :  { %v1412_v55 = vmul.u32 %v1410_v41, %v1407_v45  ;;  %v1413_v57 = vmul.u32 %v1409_v40, %v1408_v46  ;;  %v1411_v61 = vmul.u32 %v1409_v40, %v1407_v45  ;;  %v1414_v0 = vmul.u32 %v1410_v41, %v1408_v46 }
  0xc0   :  { %v1437_v18 = vshll.u32 %v1434_v2, 16  ;;  %v1438_v31 = vshrl.u32 %v1434_v2, 16  ;;  %v1439_v56 = vshll.u32 %v1435_v3, 16  ;;  %v1834_v20 = vand.u32 31, %v1832_v59 }
  0xc1   :  { %v1415_v6 = vshll.u32 %v1412_v55, 16  ;;  %v1416_v7 = vshrl.u32 %v1412_v55, 16  ;;  %v1417_v16 = vshll.u32 %v1413_v57, 16  ;;  %v1418_v17 = vshrl.u32 %v1413_v57, 16 }
  0xc2   :  { %v9687_v23 = vmov 0   ;;  %v1440_v25 = vshrl.u32 %v1435_v3, 16  ;;  %vm1441_vm7 = vc.u32 %v1433_v13, %v1437_v18  ;;  %v1443_v27 = vadd.s32 %v1437_v18, %v1433_v13 }
  0xc3   :  { %vm1419_vm6 = vc.u32 %v1411_v61, %v1415_v6  ;;  %v1421_v19 = vadd.s32 %v1415_v6, %v1411_v61  ;;  %v1442_v45 = vsel %vm1441_vm7, 1, %v9687_v23  ;;  %v6970_v46 = vsub.s32 32, %v1834_v20 }
  0xc4   :  { %v1420_v24 = vsel %vm1419_vm6, 1, %v9687_v23  ;;  %v1444_v30 = vadd.s32 %v1442_v45, %v1436_v14  ;;  %vm1445_vm9 = vc.u32 %v1443_v27, %v1439_v56  ;;  %v6973_v33 = vshrl.u32 %v1832_v59, 5 }
  0xc5   :  { %v1422_v28 = vadd.s32 %v1420_v24, %v1414_v0  ;;  %vm1423_vm8 = vc.u32 %v1421_v19, %v1417_v16  ;;  %v1446_v36 = vsel %vm1445_vm9, 1, %v9687_v23  ;;  %v6976_v40 = vadd.s32 %v1443_v27, %v1439_v56 }
  0xc6   :  { %v1424_v29 = vsel %vm1423_vm8, 1, %v9687_v23  ;;  %v1837_v41 = vshll.u32 %v9689_v49, %v1834_v20  ;;  %v1448_v44 = vadd.s32 %v1446_v36, %v1444_v30  ;;  %v1838_v47 = vshrl.u32 %v9685_v51, %v6970_v46 }
  0xc7   :  { %v1426_v35 = vadd.s32 %v1424_v29, %v1422_v28  ;;  %v1840_v55 = vshll.u32 %v9685_v51, %v1834_v20  ;;  %v1841_v57 = vshrl.u32 %v9691_v54, %v6970_v46  ;;  %v1843_v59 = vshll.u32 %v9691_v54, %v1834_v20  ;;  %v7004_v28 = vpop.permute.xlu1 %126 }
  0xc8   :  { %v1844_v0 = vshrl.u32 %v9683_v60, %v6970_v46  ;;  %v1846_v2 = vshll.u32 %v9683_v60, %v1834_v20  ;;  %v1449_v3 = vadd.s32 %v1448_v44, %v1438_v31  ;;  %v6988_v6 = vor.u32 %v1838_v47, %v1837_v41 }
  0xc9   :  { %v1427_v61 = vadd.s32 %v1426_v35, %v1416_v7  ;;  %v6990_v13 = vor.u32 %v1841_v57, %v1840_v55  ;;  %v1847_v14 = vshrl.u32 %v9695_v1, %v6970_v46  ;;  %v1849_v7 = vshll.u32 %v9695_v1, %v1834_v20 }
  0xca   :  { %v1845_v18 = vor.u32 %v1844_v0, %v1843_v59  ;;  %v1850_v19 = vshrl.u32 %v9680_v5, %v6970_v46  ;;  %v1450_v56 = vadd.s32 %v1449_v3, %v1440_v25  ;;  %vm1852_vm11 = vcmp.lt.s32.totalorder %v6973_v33, 1 }
  0xcb   :  { %v6994_v16 = vadd.s32 %v1427_v61, %v1418_v17  ;;  %v1848_v24 = vor.u32 %v1847_v14, %v1846_v2  ;;  %v7002_v27 = vshll.u32 %v1828_v52, 8  ;;  %v1451_v17 = vmul.u32 %v6926_v34, %v6964_v43 }
  0xcc   :  { %v1851_v31 = vor.u32 %v1850_v19, %v1849_v7  ;;  %v1454_v45 = vadd.s32 1, %v1450_v56  ;;  %vm1855_vm12 = vcmp.lt.s32.totalorder %v6973_v33, 4  ;;  %v1860_v20 = vsel %vm1852_vm11, %v6988_v6, %v6990_v13 }
  0xcd   :  { %vm1453_vm10 = vc.u32 %v6994_v16, %v6976_v40  ;;  %vm1854_vm13 = vcmp.lt.s32.totalorder %v6973_v33, 3  ;;  %v1861_v25 = vsel %vm1855_vm12, %v1848_v24, 920167782  ;;  %v1864_v52 = vsel %vm1852_vm11, %v6990_v13, %v1845_v18 }
  0xce   :  { %v1865_v34 = vsel %vm1855_vm12, %v1851_v31, 1326507024  ;;  %v1455_v43 = vsel %vm1453_vm10, %v1454_v45, %v1450_v56  ;;  %vm1853_vm14 = vcmp.lt.s32.totalorder %v6973_v33, 2  ;;  %v1862_v29 = vsel %vm1854_vm13, %v1845_v18, %v1861_v25 }
  0xcf   :  { %v1866_v30 = vsel %vm1854_vm13, %v1848_v24, %v1865_v34  ;;  %v1456_v35 = vadd.s32 %v1455_v43, %v1451_v17  ;;  %v1863_v36 = vsel %vm1853_vm14, %v1860_v20, %v1862_v29  ;;  %v1869_v44 = vand.u32 65535, %v7002_v27  ;;  %v7035_v45 = vpop.permute.xlu1 %154 }
  0xd0   :  { %v1867_v41 = vsel %vm1853_vm14, %v1864_v52, %v1866_v30  ;;  %v1870_v47 = vshrl.u32 %v7002_v27, 16  ;;  %v1894_v61 = vshrl.u32 %v1863_v36, 16  ;;  %v1893_v3 = vand.u32 65535, %v1863_v36 }
  0xd1   :  { %v1871_v55 = vand.u32 65535, %v1867_v41  ;;  %v1872_v57 = vshrl.u32 %v1867_v41, 16  ;;  %v1457_v59 = vadd.s32 536870912, %v1456_v35  ;;  %v7039_v41 = vsub.f32 0.0, %v7035_v45 }
  0xd2   :  { %v1896_v7 = vmul.u32 %v1894_v61, %v1869_v44  ;;  %v1895_v52 = vmul.u32 %v1893_v3, %v1869_v44  ;;  %v1897_v29 = vmul.u32 %v1893_v3, %v1870_v47  ;;  %vm1360_vm6 = vcmp.lt.s32.totalorder %v6905_v15, 0 }
  0xd3   :  { %v1874_v0 = vmul.u32 %v1872_v57, %v1869_v44  ;;  %v1875_v2 = vmul.u32 %v1871_v55, %v1870_v47  ;;  %v7032_v14 = vshrl.u32 %v1457_v59, 30  ;;  %v1873_v19 = vmul.u32 %v1871_v55, %v1869_v44  ;;  %9752 = vst [vmem:[#allocation34_spill] sm:$0xff] %v7039_v41 }
  0xd4   :  { %v1876_v31 = vmul.u32 %v1872_v57, %v1870_v47  ;;  %v1899_v17 = vshll.u32 %v1896_v7, 16  ;;  %v1898_v57 = vmul.u32 %v1894_v61, %v1870_v47  ;;  %v1901_v44 = vshll.u32 %v1897_v29, 16  ;;  %v446_v61 = vld [vmem:[#allocation8 + $0x8] sm:$0xf] }
  0xd5   :  { %v1877_v56 = vshll.u32 %v1874_v0, 16  ;;  %v1459_v24 = vshll.u32 %v7032_v14, 30  ;;  %v1879_v20 = vshll.u32 %v1875_v2, 16  ;;  %v1878_v47 = vshrl.u32 %v1874_v0, 16 }
  0xd6   :  { %vm1903_vm1 = vc.u32 %v1895_v52, %v1899_v17  ;;  %v1905_v5 = vadd.s32 %v1899_v17, %v1895_v52  ;;  %vm1359_vm7 = vcmp.le.f32.partialorder %v1358_v21, 0.7853982  ;;  %vm1822_vm9 = vcmp.lt.s32.totalorder %v6922_v32, 0 }
  0xd7   :  { %vm1881_vm15 = vc.u32 %v1873_v19, %v1877_v56  ;;  %v1883_v25 = vadd.s32 %v1877_v56, %v1873_v19  ;;  %v1460_v34 = vsub.s32 %v1456_v35, %v1459_v24  ;;  %v1904_v59 = vsel %vm1903_vm1, 1, %v9687_v23 }
  0xd8   :  { %v1882_v43 = vsel %vm1881_vm15, 1, %v9687_v23  ;;  %v1857_v35 = vsel %vm1855_vm12, %v1845_v18, 2102212464  ;;  %v1836_v56 = vshrl.u32 %v9689_v49, %v6970_v46  ;;  %vm1907_vm3 = vc.u32 %v1905_v5, %v1901_v44 }
  0xd9   :  { %v1884_v30 = vadd.s32 %v1882_v43, %v1876_v31  ;;  %vm1885_vm0 = vc.u32 %v1883_v25, %v1879_v20  ;;  %vm1461_vm2 = vcmp.lt.s32.totalorder %v1460_v34, 0  ;;  %v1462_v36 = vsub.s32 0, %v1460_v34  ;;  %v7047_v20 = vld [vmem:[#allocation8 + $0xc] sm:$0xf]  ;;  %v271_v43 = vpop.permute.xlu2 %270 }
  0xda   :  { %v1886_v55 = vsel %vm1885_vm0, 1, %v9687_v23  ;;  %v1906_v31 = vadd.s32 %v1904_v59, %v1898_v57  ;;  %v604_v25 = vmul.f32 %v7039_v41, %v7039_v41  ;;  %v1856_v18 = vsel %vm1852_vm11, %v1836_v56, %v6988_v6 }
  0xdb   :  { %v1463_v19 = vsel %vm1461_vm2, %v1462_v36, %v1460_v34  ;;  %v1888_v24 = vadd.s32 %v1886_v55, %v1884_v30  ;;  %v1858_v52 = vsel %vm1854_vm13, %v6990_v13, %v1857_v35  ;;  %v1880_v46 = vshrl.u32 %v1875_v2, 16 }
  0xdc   :  { %v1464_v3 = vclz %v1463_v19  ;;  %v1900_v36 = vshrl.u32 %v1896_v7, 16  ;;  %v1908_v55 = vsel %vm1907_vm3, 1, %v9687_v23  ;;  %v532_v57 = vperm.slane %v7047_v20, 0 }
  0xdd   :  { %v1889_v30 = vadd.s32 %v1888_v24, %v1878_v47  ;;  %v1910_v0 = vadd.s32 %v1908_v55, %v1906_v31  ;;  %v511_v59 = vperm.slane %v446_v61, 1  ;;  %v504_v19 = vperm.slane %v446_v61, 0 }
  0xde   :  { %v6325_v17 = vadd.s32 4294967294, %v1464_v3  ;;  %v1452_v3 = vadd.s32 %v6976_v40, %v6994_v16  ;;  %537 = vperm.xlu2 %6438, %v532_v57   ;;  %v588_v13 = vsub.f32 %v6891_v9, %v271_v43  ;;  %v1902_v7 = vshrl.u32 %v1897_v29, 16 }
  0xdf   :  { %v7061_v56 = vadd.s32 %v1889_v30, %v1880_v46  ;;  %v1911_v24 = vadd.s32 %v1910_v0, %v1900_v36  ;;  %516 = vperm.xlu1 %6437, %v511_v59   ;;  %509 = vperm.xlu0 %6436, %v504_v19   ;;  %v1859_v31 = vsel %vm1853_vm14, %v1856_v18, %v1858_v52  ;;  %vm7117_vm11 = vcmp.le.f32.partialorder %v1820_v37, 0.7853982 }
  0xe0   :  { %vm6326_vm4 = vcmp.lt.s32.totalorder %v6325_v17, 0  ;;  %v7066_v47 = vadd.s32 %v1905_v5, %v1901_v44  ;;  %v620_v55 = vmul.f32 %v588_v13, %v588_v13  ;;  %v7069_v40 = vmul.f32 %v6896_v10, %v271_v43 }
  0xe1   :  { %v1467_v6 = vsel %vm6326_vm4, 0, %v6325_v17  ;;  %v1912_v30 = vadd.s32 %v1911_v24, %v1902_v7  ;;  %v1913_v33 = vmul.u32 %v7002_v27, %v1859_v31  ;;  %v1482_v44 = vsub.s32 4, %v7032_v14 }
  0xe2   :  { %v1468_v2 = vsub.s32 32, %v1467_v6  ;;  %v1472_v35 = vsub.s32 4294967266, %v1467_v6  ;;  %v1469_v16 = vshll.u32 %v1460_v34, %v1467_v6  ;;  %vm1915_vm5 = vc.u32 %v7061_v56, %v7066_v47 }
  0xe3   :  { %v636_v29 = vadd.f32 %v620_v55, %v604_v25  ;;  %v2285_v36 = vand.u32 2139095040, %v7069_v40  ;;  %v1916_v5 = vadd.s32 1, %v1912_v30  ;;  %v9682_v18 = vand.u32 2147483647, %v7069_v40 }
  0xe4   :  { %v1470_v17 = vshrl.u32 %v1452_v3, %v1468_v2  ;;  %v1473_v46 = vadd.s32 127, %v1472_v35  ;;  %v1144_v59 = vmul.f32 %v6896_v10, %v6874_v48  ;;  %v518_v2 = vperm.slane %v446_v61, 2 }
  0xe5   :  { %6445 = vrcp.f32 %v636_v29  ;;  %v2286_v34 = vshrl.u32 %v2285_v36, 23  ;;  %v1917_v43 = vsel %vm1915_vm5, %v1916_v5, %v1912_v30  ;;  %v1483_v27 = vsel %vm1360_vm6, %v1482_v44, %v7032_v14 }
  0xe6   :  { %v1471_v57 = vor.u32 %v1470_v17, %v1469_v16  ;;  %v1474_v0 = vshll.u32 %v1473_v46, 23  ;;  %v1918_v19 = vadd.s32 %v1917_v43, %v1913_v33  ;;  %v2289_v7 = vand.u32 8388607, %v9682_v18  ;;  %523 = vperm.xlu2 %6438, %v518_v2  }
  0xe7   :  { %v6342_v25 = vadd.s32 4294967169, %v2286_v34  ;;  %v1141_v31 = vmul.f32 %v6896_v10, %v6886_v8  ;;  %v490_v55 = vperm.slane %v6901_v12, 2  ;;  %v1180_v17 = vmul.f32 1.442695, %v1144_v59 }
  0xe8   :  { %v1475_v52 = vor.u32 4788187, %v1474_v0  ;;  %v1478_v6 = vcvt.s32.f32 %v1471_v57  ;;  %v1919_v35 = vadd.s32 536870912, %v1918_v19  ;;  %v1485_v46 = vsel %vm1359_vm7, 0, %v1483_v27 }
  0xe9   :  { %v2292_v24 = vadd.s32 1, %v6342_v25  ;;  %495 = vperm.xlu1 %6437, %v490_v55   ;;  %v2290_v36 = vor.u32 8388608, %v2289_v7  ;;  %v1174_v12 = vmul.f32 1.442695, %v1141_v31  ;;  %v539_v33 = vperm.slane %v7047_v20, 1 }
  0xea   :  { %v1476_v3 = vand.u32 2147483647, %v1475_v52  ;;  %v1920_v61 = vshrl.u32 %v1919_v35, 30  ;;  %v3999_v5 = vadd.s32 3, %v1485_v46  ;;  %6447 = vpow2.f32 %v1180_v17 }
  0xeb   :  { %v7088_v16 = vpop.eup %6445  ;;  %vm2293_vm8 = vcmp.gt.s32.totalorder %v2292_v24, 0  ;;  %544 = vperm.xlu0 %6436, %v539_v33   ;;  %v7113_v43 = vshll.u32 %v2290_v36, 8  ;;  %6449 = vpow2.f32 %v1174_v12  ;;  %v1914_v37 = vadd.s32 %v7066_v47, %v7061_v56 }
  0xec   :  { %v1479_v48 = vmul.f32 %v1478_v6, %v1476_v3  ;;  %9753 = vst [vmem:[#allocation35_spill] sm:$0xff] %v7088_v16  ;;  %v7093_v30 = vmul.f32 %v7088_v16, %v588_v13  ;;  %v2294_v29 = vsel %vm2293_vm8, %v2292_v24, 0  ;;  %v1921_v8 = vshll.u32 %v1920_v61, 30 }
  0xed   :  { %v7095_v57 = vand.u32 31, %v2294_v29  ;;  %v1944_v52 = vsub.s32 4, %v1920_v61  ;;  %v7121_v3 = vand.u32 3, %v1485_v46  ;;  %v7123_v6 = vand.u32 3, %v3999_v5 }
  0xee   :  { %v1480_v14 = vxor.u32 2147483648, %v1479_v48  ;;  %9754 = vst [vmem:[#allocation36_spill] sm:$0xff] %v7093_v30  ;;  %v7103_v44 = vsub.s32 %v1918_v19, %v1921_v8  ;;  %v7135_v55 = vand.u32 65535, %v7113_v43  ;;  %v7138_v17 = vshrl.u32 %v7113_v43, 16 }
  0xef   :  { %v7106_v13 = vsub.s32 32, %v7095_v57  ;;  %v1945_v31 = vsel %vm1822_vm9, %v1944_v52, %v1920_v61  ;;  %v7142_v12 = vshrl.u32 %v2294_v29, 5  ;;  %vm1507_vm12 = vcmp.eq.s32.totalorder %v7121_v3, 2 }
  0xf0   :  { %v1481_v0 = vsel %vm1360_vm6, %v1480_v14, %v1479_v48  ;;  %vm1923_vm10 = vcmp.lt.s32.totalorder %v7103_v44, 0  ;;  %v1924_v20 = vsub.s32 0, %v7103_v44  ;;  %v2299_v48 = vshll.u32 %v9689_v49, %v7095_v57  ;;  %v7140_v14 = vpop.eup %6447 }
  0xf1   :  { %v7101_v21 = vsel %vm1359_vm7, %v6905_v15, %v1481_v0  ;;  %v2300_v27 = vshrl.u32 %v9685_v51, %v7106_v13  ;;  %vm4005_vm13 = vcmp.eq.s32.totalorder %v7123_v6, 2  ;;  %v7148_v56 = vsel %vm7117_vm11, 0, %v1945_v31  ;;  %v6450_v33 = vpop.eup %6449 }
  0xf2   :  { %v1486_v34 = vmul.f32 %v7101_v21, %v7101_v21  ;;  %v1925_v2 = vsel %vm1923_vm10, %v1924_v20, %v7103_v44  ;;  %v2302_v61 = vshll.u32 %v9685_v51, %v7095_v57  ;;  %v2303_v0 = vshrl.u32 %v9691_v54, %v7106_v13 }
  0xf3   :  { %v1926_v24 = vclz %v1925_v2  ;;  %v7150_v47 = vor.u32 %v2300_v27, %v2299_v48  ;;  %v2306_v52 = vshrl.u32 %v9683_v60, %v7106_v13  ;;  %vm1504_vm15 = vcmp.eq.s32.totalorder %v7121_v3, 0 }
  0xf4   :  { %v1487_v59 = vmul.f32 -0.001358992, %v1486_v34  ;;  %v1494_v19 = vmul.f32 -0.00019511016, %v1486_v34  ;;  %vm4002_vm0 = vcmp.eq.s32.totalorder %v7123_v6, 0  ;;  %vm1503_vm1 = vcmp.lt.s32.totalorder %v7121_v3, 2 }
  0xf5   :  { %v6334_v36 = vadd.s32 4294967294, %v1926_v24  ;;  %v9757_v2 = vmov 1326507024   ;;  %vm4001_vm2 = vcmp.lt.s32.totalorder %v7123_v6, 2  ;;  %v2305_v31 = vshll.u32 %v9691_v54, %v7095_v57 }
  0xf6   :  { %v1488_v35 = vadd.f32 0.041655596, %v1487_v59  ;;  %v1495_v7 = vadd.f32 0.008332121, %v1494_v19  ;;  %v2308_v59 = vshll.u32 %v9683_v60, %v7095_v57  ;;  %v2309_v19 = vshrl.u32 %v9695_v1, %v7106_v13 }
  0xf7   :  { %vm6335_vm14 = vcmp.lt.s32.totalorder %v6334_v36, 0  ;;  %v2312_v27 = vshrl.u32 %v9757_v2, %v7106_v13  ;;  %vm1501_vm3 = vweird.f32 %v6905_v15  ;;  %v2307_v23 = vor.u32 %v2306_v52, %v2305_v31 }
  0xf8   :  { %v1489_v46 = vmul.f32 %v1488_v35, %v1486_v34  ;;  %v1496_v8 = vmul.f32 %v1495_v7, %v1486_v34  ;;  %v1929_v20 = vsel %vm6335_vm14, 0, %v6334_v36  ;;  %v2311_v36 = vshll.u32 %v9695_v1, %v7095_v57 }
  0xf9   :  { %v1930_v24 = vsub.s32 32, %v1929_v20  ;;  %v1934_v48 = vsub.s32 4294967266, %v1929_v20  ;;  %vm2314_vm4 = vcmp.lt.s32.totalorder %v7142_v12, 1  ;;  %vm2317_vm5 = vcmp.lt.s32.totalorder %v7142_v12, 4 }
  0xfa   :  { %v1490_v5 = vadd.f32 -0.4999988, %v1489_v46  ;;  %v1497_v29 = vadd.f32 -0.16666654, %v1496_v8  ;;  %v2304_v46 = vor.u32 %v2303_v0, %v2302_v61  ;;  %v2310_v8 = vor.u32 %v2309_v19, %v2308_v59 }
  0xfb   :  { %v1935_v51 = vadd.s32 127, %v1934_v48  ;;  %v2313_v49 = vor.u32 %v2312_v27, %v2311_v36  ;;  %vm2315_vm6 = vcmp.lt.s32.totalorder %v7142_v12, 2  ;;  %vm2316_vm7 = vcmp.lt.s32.totalorder %v7142_v12, 3 }
  0xfc   :  { %v1491_v35 = vmul.f32 %v1490_v5, %v1486_v34  ;;  %v1498_v7 = vmul.f32 %v1497_v29, %v1486_v34  ;;  %v1931_v34 = vshll.u32 %v7103_v44, %v1929_v20  ;;  %v1932_v5 = vshrl.u32 %v1914_v37, %v1930_v24  ;;  %v7174_v29 = vpop.permute.xlu1 %175 }
  0xfd   :  { %9758 = vst [vmem:[#allocation37_spill] sm:$0xff] %v7174_v29  ;;  %v1936_v0 = vshll.u32 %v1935_v51, 23  ;;  %v2322_v57 = vsel %vm2314_vm4, %v7150_v47, %v2304_v46  ;;  %v2323_v44 = vsel %vm2317_vm5, %v2310_v8, 920167782  ;;  %v2326_v59 = vsel %vm2314_vm4, %v2304_v46, %v2307_v23 }
  0xfe   :  { %v1492_v18 = vadd.f32 1.0, %v1491_v35  ;;  %v1499_v60 = vadd.f32 1.0, %v1498_v7  ;;  %v1933_v61 = vor.u32 %v1932_v5, %v1931_v34  ;;  %v2324_v20 = vsel %vm2316_vm7, %v2307_v23, %v2323_v44 }
  0xff   :  { %v2325_v35 = vsel %vm2315_vm6, %v2322_v57, %v2324_v20  ;;  %v9759_v6 = vmov 683565275   ;;  %v7221_v15 = vsub.f32 0.0, %v6882_v63 }
 0x100   :  { %v1500_v54 = vmul.f32 %v1499_v60, %v7101_v21  ;;  %v1508_v30 = vxor.u32 2147483648, %v1492_v18  ;;  %v1937_v21 = vor.u32 4788187, %v1936_v0  ;;  %v1940_v51 = vcvt.s32.f32 %v1933_v61 }
 0x101   :  { %v2298_v0 = vshrl.u32 %v9759_v6, %v7106_v13  ;;  %v2356_v44 = vshrl.u32 %v2325_v35, 16 }
 0x102   :  { %v1505_v37 = vxor.u32 2147483648, %v1500_v54  ;;  %v1509_v52 = vsel %vm1507_vm12, %v1508_v30, %v1500_v54  ;;  %v4007_v60 = vsel %vm4005_vm13, %v1508_v30, %v1500_v54  ;;  %v2327_v54 = vsel %vm2317_vm5, %v2313_v49, 1326507024 }
 0x103   :  { %v1938_v24 = vand.u32 2147483647, %v1937_v21  ;;  %v2328_v31 = vsel %vm2316_vm7, %v2310_v8, %v2327_v54  ;;  %v2355_v49 = vand.u32 65535, %v2325_v35  ;;  %v2319_v8 = vsel %vm2317_vm5, %v2307_v23, 2102212464 }
 0x104   :  { %v1506_v19 = vsel %vm1504_vm15, %v1492_v18, %v1505_v37  ;;  %v4004_v27 = vsel %vm4002_vm0, %v1492_v18, %v1505_v37  ;;  %v2329_v36 = vsel %vm2315_vm6, %v2326_v59, %v2328_v31  ;;  %v7218_v37 = vpop.permute.xlu1 %196  ;;  %v7226_v21 = vand.u32 3, %v7148_v56 }
 0x105   :  { %v1510_v30 = vsel %vm1503_vm1, %v1506_v19, %v1509_v52  ;;  %v4008_v7 = vsel %vm4001_vm2, %v4004_v27, %v4007_v60  ;;  %v1941_v5 = vmul.f32 %v1940_v51, %v1938_v24  ;;  %v2333_v61 = vand.u32 65535, %v2329_v36  ;;  %9760 = vst [vmem:[#allocation38_spill] sm:$0xff] %v7218_v37 }
 0x106   :  { %v1511_v48 = vsel %vm1501_vm3, nan, %v1510_v30  ;;  %v4009_v18 = vsel %vm1501_vm3, nan, %v4008_v7  ;;  %v2334_v57 = vshrl.u32 %v2329_v36, 16  ;;  %v2318_v23 = vsel %vm2314_vm4, %v2298_v0, %v7150_v47 }
 0x107   :  { %v3669_v34 = vmul.f32 %v6450_v33, %v1511_v48  ;;  %v6181_v3 = vmul.f32 %v6450_v33, %v4009_v18  ;;  %v1942_v52 = vxor.u32 2147483648, %v1941_v5  ;;  %v2337_v60 = vmul.u32 %v2333_v61, %v7138_v17 }
 0x108   :  { %v2359_v33 = vmul.u32 %v2355_v49, %v7138_v17  ;;  %v2336_v13 = vmul.u32 %v2334_v57, %v7135_v55  ;;  %v2358_v51 = vmul.u32 %v2356_v44, %v7135_v55  ;;  %v2320_v59 = vsel %vm2316_vm7, %v2304_v46, %v2319_v8 }
 0x109   :  { %3685 = vst [vmem:[#allocation16 + $0x4] sm:$0xf] %v3669_v34  ;;  %v1943_v20 = vsel %vm1822_vm9, %v1942_v52, %v1941_v5  ;;  %v2335_v19 = vmul.u32 %v2333_v61, %v7135_v55  ;;  %v2357_v27 = vmul.u32 %v2355_v49, %v7135_v55  ;;  %v2338_v47 = vmul.u32 %v2334_v57, %v7138_v17  ;;  %v7246_v61 = vpop.permute.xlu2 %291 }
 0x10a   :  { %6197 = vst [vmem:[#allocation17 + $0x4] sm:$0xf] %v6181_v3  ;;  %v1946_v35 = vsel %vm7117_vm11, %v6922_v32, %v1943_v20  ;;  %v2339_v54 = vshll.u32 %v2336_v13, 16  ;;  %v2361_v30 = vshll.u32 %v2358_v51, 16  ;;  %v2341_v24 = vshll.u32 %v2337_v60, 16 }
 0x10b   :  { %v1948_v7 = vmul.f32 %v1946_v35, %v1946_v35  ;;  %v2360_v31 = vmul.u32 %v2356_v44, %v7138_v17  ;;  %v2363_v48 = vshll.u32 %v2359_v33, 16  ;;  %v9761_v55 = vmov 0   ;;  %9762 = vst [vmem:[#allocation39_spill] sm:$0xff] %v7246_v61 }
 0x10c   :  { %vm2343_vm8 = vc.u32 %v2335_v19, %v2339_v54  ;;  %v2345_v18 = vadd.s32 %v2339_v54, %v2335_v19  ;;  %vm2365_vm9 = vc.u32 %v2357_v27, %v2361_v30  ;;  %v2367_v46 = vadd.s32 %v2361_v30, %v2357_v27  ;;  %v7250_v27 = vpop.permute.xlu1 %221 }
 0x10d   :  { %v1949_v36 = vmul.f32 -0.001358992, %v1948_v7  ;;  %v1956_v34 = vmul.f32 -0.00019511016, %v1948_v7  ;;  %v2344_v49 = vsel %vm2343_vm8, 1, %v9761_v55  ;;  %v2366_v25 = vsel %vm2365_vm9, 1, %v9761_v55 }
 0x10e   :  { %v2346_v3 = vadd.s32 %v2344_v49, %v2338_v47  ;;  %vm2347_vm10 = vc.u32 %v2345_v18, %v2341_v24  ;;  %v2368_v5 = vadd.s32 %v2366_v25, %v2360_v31  ;;  %vm2369_vm11 = vc.u32 %v2367_v46, %v2363_v48 }
 0x10f   :  { %v1950_v0 = vadd.f32 0.041655596, %v1949_v36  ;;  %v1957_v8 = vadd.f32 0.008332121, %v1956_v34  ;;  %v2348_v17 = vsel %vm2347_vm10, 1, %v9761_v55  ;;  %v2370_v57 = vsel %vm2369_vm11, 1, %v9761_v55 }
 0x110   :  { %v2340_v44 = vshrl.u32 %v2336_v13, 16  ;;  %v2350_v52 = vadd.s32 %v2348_v17, %v2346_v3  ;;  %v2362_v20 = vshrl.u32 %v2358_v51, 16  ;;  %v2372_v19 = vadd.s32 %v2370_v57, %v2368_v5 }
 0x111   :  { %v1951_v54 = vmul.f32 %v1950_v0, %v1948_v7  ;;  %v1958_v30 = vmul.f32 %v1957_v8, %v1948_v7  ;;  %v4464_v47 = vadd.s32 3, %v7148_v56  ;;  %v7255_v24 = vmul.f32 %v6896_v10, %v7246_v61 }
 0x112   :  { %v2342_v31 = vshrl.u32 %v2337_v60, 16  ;;  %v2351_v18 = vadd.s32 %v2350_v52, %v2340_v44  ;;  %v2364_v36 = vshrl.u32 %v2359_v33, 16  ;;  %v2373_v34 = vadd.s32 %v2372_v19, %v2362_v20 }
 0x113   :  { %v1952_v49 = vadd.f32 -0.4999988, %v1951_v54  ;;  %v1959_v25 = vadd.f32 -0.16666654, %v1958_v30  ;;  %v2321_v13 = vsel %vm2315_vm6, %v2318_v23, %v2320_v59  ;;  %v7261_v51 = vsub.f32 %v6891_v9, %v7250_v27 }
 0x114   :  { %v7263_v3 = vadd.s32 %v2351_v18, %v2342_v31  ;;  %v7265_v56 = vadd.s32 %v2367_v46, %v2363_v48  ;;  %v2374_v5 = vadd.s32 %v2373_v34, %v2364_v36  ;;  %v2747_v0 = vand.u32 2139095040, %v7255_v24 }
 0x115   :  { %v597_v60 = vmul.f32 %v7221_v15, %v7221_v15  ;;  %v1147_v33 = vmul.f32 %v6896_v10, %v7035_v45  ;;  %v1953_v8 = vmul.f32 %v1952_v49, %v1948_v7  ;;  %v1960_v12 = vmul.f32 %v1959_v25, %v1948_v7 }
 0x116   :  { %v4465_v23 = vand.u32 3, %v4464_v47  ;;  %vm2377_vm12 = vc.u32 %v7263_v3, %v7265_v56  ;;  %v2378_v9 = vadd.s32 1, %v2374_v5  ;;  %v2748_v59 = vshrl.u32 %v2747_v0, 23 }
 0x117   :  { %v1954_v17 = vadd.f32 1.0, %v1953_v8  ;;  %v1961_v48 = vadd.f32 1.0, %v1960_v12  ;;  %v2375_v46 = vmul.u32 %v7113_v43, %v2321_v13  ;;  %v613_v57 = vmul.f32 %v7261_v51, %v7261_v51 }
 0x118   :  { %vm1965_vm13 = vcmp.lt.s32.totalorder %v7226_v21, 2  ;;  %v2379_v44 = vsel %vm2377_vm12, %v2378_v9, %v2374_v5  ;;  %v9694_v10 = vand.u32 2147483647, %v7255_v24  ;;  %v6351_v45 = vadd.s32 4294967169, %v2748_v59 }
 0x119   :  { %v1962_v7 = vmul.f32 %v1961_v48, %v1946_v35  ;;  %vm1966_vm14 = vcmp.eq.s32.totalorder %v7226_v21, 0  ;;  %v1970_v52 = vxor.u32 2147483648, %v1954_v17  ;;  %v2380_v20 = vadd.s32 %v2379_v44, %v2375_v46 }
 0x11a   :  { %vm1969_vm15 = vcmp.eq.s32.totalorder %v7226_v21, 2  ;;  %vm4466_vm0 = vcmp.lt.s32.totalorder %v4465_v23, 2  ;;  %v2754_v19 = vadd.s32 1, %v6351_v45  ;;  %v629_v54 = vadd.f32 %v613_v57, %v597_v60 }
 0x11b   :  { %v1967_v43 = vxor.u32 2147483648, %v1962_v7  ;;  %vm4467_vm1 = vcmp.eq.s32.totalorder %v4465_v23, 0  ;;  %vm4470_vm2 = vcmp.eq.s32.totalorder %v4465_v23, 2  ;;  %v2381_v30 = vadd.s32 536870912, %v2380_v20 }
 0x11c   :  { %v1971_v47 = vsel %vm1969_vm15, %v1970_v52, %v1962_v7  ;;  %v4472_v31 = vsel %vm4470_vm2, %v1970_v52, %v1962_v7  ;;  %v2751_v18 = vand.u32 8388607, %v9694_v10  ;;  %vm2755_vm3 = vcmp.gt.s32.totalorder %v2754_v19, 0 }
 0x11d   :  { %v1968_v35 = vsel %vm1966_vm14, %v1954_v17, %v1967_v43  ;;  %v4469_v36 = vsel %vm4467_vm1, %v1954_v17, %v1967_v43  ;;  %v2382_v34 = vshrl.u32 %v2381_v30, 30  ;;  %v2756_v49 = vsel %vm2755_vm3, %v2754_v19, 0 }
 0x11e   :  { %vm1963_vm4 = vweird.f32 %v6922_v32  ;;  %v1972_v25 = vsel %vm1965_vm13, %v1968_v35, %v1971_v47  ;;  %v4473_v13 = vsel %vm4466_vm0, %v4469_v36, %v4472_v31  ;;  %v2758_v5 = vand.u32 31, %v2756_v49 }
 0x11f   :  { %v1973_v0 = vsel %vm1963_vm4, nan, %v1972_v25  ;;  %v4474_v60 = vsel %vm1963_vm4, nan, %v4473_v13  ;;  %v2383_v8 = vshll.u32 %v2382_v34, 30  ;;  %v2752_v59 = vor.u32 8388608, %v2751_v18 }
 0x120   :  { %v3672_v12 = vmul.f32 %v7140_v14, %v1973_v0  ;;  %v6184_v9 = vmul.f32 %v7140_v14, %v4474_v60  ;;  %v7289_v48 = vsub.s32 32, %v2758_v5  ;;  %v7291_v46 = vmul.f32 1.442695, %v1147_v33 }
 0x121   :  { %v2384_v17 = vsub.s32 %v2380_v20, %v2383_v8  ;;  %v9763_v32 = vmov 2475754826   ;;  %vm2284_vm5 = vcmp.lt.s32.totalorder %v7069_v40, 0  ;;  %v9764_v57 = vmov 2131351028  }
 0x122   :  { %3688 = vst [vmem:[#allocation16 + $0x10] sm:$0xf] %v3672_v12  ;;  %v2762_v21 = vshrl.u32 %v9763_v32, %v7289_v48  ;;  %v2765_v44 = vshrl.u32 %v9764_v57, %v7289_v48  ;;  %v2761_v14 = vshll.u32 %v9759_v6, %v2758_v5  ;;  %v9765_v45 = vmov 2102212464   ;;  %v7330_v12 = vld [vmem:[%s9673_s5] ss:$0 sm:$0xff] }
 0x123   :  { %6200 = vst [vmem:[#allocation17 + $0x10] sm:$0xf] %v6184_v9  ;;  %vm2385_vm6 = vcmp.lt.s32.totalorder %v2384_v17, 0  ;;  %v2386_v23 = vsub.s32 0, %v2384_v17  ;;  %v2768_v7 = vshrl.u32 %v9765_v45, %v7289_v48  ;;  %v7301_v52 = vshll.u32 %v2752_v59, 8 }
 0x124   :  { %6451 = vrcp.f32 %v629_v54  ;;  %v2406_v20 = vsub.s32 4, %v2382_v34  ;;  %v7303_v19 = vshrl.u32 %v2756_v49, 5  ;;  %v2764_v43 = vshll.u32 %v9763_v32, %v2758_v5 }
 0x125   :  { %v2387_v33 = vsel %vm2385_vm6, %v2386_v23, %v2384_v17  ;;  %v9766_v30 = vand.u32 2147483647, %v7069_v40  ;;  %v7312_v18 = vor.u32 %v2762_v21, %v2761_v14  ;;  %v2767_v35 = vshll.u32 %v9764_v57, %v2758_v5 }
 0x126   :  { %v2388_v31 = vclz %v2387_v33  ;;  %v2771_v54 = vshrl.u32 %v9695_v1, %v7289_v48  ;;  %v7317_v36 = vor.u32 %v2765_v44, %v2764_v43  ;;  %v2770_v49 = vshll.u32 %v9765_v45, %v2758_v5 }
 0x127   :  { %vm7308_vm7 = vcmp.le.f32.partialorder %v9766_v30, 0.7853982  ;;  %v2773_v25 = vshll.u32 %v9695_v1, %v2758_v5  ;;  %v2774_v13 = vshrl.u32 %v9757_v2, %v7289_v48  ;;  %v2376_v0 = vadd.s32 %v7265_v56, %v7263_v3 }
 0x128   :  { %v6343_v60 = vadd.s32 4294967294, %v2388_v31  ;;  %v7325_v8 = vor.u32 %v2768_v7, %v2767_v35  ;;  %v7334_v9 = vmul.f32 %v7330_v12, %v7250_v27  ;;  %v2772_v59 = vor.u32 %v2771_v54, %v2770_v49 }
 0x129   :  { %v2775_v5 = vor.u32 %v2774_v13, %v2773_v25  ;;  %v2793_v21 = vand.u32 65535, %v7301_v52  ;;  %v2794_v23 = vshrl.u32 %v7301_v52, 16  ;;  %v2407_v3 = vsel %vm2284_vm5, %v2406_v20, %v2382_v34 }
 0x12a   :  { %v7338_v44 = vpop.eup %6451  ;;  %vm6344_vm8 = vcmp.lt.s32.totalorder %v6343_v60, 0  ;;  %vm2776_vm9 = vcmp.lt.s32.totalorder %v7303_v19, 1  ;;  %vm2779_vm10 = vcmp.lt.s32.totalorder %v7303_v19, 4  ;;  %vm2777_vm11 = vcmp.lt.s32.totalorder %v7303_v19, 2 }
 0x12b   :  { %v2391_v56 = vsel %vm6344_vm8, 0, %v6343_v60  ;;  %v2784_v27 = vsel %vm2776_vm9, %v7312_v18, %v7317_v36  ;;  %v2785_v14 = vsel %vm2779_vm10, %v2772_v59, 920167782  ;;  %vm2778_vm12 = vcmp.lt.s32.totalorder %v7303_v19, 3 }
 0x12c   :  { %v2392_v7 = vsub.s32 32, %v2391_v56  ;;  %v2396_v33 = vsub.s32 4294967266, %v2391_v56  ;;  %v2788_v34 = vsel %vm2776_vm9, %v7317_v36, %v7325_v8  ;;  %v2393_v20 = vshll.u32 %v2384_v17, %v2391_v56 }
 0x12d   :  { %v2786_v43 = vsel %vm2778_vm12, %v7325_v8, %v2785_v14  ;;  %v2789_v30 = vsel %vm2779_vm10, %v2775_v5, 1326507024  ;;  %v7363_v31 = vmul.f32 %v7338_v44, %v7261_v51  ;;  %v7371_v17 = vsel %vm7308_vm7, 0, %v2407_v3 }
 0x12e   :  { %v2394_v35 = vshrl.u32 %v2376_v0, %v2392_v7  ;;  %v2397_v54 = vadd.s32 127, %v2396_v33  ;;  %v2787_v49 = vsel %vm2777_vm11, %v2784_v27, %v2786_v43  ;;  %v2790_v25 = vsel %vm2778_vm12, %v2772_v59, %v2789_v30 }
 0x12f   :  { %9769 = vst [vmem:[#allocation40_spill] sm:$0xff] %v7363_v31  ;;  %v2791_v13 = vsel %vm2777_vm11, %v2788_v34, %v2790_v25  ;;  %v2817_v60 = vand.u32 65535, %v2787_v49  ;;  %v2818_v5 = vshrl.u32 %v2787_v49, 16  ;;  %v2760_v7 = vshrl.u32 %v9759_v6, %v7289_v48 }
 0x130   :  { %v2395_v56 = vor.u32 %v2394_v35, %v2393_v20  ;;  %v2398_v51 = vshll.u32 %v2397_v54, 23  ;;  %v2795_v14 = vand.u32 65535, %v2791_v13  ;;  %v2796_v0 = vshrl.u32 %v2791_v13, 16 }
 0x131   :  { %v2820_v27 = vmul.u32 %v2818_v5, %v2793_v21  ;;  %v2821_v33 = vmul.u32 %v2817_v60, %v2794_v23  ;;  %v4929_v3 = vadd.s32 3, %v7371_v17  ;;  %v1207_v10 = vand.u32 2139095040, %v7334_v9 }
 0x132   :  { %v2399_v43 = vor.u32 4788187, %v2398_v51  ;;  %v2798_v30 = vmul.u32 %v2796_v0, %v2793_v21  ;;  %v2799_v34 = vmul.u32 %v2795_v14, %v2794_v23  ;;  %v2819_v25 = vmul.u32 %v2817_v60, %v2793_v21 }
 0x133   :  { %v2822_v49 = vmul.u32 %v2818_v5, %v2794_v23  ;;  %v2823_v20 = vshll.u32 %v2820_v27, 16  ;;  %v2402_v54 = vcvt.s32.f32 %v2395_v56  ;;  %v2797_v13 = vmul.u32 %v2795_v14, %v2793_v21 }
 0x134   :  { %v2400_v35 = vand.u32 2147483647, %v2399_v43  ;;  %v2801_v1 = vshll.u32 %v2798_v30, 16  ;;  %v2800_v50 = vmul.u32 %v2796_v0, %v2794_v23  ;;  %v2803_v48 = vshll.u32 %v2799_v34, 16 }
 0x135   :  { %v2825_v42 = vshll.u32 %v2821_v33, 16  ;;  %vm2827_vm13 = vc.u32 %v2819_v25, %v2823_v20  ;;  %v2829_v16 = vadd.s32 %v2823_v20, %v2819_v25  ;;  %v1208_v60 = vshrl.u32 %v1207_v10, 23 }
 0x136   :  { %v2403_v31 = vmul.f32 %v2402_v54, %v2400_v35  ;;  %vm2805_vm14 = vc.u32 %v2797_v13, %v2801_v1  ;;  %v2807_v51 = vadd.s32 %v2801_v1, %v2797_v13  ;;  %v2828_v59 = vsel %vm2827_vm13, 1, %v9761_v55 }
 0x137   :  { %v2806_v4 = vsel %vm2805_vm14, 1, %v9761_v55  ;;  %v2830_v41 = vadd.s32 %v2828_v59, %v2822_v49  ;;  %v2780_v21 = vsel %vm2776_vm9, %v2760_v7, %v7312_v18  ;;  %v2781_v23 = vsel %vm2779_vm10, %v7325_v8, 2102212464 }
 0x138   :  { %v2404_v5 = vxor.u32 2147483648, %v2403_v31  ;;  %v2808_v56 = vadd.s32 %v2806_v4, %v2800_v50  ;;  %vm2809_vm15 = vc.u32 %v2807_v51, %v2803_v48  ;;  %vm2831_vm0 = vc.u32 %v2829_v16, %v2825_v42 }
 0x139   :  { %v2810_v1 = vsel %vm2809_vm15, 1, %v9761_v55  ;;  %v6321_v14 = vadd.s32 4294967169, %v1208_v60  ;;  %v2802_v59 = vshrl.u32 %v2798_v30, 16  ;;  %v2832_v43 = vsel %vm2831_vm0, 1, %v9761_v55 }
 0x13a   :  { %v2405_v0 = vsel %vm2284_vm5, %v2404_v5, %v2403_v31  ;;  %v2812_v10 = vadd.s32 %v2810_v1, %v2808_v56  ;;  %v2824_v50 = vshrl.u32 %v2820_v27, 16  ;;  %v2834_v18 = vadd.s32 %v2832_v43, %v2830_v41 }
 0x13b   :  { %v7395_v4 = vsel %vm7308_vm7, %v7069_v40, %v2405_v0  ;;  %v1214_v7 = vadd.s32 1, %v6321_v14  ;;  %v2782_v25 = vsel %vm2778_vm12, %v7317_v36, %v2781_v23  ;;  %v2804_v31 = vshrl.u32 %v2799_v34, 16 }
 0x13c   :  { %v2410_v8 = vmul.f32 %v7395_v4, %v7395_v4  ;;  %v2813_v30 = vadd.s32 %v2812_v10, %v2802_v59  ;;  %v2826_v49 = vshrl.u32 %v2821_v33, 16  ;;  %v7402_v20 = vadd.s32 %v2829_v16, %v2825_v42 }
 0x13d   :  { %v2835_v35 = vadd.s32 %v2834_v18, %v2824_v50  ;;  %vm1215_vm1 = vcmp.gt.s32.totalorder %v1214_v7, 0  ;;  %v2783_v27 = vsel %vm2777_vm11, %v2780_v21, %v2782_v25  ;;  %v9770_v51 = vand.u32 2147483647, %v7334_v9 }
 0x13e   :  { %v2411_v47 = vmul.f32 -0.001358992, %v2410_v8  ;;  %v2418_v54 = vmul.f32 -0.00019511016, %v2410_v8  ;;  %v7404_v13 = vadd.s32 %v2813_v30, %v2804_v31  ;;  %v1216_v41 = vsel %vm1215_vm1, %v1214_v7, 0 }
 0x13f   :  { %v2836_v48 = vadd.s32 %v2835_v35, %v2826_v49  ;;  %v1211_v60 = vand.u32 8388607, %v9770_v51  ;;  %v1218_v36 = vand.u32 31, %v1216_v41  ;;  %v7411_v42 = vand.u32 3, %v7371_v17 }
 0x140   :  { %v2412_v34 = vadd.f32 0.041655596, %v2411_v47  ;;  %v2419_v5 = vadd.f32 0.008332121, %v2418_v54  ;;  %vm2839_vm2 = vc.u32 %v7404_v13, %v7402_v20  ;;  %v7415_v16 = vand.u32 3, %v4929_v3 }
 0x141   :  { %v2840_v33 = vadd.s32 1, %v2836_v48  ;;  %v7417_v56 = vsub.s32 32, %v1218_v36  ;;  %v2837_v23 = vmul.u32 %v7301_v52, %v2783_v27  ;;  %6453 = vpow2.f32 %v7291_v46 }
 0x142   :  { %v2413_v19 = vmul.f32 %v2412_v34, %v2410_v8  ;;  %v2420_v21 = vmul.f32 %v2419_v5, %v2410_v8  ;;  %v1212_v14 = vor.u32 8388608, %v1211_v60  ;;  %vm2431_vm3 = vcmp.eq.s32.totalorder %v7411_v42, 2 }
 0x143   :  { %v2841_v1 = vsel %vm2839_vm2, %v2840_v33, %v2836_v48  ;;  %v7422_v10 = vshrl.u32 %v1216_v41, 5  ;;  %vm2428_vm4 = vcmp.eq.s32.totalorder %v7411_v42, 0  ;;  %vm4932_vm5 = vcmp.eq.s32.totalorder %v7415_v16, 0 }
 0x144   :  { %v2414_v0 = vadd.f32 -0.4999988, %v2413_v19  ;;  %v2421_v59 = vadd.f32 -0.16666654, %v2420_v21  ;;  %v2842_v17 = vadd.s32 %v2841_v1, %v2837_v23  ;;  %v1221_v3 = vshll.u32 %v9759_v6, %v1218_v36 }
 0x145   :  { %v1222_v52 = vshrl.u32 %v9763_v32, %v7417_v56  ;;  %v1225_v46 = vshrl.u32 %v9764_v57, %v7417_v56  ;;  %v9771_v43 = vmov 920167782   ;;  %vm2427_vm6 = vcmp.lt.s32.totalorder %v7411_v42, 2 }
 0x146   :  { %v1231_v50 = vshrl.u32 %v9771_v43, %v7417_v56  ;;  %v2415_v18 = vmul.f32 %v2414_v0, %v2410_v8  ;;  %v2422_v7 = vmul.f32 %v2421_v59, %v2410_v8  ;;  %vm4931_vm7 = vcmp.lt.s32.totalorder %v7415_v16, 2 }
 0x147   :  { %v2843_v25 = vadd.s32 536870912, %v2842_v17  ;;  %v1230_v31 = vshll.u32 %v9765_v45, %v1218_v36  ;;  %vm2425_vm8 = vweird.f32 %v7069_v40  ;;  %v1224_v30 = vshll.u32 %v9763_v32, %v1218_v36  ;;  %v6454_v48 = vpop.eup %6453 }
 0x148   :  { %v1228_v49 = vshrl.u32 %v9765_v45, %v7417_v56  ;;  %v1233_v35 = vshll.u32 %v9771_v43, %v1218_v36  ;;  %v1234_v47 = vshrl.u32 %v9757_v2, %v7417_v56  ;;  %v2416_v8 = vadd.f32 1.0, %v2415_v18 }
 0x149   :  { %v2423_v54 = vadd.f32 1.0, %v2422_v7  ;;  %v7443_v41 = vshrl.u32 %v2843_v25, 30  ;;  %v1232_v27 = vor.u32 %v1231_v50, %v1230_v31  ;;  %v1223_v51 = vor.u32 %v1222_v52, %v1221_v3 }
 0x14a   :  { %v7445_v60 = vor.u32 %v1225_v46, %v1224_v30  ;;  %v1227_v34 = vshll.u32 %v9764_v57, %v1218_v36  ;;  %v1235_v5 = vor.u32 %v1234_v47, %v1233_v35  ;;  %v2432_v19 = vxor.u32 2147483648, %v2416_v8 }
 0x14b   :  { %v2424_v33 = vmul.f32 %v2423_v54, %v7395_v4  ;;  %vm4935_vm9 = vcmp.eq.s32.totalorder %v7415_v16, 2  ;;  %v2845_v21 = vshll.u32 %v7443_v41, 30  ;;  %vm1236_vm10 = vcmp.lt.s32.totalorder %v7422_v10, 1 }
 0x14c   :  { %v7451_v23 = vor.u32 %v1228_v49, %v1227_v34  ;;  %vm1239_vm11 = vcmp.lt.s32.totalorder %v7422_v10, 4  ;;  %v7455_v1 = vshll.u32 %v1212_v14, 8  ;;  %vm1238_vm12 = vcmp.lt.s32.totalorder %v7422_v10, 3 }
 0x14d   :  { %v2429_v0 = vxor.u32 2147483648, %v2424_v33  ;;  %v2846_v59 = vsub.s32 %v2842_v17, %v2845_v21  ;;  %v1245_v4 = vsel %vm1239_vm11, %v1232_v27, 920167782  ;;  %v2433_v36 = vsel %vm2431_vm3, %v2432_v19, %v2424_v33 }
 0x14e   :  { %v4937_v3 = vsel %vm4935_vm9, %v2432_v19, %v2424_v33  ;;  %v1244_v52 = vsel %vm1236_vm10, %v1223_v51, %v7445_v60  ;;  %v1249_v46 = vsel %vm1239_vm11, %v1235_v5, 1326507024  ;;  %v1246_v25 = vsel %vm1238_vm12, %v7451_v23, %v1245_v4 }
 0x14f   :  { %v2430_v14 = vsel %vm2428_vm4, %v2416_v8, %v2429_v0  ;;  %v4934_v17 = vsel %vm4932_vm5, %v2416_v8, %v2429_v0  ;;  %vm2847_vm13 = vcmp.lt.s32.totalorder %v2846_v59, 0  ;;  %v2848_v50 = vsub.s32 0, %v2846_v59 }
 0x150   :  { %v2434_v18 = vsel %vm2427_vm6, %v2430_v14, %v2433_v36  ;;  %v4938_v7 = vsel %vm4931_vm7, %v4934_v17, %v4937_v3  ;;  %v1248_v31 = vsel %vm1236_vm10, %v7445_v60, %v7451_v23  ;;  %v1250_v16 = vsel %vm1238_vm12, %v1232_v27, %v1249_v46 }
 0x151   :  { %v2435_v30 = vsel %vm2425_vm8, nan, %v2434_v18  ;;  %v4939_v49 = vsel %vm2425_vm8, nan, %v4938_v7  ;;  %v2849_v42 = vsel %vm2847_vm13, %v2848_v50, %v2846_v59  ;;  %vm1237_vm14 = vcmp.lt.s32.totalorder %v7422_v10, 2 }
 0x152   :  { %v3675_v35 = vmul.f32 %v6454_v48, %v2435_v30  ;;  %v6187_v47 = vmul.f32 %v6454_v48, %v4939_v49  ;;  %v2850_v8 = vclz %v2849_v42  ;;  %v1247_v54 = vsel %vm1237_vm14, %v1244_v52, %v1246_v25 }
 0x153   :  { %v1251_v5 = vsel %vm1237_vm14, %v1248_v31, %v1250_v16  ;;  %v1253_v40 = vand.u32 65535, %v7455_v1  ;;  %v1254_v33 = vshrl.u32 %v7455_v1, 16  ;;  %v1220_v48 = vshrl.u32 %v9759_v6, %v7417_v56 }
 0x154   :  { %3691 = vst [vmem:[#allocation16 + $0x1c] sm:$0xf] %v3675_v35  ;;  %v6352_v34 = vadd.s32 4294967294, %v2850_v8  ;;  %v1255_v19 = vand.u32 65535, %v1251_v5  ;;  %v1256_v27 = vshrl.u32 %v1251_v5, 16  ;;  %v1278_v21 = vshrl.u32 %v1247_v54, 16 }
 0x155   :  { %6203 = vst [vmem:[#allocation17 + $0x1c] sm:$0xf] %v6187_v47  ;;  %v1277_v3 = vand.u32 65535, %v1247_v54  ;;  %v2838_v52 = vadd.s32 %v7402_v20, %v7404_v13  ;;  %v1240_v50 = vsel %vm1236_vm10, %v1220_v48, %v1223_v51  ;;  %vm2746_vm5 = vcmp.lt.s32.totalorder %v7255_v24, 0 }
 0x156   :  { %vm6353_vm15 = vcmp.lt.s32.totalorder %v6352_v34, 0  ;;  %v1258_v4 = vmul.u32 %v1256_v27, %v1253_v40  ;;  %v1259_v36 = vmul.u32 %v1255_v19, %v1254_v33  ;;  %v1257_v18 = vmul.u32 %v1255_v19, %v1253_v40 }
 0x157   :  { %v2853_v0 = vsel %vm6353_vm15, 0, %v6352_v34  ;;  %v1260_v30 = vmul.u32 %v1256_v27, %v1254_v33  ;;  %v1280_v56 = vmul.u32 %v1278_v21, %v1253_v40  ;;  %v1281_v16 = vmul.u32 %v1277_v3, %v1254_v33 }
 0x158   :  { %v2854_v46 = vsub.s32 32, %v2853_v0  ;;  %v2858_v14 = vsub.s32 4294967266, %v2853_v0  ;;  %v2855_v17 = vshll.u32 %v2846_v59, %v2853_v0  ;;  %v1261_v7 = vshll.u32 %v1258_v4, 16 }
 0x159   :  { %v1263_v49 = vshll.u32 %v1259_v36, 16  ;;  %v1283_v13 = vshll.u32 %v1280_v56, 16  ;;  %v1241_v59 = vsel %vm1239_vm11, %v7451_v23, 2102212464  ;;  %v1279_v8 = vmul.u32 %v1277_v3, %v1253_v40 }
 0x15a   :  { %v2856_v25 = vshrl.u32 %v2838_v52, %v2854_v46  ;;  %v2859_v31 = vadd.s32 127, %v2858_v14  ;;  %vm1265_vm0 = vc.u32 %v1257_v18, %v1261_v7  ;;  %v1267_v42 = vadd.s32 %v1261_v7, %v1257_v18  ;;  %v6506_v7 = vld [vmem:[#allocation8 + $0x8] sm:$0xf] }
 0x15b   :  { %v1266_v20 = vsel %vm1265_vm0, 1, %v9761_v55  ;;  %v1262_v34 = vshrl.u32 %v1258_v4, 16  ;;  %v1282_v19 = vmul.u32 %v1278_v21, %v1254_v33  ;;  %v1285_v48 = vshll.u32 %v1281_v16, 16  ;;  %v7511_v4 = vpop.permute.xlu2 %312 }
 0x15c   :  { %v2857_v35 = vor.u32 %v2856_v25, %v2855_v17  ;;  %v2860_v47 = vshll.u32 %v2859_v31, 23  ;;  %v1268_v51 = vadd.s32 %v1266_v20, %v1260_v30  ;;  %vm1269_vm1 = vc.u32 %v1267_v42, %v1263_v49  ;;  %9772 = vst [vmem:[#allocation41_spill] sm:$0xff] %v7511_v4  ;;  %v6507_v49 = vld [vmem:[#allocation8 + $0x4] sm:$0xf] }
 0x15d   :  { %v1270_v5 = vsel %vm1269_vm1, 1, %v9761_v55  ;;  %vm1287_vm2 = vc.u32 %v1279_v8, %v1283_v13  ;;  %v1289_v0 = vadd.s32 %v1283_v13, %v1279_v8  ;;  %v2868_v14 = vsub.s32 4, %v7443_v41 }
 0x15e   :  { %v2861_v54 = vor.u32 4788187, %v2860_v47  ;;  %v1272_v27 = vadd.s32 %v1270_v5, %v1268_v51  ;;  %v2864_v46 = vcvt.s32.f32 %v2857_v35  ;;  %v1288_v17 = vsel %vm1287_vm2, 1, %v9761_v55  ;;  %v7514_v35 = vld [vmem:[#allocation8 + $0xc] sm:$0xf] }
 0x15f   :  { %v1242_v23 = vsel %vm1238_vm12, %v7445_v60, %v1241_v59  ;;  %v1290_v3 = vadd.s32 %v1288_v17, %v1282_v19  ;;  %vm1291_vm3 = vc.u32 %v1289_v0, %v1285_v48  ;;  %v1264_v21 = vshrl.u32 %v1259_v36, 16 }
 0x160   :  { %v2862_v52 = vand.u32 2147483647, %v2861_v54  ;;  %v1273_v40 = vadd.s32 %v1272_v27, %v1262_v34  ;;  %v1292_v18 = vsel %vm1291_vm3, 1, %v9761_v55  ;;  %v525_v25 = vperm.slane %v6506_v7, 3 }
 0x161   :  { %v1284_v31 = vshrl.u32 %v1280_v56, 16  ;;  %v1294_v30 = vadd.s32 %v1292_v18, %v1290_v3  ;;  %v497_v42 = vperm.slane %v6507_v49, 3  ;;  %v546_v47 = vperm.slane %v7514_v35, 2 }
 0x162   :  { %v2865_v33 = vmul.f32 %v2864_v46, %v2862_v52  ;;  %v7517_v20 = vadd.s32 %v1273_v40, %v1264_v21  ;;  %530 = vperm.xlu2 %6438, %v525_v25   ;;  %v7521_v13 = vmul.f32 %v7330_v12, %v7511_v4  ;;  %v9773_v36 = vand.u32 2147483647, %v7255_v24 }
 0x163   :  { %v1286_v56 = vshrl.u32 %v1281_v16, 16  ;;  %v1295_v51 = vadd.s32 %v1294_v30, %v1284_v31  ;;  %502 = vperm.xlu1 %6437, %v497_v42   ;;  %551 = vperm.xlu0 %6436, %v546_v47   ;;  %v2869_v54 = vsel %vm2746_vm5, %v2868_v14, %v7443_v41  ;;  %v1243_v34 = vsel %vm1237_vm14, %v1240_v50, %v1242_v23 }
 0x164   :  { %v2866_v60 = vxor.u32 2147483648, %v2865_v33  ;;  %vm7525_vm4 = vcmp.le.f32.partialorder %v9773_v36, 0.7853982  ;;  %v1293_v5 = vadd.s32 %v1289_v0, %v1285_v48  ;;  %v9703_v52 = vand.u32 2147483647, %v7521_v13 }
 0x165   :  { %v1296_v27 = vadd.s32 %v1295_v51, %v1286_v56  ;;  %v3209_v46 = vand.u32 2139095040, %v7521_v13  ;;  %v7539_v16 = vsub.f32 0.0, %v6876_v53  ;;  %v7544_v10 = vmul.f32 %v7330_v12, %v6876_v53 }
 0x166   :  { %v2867_v8 = vsel %vm2746_vm5, %v2866_v60, %v2865_v33  ;;  %vm1299_vm6 = vc.u32 %v7517_v20, %v1293_v5  ;;  %v1150_v41 = vmul.f32 %v7330_v12, %v7174_v29  ;;  %v2871_v0 = vsel %vm7525_vm4, 0, %v2869_v54 }
 0x167   :  { %v2870_v19 = vsel %vm7525_vm4, %v7255_v24, %v2867_v8  ;;  %9776 = vst [vmem:[#allocation42_spill] sm:$0xff] %v7539_v16  ;;  %v1300_v50 = vadd.s32 1, %v1296_v27  ;;  %v3210_v48 = vshrl.u32 %v3209_v46, 23  ;;  %v1297_v40 = vmul.u32 %v7455_v1, %v1243_v34  ;;  %v7572_v46 = vpop.permute.xlu1 %242 }
 0x168   :  { %v2872_v17 = vmul.f32 %v2870_v19, %v2870_v19  ;;  %v7552_v3 = vsub.f32 0.0, %v6966_v22  ;;  %v3213_v53 = vand.u32 8388607, %v9703_v52  ;;  %v7558_v18 = vmul.f32 %v7539_v16, %v7539_v16 }
 0x169   :  { %v1301_v33 = vsel %vm1299_vm6, %v1300_v50, %v1296_v27  ;;  %v6360_v21 = vadd.s32 4294967169, %v3210_v48  ;;  %v1140_v30 = vmul.f32 %v7330_v12, %v6882_v63  ;;  %v1192_v49 = vmul.f32 1.442695, %v1150_v41  ;;  %v7576_v50 = vpop.permute.xlu0 %147 }
 0x16a   :  { %v2873_v14 = vmul.f32 -0.001358992, %v2872_v17  ;;  %v2880_v23 = vmul.f32 -0.00019511016, %v2872_v17  ;;  %9777 = vst [vmem:[#allocation43_spill] sm:$0xff] %v7552_v3  ;;  %v1302_v31 = vadd.s32 %v1301_v33, %v1297_v40  ;;  %v5394_v1 = vadd.s32 3, %v2871_v0 }
 0x16b   :  { %v3216_v42 = vadd.s32 1, %v6360_v21  ;;  %v2888_v36 = vand.u32 3, %v2871_v0  ;;  %v7564_v56 = vmul.f32 %v7552_v3, %v7552_v3  ;;  %v7568_v51 = vmul.f32 %v7330_v12, %v6966_v22 }
 0x16c   :  { %v2874_v7 = vadd.f32 0.041655596, %v2873_v14  ;;  %v2881_v25 = vadd.f32 0.008332121, %v2880_v23  ;;  %v1303_v59 = vadd.s32 536870912, %v1302_v31  ;;  %v3214_v8 = vor.u32 8388608, %v3213_v53 }
 0x16d   :  { %vm3217_vm7 = vcmp.gt.s32.totalorder %v3216_v42, 0  ;;  %v7574_v41 = vmul.f32 1.442695, %v1140_v30  ;;  %6455 = vpow2.f32 %v1192_v49  ;;  %v5395_v48 = vand.u32 3, %v5394_v1 }
 0x16e   :  { %v2875_v47 = vmul.f32 %v2874_v7, %v2872_v17  ;;  %v2882_v60 = vmul.f32 %v2881_v25, %v2872_v17  ;;  %v7570_v63 = vshrl.u32 %v1303_v59, 30  ;;  %v3218_v27 = vsel %vm3217_vm7, %v3216_v42, 0 }
 0x16f   :  { %v3220_v0 = vand.u32 31, %v3218_v27  ;;  %vm2889_vm8 = vcmp.lt.s32.totalorder %v2888_v36, 2  ;;  %vm2887_vm9 = vweird.f32 %v7255_v24  ;;  %vm2890_vm10 = vcmp.eq.s32.totalorder %v2888_v36, 0 }
 0x170   :  { %v2876_v54 = vadd.f32 -0.4999988, %v2875_v47  ;;  %v2883_v34 = vadd.f32 -0.16666654, %v2882_v60  ;;  %v1305_v22 = vshll.u32 %v7570_v63, 30  ;;  %vm2893_vm11 = vcmp.eq.s32.totalorder %v2888_v36, 2 }
 0x171   :  { %v7580_v40 = vshll.u32 %v3214_v8, 8  ;;  %v7584_v33 = vmul.f32 %v7330_v12, %v7572_v46  ;;  %v7588_v25 = vsub.s32 32, %v3220_v0  ;;  %vm5396_vm12 = vcmp.lt.s32.totalorder %v5395_v48, 2 }
 0x172   :  { %v2877_v14 = vmul.f32 %v2876_v54, %v2872_v17  ;;  %v2884_v23 = vmul.f32 %v2883_v34, %v2872_v17  ;;  %v7586_v7 = vsub.s32 %v1302_v31, %v1305_v22  ;;  %vm5397_vm13 = vcmp.eq.s32.totalorder %v5395_v48, 0 }
 0x173   :  { %vm5400_vm14 = vcmp.eq.s32.totalorder %v5395_v48, 2  ;;  %v1298_v17 = vadd.s32 %v1293_v5, %v7517_v20  ;;  %v6456_v42 = vpop.eup %6455  ;;  %v7594_v47 = vand.u32 65535, %v7580_v40  ;;  %v7597_v31 = vshrl.u32 %v7580_v40, 16 }
 0x174   :  { %v2878_v21 = vadd.f32 1.0, %v2877_v14  ;;  %v2885_v53 = vadd.f32 1.0, %v2884_v23  ;;  %vm1307_vm15 = vcmp.lt.s32.totalorder %v7586_v7, 0  ;;  %v1308_v1 = vsub.s32 0, %v7586_v7 }
 0x175   :  { %v1669_v59 = vand.u32 2139095040, %v7584_v33  ;;  %v7602_v5 = vshrl.u32 %v3218_v27, 5  ;;  %v3223_v14 = vshll.u32 %v9759_v6, %v3220_v0  ;;  %v3227_v23 = vshrl.u32 %v9764_v57, %v7588_v25 }
 0x176   :  { %v2886_v30 = vmul.f32 %v2885_v53, %v2870_v19  ;;  %v2894_v49 = vxor.u32 2147483648, %v2878_v21  ;;  %v1309_v20 = vsel %vm1307_vm15, %v1308_v1, %v7586_v7  ;;  %v3224_v19 = vshrl.u32 %v9763_v32, %v7588_v25  ;;  %v7615_v1 = vpop.permute.xlu0 %168 }
 0x177   :  { %v1310_v34 = vclz %v1309_v20  ;;  %v3230_v27 = vshrl.u32 %v9765_v45, %v7588_v25  ;;  %v3226_v29 = vshll.u32 %v9763_v32, %v3220_v0  ;;  %vm1206_vm0 = vcmp.lt.s32.totalorder %v7334_v9, 0 }
 0x178   :  { %v2891_v8 = vxor.u32 2147483648, %v2886_v30  ;;  %v2895_v54 = vsel %vm2893_vm11, %v2894_v49, %v2886_v30  ;;  %v5402_v52 = vsel %vm5400_vm14, %v2894_v49, %v2886_v30  ;;  %v3225_v30 = vor.u32 %v3224_v19, %v3223_v14 }
 0x179   :  { %v6322_v4 = vadd.s32 4294967294, %v1310_v34  ;;  %v3229_v49 = vshll.u32 %v9764_v57, %v3220_v0  ;;  %v3228_v36 = vor.u32 %v3227_v23, %v3226_v29  ;;  %v3233_v34 = vshrl.u32 %v9771_v43, %v7588_v25 }
 0x17a   :  { %v2892_v22 = vsel %vm2890_vm10, %v2878_v21, %v2891_v8  ;;  %v5399_v53 = vsel %vm5397_vm13, %v2878_v21, %v2891_v8  ;;  %v9778_v24 = vand.u32 2147483647, %v7334_v9  ;;  %v3236_v29 = vshrl.u32 %v9757_v2, %v7588_v25 }
 0x17b   :  { %v2896_v60 = vsel %vm2889_vm8, %v2892_v22, %v2895_v54  ;;  %v5403_v20 = vsel %vm5396_vm12, %v5399_v53, %v5402_v52  ;;  %vm6323_vm1 = vcmp.lt.s32.totalorder %v6322_v4, 0  ;;  %v3231_v52 = vor.u32 %v3230_v27, %v3229_v49 }
 0x17c   :  { %v2897_v38 = vsel %vm2887_vm9, nan, %v2896_v60  ;;  %v5404_v21 = vsel %vm2887_vm9, nan, %v5403_v20  ;;  %v1313_v48 = vsel %vm6323_vm1, 0, %v6322_v4  ;;  %v3232_v54 = vshll.u32 %v9765_v45, %v3220_v0 }
 0x17d   :  { %v3678_v8 = vmul.f32 %v6456_v42, %v2897_v38  ;;  %v6190_v26 = vmul.f32 %v6456_v42, %v5404_v21  ;;  %vm7631_vm2 = vcmp.le.f32.partialorder %v9778_v24, 0.7853982  ;;  %v1314_v19 = vsub.s32 32, %v1313_v48 }
 0x17e   :  { %v1318_v14 = vsub.s32 4294967266, %v1313_v48  ;;  %v3235_v38 = vshll.u32 %v9771_v43, %v3220_v0  ;;  %v1315_v4 = vshll.u32 %v7586_v7, %v1313_v48  ;;  %v1328_v42 = vsub.s32 4, %v7570_v63  ;;  %v7660_v24 = vpop.permute.xlu0 %189 }
 0x17f   :  { %3694 = vst [vmem:[#allocation16 + $0x28] sm:$0xf] %v3678_v8  ;;  %v3234_v23 = vor.u32 %v3233_v34, %v3232_v54  ;;  %vm3238_vm3 = vcmp.lt.s32.totalorder %v7602_v5, 1  ;;  %v1316_v22 = vshrl.u32 %v1298_v17, %v1314_v19  ;;  %vm3241_vm4 = vcmp.lt.s32.totalorder %v7602_v5, 4 }
 0x180   :  { %6206 = vst [vmem:[#allocation17 + $0x28] sm:$0xf] %v6190_v26  ;;  %v1319_v53 = vadd.s32 127, %v1318_v14  ;;  %v3237_v27 = vor.u32 %v3236_v29, %v3235_v38  ;;  %vm3240_vm5 = vcmp.lt.s32.totalorder %v7602_v5, 3  ;;  %v3246_v0 = vsel %vm3238_vm3, %v3225_v30, %v3228_v36 }
 0x181   :  { %v3247_v26 = vsel %vm3241_vm4, %v3234_v23, 920167782  ;;  %v9781_v7 = vand.u32 2147483647, %v7584_v33  ;;  %v1317_v21 = vor.u32 %v1316_v22, %v1315_v4  ;;  %vm3239_vm6 = vcmp.lt.s32.totalorder %v7602_v5, 2  ;;  %9782 = vst [vmem:[#allocation44_spill] sm:$0xff] %v7660_v24 }
 0x182   :  { %v1320_v49 = vshll.u32 %v1319_v53, 23  ;;  %v3248_v17 = vsel %vm3240_vm5, %v3231_v52, %v3247_v26  ;;  %v3250_v48 = vsel %vm3238_vm3, %v3228_v36, %v3231_v52  ;;  %v3251_v54 = vsel %vm3241_vm4, %v3237_v27, 1326507024 }
 0x183   :  { %v7649_v20 = vand.u32 8388607, %v9781_v7  ;;  %v3249_v8 = vsel %vm3239_vm6, %v3246_v0, %v3248_v17  ;;  %v1670_v34 = vshrl.u32 %v1669_v59, 23  ;;  %v1329_v14 = vsel %vm1206_vm0, %v1328_v42, %v7570_v63 }
 0x184   :  { %v1321_v19 = vor.u32 4788187, %v1320_v49  ;;  %v3252_v38 = vsel %vm3240_vm5, %v3234_v23, %v3251_v54  ;;  %v3279_v29 = vand.u32 65535, %v3249_v8  ;;  %v3222_v4 = vshrl.u32 %v9759_v6, %v7588_v25 }
 0x185   :  { %v3243_v22 = vsel %vm3241_vm4, %v3231_v52, 2102212464  ;;  %v3253_v59 = vsel %vm3239_vm6, %v3250_v48, %v3252_v38  ;;  %v3280_v53 = vshrl.u32 %v3249_v8, 16  ;;  %v1324_v0 = vcvt.s32.f32 %v1317_v21 }
 0x186   :  { %v1322_v27 = vand.u32 2147483647, %v1321_v19  ;;  %v3257_v26 = vand.u32 65535, %v3253_v59  ;;  %v3258_v7 = vshrl.u32 %v3253_v59, 16  ;;  %v1331_v63 = vsel %vm7631_vm2, 0, %v1329_v14 }
 0x187   :  { %v3242_v42 = vsel %vm3238_vm3, %v3222_v4, %v3225_v30  ;;  %v3282_v23 = vmul.u32 %v3280_v53, %v7594_v47  ;;  %v3283_v25 = vmul.u32 %v3279_v29, %v7597_v31  ;;  %v3244_v52 = vsel %vm3240_vm5, %v3228_v36, %v3243_v22 }
 0x188   :  { %v1325_v49 = vmul.f32 %v1324_v0, %v1322_v27  ;;  %v3260_v17 = vmul.u32 %v3258_v7, %v7594_v47  ;;  %v3261_v21 = vmul.u32 %v3257_v26, %v7597_v31  ;;  %v3281_v8 = vmul.u32 %v3279_v29, %v7594_v47 }
 0x189   :  { %v3284_v48 = vmul.u32 %v3280_v53, %v7597_v31  ;;  %v3285_v54 = vshll.u32 %v3282_v23, 16  ;;  %v6330_v19 = vadd.s32 4294967169, %v1670_v34  ;;  %v3259_v30 = vmul.u32 %v3257_v26, %v7594_v47  ;;  %v7698_v26 = vpop.permute.xlu0 %210 }
 0x18a   :  { %v1326_v14 = vxor.u32 2147483648, %v1325_v49  ;;  %v3262_v38 = vmul.u32 %v3258_v7, %v7597_v31  ;;  %v3263_v4 = vshll.u32 %v3260_v17, 16  ;;  %v3265_v59 = vshll.u32 %v3261_v21, 16  ;;  %9783 = vst [vmem:[#allocation45_spill] sm:$0xff] %v7698_v26 }
 0x18b   :  { %v3287_v27 = vshll.u32 %v3283_v25, 16  ;;  %vm3289_vm7 = vc.u32 %v3281_v8, %v3285_v54  ;;  %v3291_v36 = vadd.s32 %v3285_v54, %v3281_v8  ;;  %v3264_v8 = vshrl.u32 %v3260_v17, 16 }
 0x18c   :  { %v1327_v22 = vsel %vm1206_vm0, %v1326_v14, %v1325_v49  ;;  %vm3267_vm8 = vc.u32 %v3259_v30, %v3263_v4  ;;  %v3269_v0 = vadd.s32 %v3263_v4, %v3259_v30  ;;  %v3290_v29 = vsel %vm3289_vm7, 1, %v9761_v55 }
 0x18d   :  { %v7693_v34 = vsel %vm7631_vm2, %v7334_v9, %v1327_v22  ;;  %v3268_v47 = vsel %vm3267_vm8, 1, %v9761_v55  ;;  %v3292_v31 = vadd.s32 %v3290_v29, %v3284_v48  ;;  %vm3293_vm9 = vc.u32 %v3291_v36, %v3287_v27 }
 0x18e   :  { %v1332_v53 = vmul.f32 %v7693_v34, %v7693_v34  ;;  %v3270_v7 = vadd.s32 %v3268_v47, %v3262_v38  ;;  %vm3271_vm10 = vc.u32 %v3269_v0, %v3265_v59  ;;  %v3294_v49 = vsel %vm3293_vm9, 1, %v9761_v55 }
 0x18f   :  { %v3272_v54 = vsel %vm3271_vm10, 1, %v9761_v55  ;;  %v3286_v14 = vshrl.u32 %v3282_v23, 16  ;;  %v3296_v60 = vadd.s32 %v3294_v49, %v3292_v31  ;;  %v1676_v16 = vadd.s32 1, %v6330_v19 }
 0x190   :  { %v1333_v30 = vmul.f32 -0.001358992, %v1332_v53  ;;  %v1340_v4 = vmul.f32 -0.00019511016, %v1332_v53  ;;  %v3274_v22 = vadd.s32 %v3272_v54, %v3270_v7  ;;  %v3844_v48 = vadd.s32 3, %v1331_v63 }
 0x191   :  { %v3266_v29 = vshrl.u32 %v3261_v21, 16  ;;  %v3288_v61 = vshrl.u32 %v3283_v25, 16  ;;  %v3297_v39 = vadd.s32 %v3296_v60, %v3286_v14  ;;  %vm1677_vm11 = vcmp.gt.s32.totalorder %v1676_v16, 0  ;;  %v7731_v54 = vld [vmem:[%s9672_s4] ss:$0 sm:$0xff] }
 0x192   :  { %v1334_v11 = vadd.f32 0.041655596, %v1333_v30  ;;  %v1341_v3 = vadd.f32 0.008332121, %v1340_v4  ;;  %v3275_v26 = vadd.s32 %v3274_v22, %v3264_v8  ;;  %v1348_v38 = vand.u32 3, %v1331_v63 }
 0x193   :  { %v3245_v17 = vsel %vm3239_vm6, %v3242_v42, %v3244_v52  ;;  %v3298_v59 = vadd.s32 %v3297_v39, %v3288_v61  ;;  %v1678_v0 = vsel %vm1677_vm11, %v1676_v16, 0  ;;  %v7706_v7 = vadd.s32 %v3291_v36, %v3287_v27  ;;  %v7719_v42 = vpop.permute.xlu0 %235 }
 0x194   :  { %v1335_v23 = vmul.f32 %v1334_v11, %v1332_v53  ;;  %v1342_v47 = vmul.f32 %v1341_v3, %v1332_v53  ;;  %v7704_v31 = vadd.s32 %v3275_v26, %v3266_v29  ;;  %6457 = vpow2.f32 %v7574_v41 }
 0x195   :  { %v3845_v25 = vand.u32 3, %v3844_v48  ;;  %v3302_v21 = vadd.s32 1, %v3298_v59  ;;  %v1680_v19 = vand.u32 31, %v1678_v0  ;;  %v3299_v63 = vmul.u32 %v7580_v40, %v3245_v17 }
 0x196   :  { %v1336_v49 = vadd.f32 -0.4999988, %v1335_v23  ;;  %v1343_v8 = vadd.f32 -0.16666654, %v1342_v47  ;;  %vm3301_vm12 = vc.u32 %v7704_v31, %v7706_v7  ;;  %v7714_v11 = vmul.f32 %v7330_v12, %v7004_v28 }
 0x197   :  { %v3303_v39 = vsel %vm3301_vm12, %v3302_v21, %v3298_v59  ;;  %v1674_v61 = vor.u32 8388608, %v7649_v20  ;;  %v7717_v16 = vsub.s32 32, %v1680_v19  ;;  %vm1349_vm13 = vcmp.lt.s32.totalorder %v1348_v38, 2 }
 0x198   :  { %v1337_v3 = vmul.f32 %v1336_v49, %v1332_v53  ;;  %v1344_v41 = vmul.f32 %v1343_v8, %v1332_v53  ;;  %v3304_v5 = vadd.s32 %v3303_v39, %v3299_v63  ;;  %vm1347_vm14 = vweird.f32 %v7334_v9 }
 0x199   :  { %vm1350_vm15 = vcmp.eq.s32.totalorder %v1348_v38, 0  ;;  %vm1353_vm0 = vcmp.eq.s32.totalorder %v1348_v38, 2  ;;  %vm3846_vm1 = vcmp.lt.s32.totalorder %v3845_v25, 2  ;;  %vm3847_vm2 = vcmp.eq.s32.totalorder %v3845_v25, 0 }
 0x19a   :  { %v1338_v40 = vadd.f32 1.0, %v1337_v3  ;;  %v1345_v52 = vadd.f32 1.0, %v1344_v41  ;;  %vm3850_vm3 = vcmp.eq.s32.totalorder %v3845_v25, 2  ;;  %v3305_v27 = vadd.s32 536870912, %v3304_v5  ;;  %v6458_v36 = vpop.eup %6457 }
 0x19b   :  { %v1684_v20 = vshrl.u32 %v9763_v32, %v7717_v16  ;;  %v1687_v53 = vshrl.u32 %v9764_v57, %v7717_v16  ;;  %v7726_v26 = vshll.u32 %v1674_v61, 8  ;;  %v7735_v14 = vsub.f32 %v7731_v54, %v7719_v42 }
 0x19c   :  { %v1346_v60 = vmul.f32 %v1345_v52, %v7693_v34  ;;  %v1354_v30 = vxor.u32 2147483648, %v1338_v40  ;;  %v7738_v4 = vshrl.u32 %v3305_v27, 30  ;;  %v7740_v22 = vshrl.u32 %v1678_v0, 5 }
 0x19d   :  { %v1683_v48 = vshll.u32 %v9759_v6, %v1680_v19  ;;  %v1686_v29 = vshll.u32 %v9763_v32, %v1680_v19  ;;  %v1689_v17 = vshll.u32 %v9764_v57, %v1680_v19  ;;  %v1693_v59 = vshrl.u32 %v9771_v43, %v7717_v16 }
 0x19e   :  { %v1351_v23 = vxor.u32 2147483648, %v1346_v60  ;;  %v3307_v47 = vshll.u32 %v7738_v4, 30  ;;  %v1690_v34 = vshrl.u32 %v9765_v45, %v7717_v16  ;;  %v1692_v21 = vshll.u32 %v9765_v45, %v1680_v19 }
 0x19f   :  { %v1355_v0 = vsel %vm1353_vm0, %v1354_v30, %v1346_v60  ;;  %v1685_v49 = vor.u32 %v1684_v20, %v1683_v48  ;;  %v7752_v8 = vor.u32 %v1687_v53, %v1686_v29  ;;  %v1696_v63 = vshrl.u32 %v9757_v2, %v7717_v16 }
 0x1a0   :  { %v1352_v39 = vsel %vm1350_vm15, %v1338_v40, %v1351_v23  ;;  %v3849_v61 = vsel %vm3847_vm2, %v1338_v40, %v1351_v23  ;;  %v3852_v3 = vsel %vm3850_vm3, %v1354_v30, %v1346_v60  ;;  %v3308_v41 = vsub.s32 %v3304_v5, %v3307_v47 }
 0x1a1   :  { %v1356_v52 = vsel %vm1349_vm13, %v1352_v39, %v1355_v0  ;;  %v3853_v27 = vsel %vm3846_vm1, %v3849_v61, %v3852_v3  ;;  %v1694_v24 = vor.u32 %v1693_v59, %v1692_v21  ;;  %v1695_v62 = vshll.u32 %v9771_v43, %v1680_v19 }
 0x1a2   :  { %v1357_v20 = vsel %vm1347_vm14, nan, %v1356_v52  ;;  %v3854_v53 = vsel %vm1347_vm14, nan, %v3853_v27  ;;  %vm3309_vm4 = vcmp.lt.s32.totalorder %v3308_v41, 0  ;;  %v3310_v48 = vsub.s32 0, %v3308_v41 }
 0x1a3   :  { %v3668_v29 = vmul.f32 %v6458_v36, %v1357_v20  ;;  %v6180_v40 = vmul.f32 %v6458_v36, %v3854_v53  ;;  %v1691_v23 = vor.u32 %v1690_v34, %v1689_v17  ;;  %v1697_v60 = vor.u32 %v1696_v63, %v1695_v62  ;;  %v7800_v63 = vld [vmem:[%s9673_s5] ss:$0 sm:$0xff] }
 0x1a4   :  { %v7768_v38 = vmul.f32 %v7330_v12, %v7218_v37  ;;  %v3311_v25 = vsel %vm3309_vm4, %v3310_v48, %v3308_v41  ;;  %vm1698_vm5 = vcmp.lt.s32.totalorder %v7740_v22, 1  ;;  %vm1701_vm6 = vcmp.lt.s32.totalorder %v7740_v22, 4 }
 0x1a5   :  { %3684 = vst [vmem:[#allocation16] sm:$0xf] %v3668_v29  ;;  %vm3208_vm7 = vcmp.lt.s32.totalorder %v7521_v13, 0  ;;  %v3312_v9 = vclz %v3311_v25  ;;  %v1706_v19 = vsel %vm1698_vm5, %v1685_v49, %v7752_v8  ;;  %v1707_v62 = vsel %vm1701_vm6, %v1694_v24, 920167782 }
 0x1a6   :  { %v1715_v5 = vand.u32 65535, %v7726_v26  ;;  %6196 = vst [vmem:[#allocation17] sm:$0xf] %v6180_v40  ;;  %vm1699_vm8 = vcmp.lt.s32.totalorder %v7740_v22, 2  ;;  %vm1700_vm9 = vcmp.lt.s32.totalorder %v7740_v22, 3  ;;  %v1716_v12 = vshrl.u32 %v7726_v26, 16 }
 0x1a7   :  { %v615_v36 = vmul.f32 %v7735_v14, %v7735_v14  ;;  %v6361_v30 = vadd.s32 4294967294, %v3312_v9  ;;  %v1708_v17 = vsel %vm1700_vm9, %v1691_v23, %v1707_v62  ;;  %v1710_v59 = vsel %vm1698_vm5, %v7752_v8, %v1691_v23 }
 0x1a8   :  { %v1711_v47 = vsel %vm1701_vm6, %v1697_v60, 1326507024  ;;  %v3300_v34 = vadd.s32 %v7706_v7, %v7704_v31  ;;  %v1682_v21 = vshrl.u32 %v9759_v6, %v7717_v16  ;;  %v1709_v0 = vsel %vm1699_vm8, %v1706_v19, %v1708_v17 }
 0x1a9   :  { %v7804_v39 = vmul.f32 %v7800_v63, %v7719_v42  ;;  %vm6362_vm10 = vcmp.lt.s32.totalorder %v6361_v30, 0  ;;  %v1712_v61 = vsel %vm1700_vm9, %v1694_v24, %v1711_v47  ;;  %v1739_v31 = vand.u32 65535, %v1709_v0 }
 0x1aa   :  { %v1740_v7 = vshrl.u32 %v1709_v0, 16  ;;  %v3315_v3 = vsel %vm6362_vm10, 0, %v6361_v30  ;;  %v3330_v16 = vsub.s32 4, %v7738_v4  ;;  %v1713_v52 = vsel %vm1699_vm8, %v1710_v59, %v1712_v61 }
 0x1ab   :  { %v631_v27 = vadd.f32 %v615_v36, %v7564_v56  ;;  %v3316_v20 = vsub.s32 32, %v3315_v3  ;;  %v3320_v53 = vsub.s32 4294967266, %v3315_v3  ;;  %v1703_v42 = vsel %vm1701_vm6, %v1691_v23, 2102212464 }
 0x1ac   :  { %v1717_v48 = vand.u32 65535, %v1713_v52  ;;  %v3317_v29 = vshll.u32 %v3308_v41, %v3315_v3  ;;  %v1702_v24 = vsel %vm1698_vm5, %v1682_v21, %v1685_v49  ;;  %v1718_v40 = vshrl.u32 %v1713_v52, 16 }
 0x1ad   :  { %v1742_v60 = vmul.u32 %v1740_v7, %v1715_v5  ;;  %v3318_v25 = vshrl.u32 %v3300_v34, %v3316_v20  ;;  %v3321_v9 = vadd.s32 127, %v3320_v53  ;;  %v1743_v62 = vmul.u32 %v1739_v31, %v1716_v12 }
 0x1ae   :  { %v1721_v19 = vmul.u32 %v1717_v48, %v1716_v12  ;;  %v3331_v56 = vsel %vm3208_vm7, %v3330_v16, %v7738_v4  ;;  %v1704_v36 = vsel %vm1700_vm9, %v7752_v8, %v1703_v42  ;;  %v1720_v23 = vmul.u32 %v1718_v40, %v1715_v5 }
 0x1af   :  { %v1745_v30 = vshll.u32 %v1742_v60, 16  ;;  %v3319_v41 = vor.u32 %v3318_v25, %v3317_v29  ;;  %v3322_v17 = vshll.u32 %v3321_v9, 23  ;;  %v1719_v59 = vmul.u32 %v1717_v48, %v1715_v5 }
 0x1b0   :  { %v1741_v49 = vmul.u32 %v1739_v31, %v1715_v5  ;;  %v1722_v47 = vmul.u32 %v1718_v40, %v1716_v12  ;;  %v1723_v21 = vshll.u32 %v1720_v23, 16  ;;  %v1725_v34 = vshll.u32 %v1721_v19, 16 }
 0x1b1   :  { %v1744_v0 = vmul.u32 %v1740_v7, %v1716_v12  ;;  %v3323_v61 = vor.u32 4788187, %v3322_v17  ;;  %v3326_v3 = vcvt.s32.f32 %v3319_v41  ;;  %v1747_v52 = vshll.u32 %v1743_v62, 16 }
 0x1b2   :  { %vm1749_vm11 = vc.u32 %v1741_v49, %v1745_v30  ;;  %vm1727_vm12 = vc.u32 %v1719_v59, %v1723_v21  ;;  %v1729_v4 = vadd.s32 %v1723_v21, %v1719_v59  ;;  %v1751_v20 = vadd.s32 %v1745_v30, %v1741_v49 }
 0x1b3   :  { %v1750_v16 = vsel %vm1749_vm11, 1, %v9761_v55  ;;  %v3324_v8 = vand.u32 2147483647, %v3323_v61  ;;  %v1728_v53 = vsel %vm1727_vm12, 1, %v9761_v55  ;;  %6459 = vrcp.f32 %v631_v27 }
 0x1b4   :  { %v1752_v42 = vadd.s32 %v1750_v16, %v1744_v0  ;;  %v1730_v48 = vadd.s32 %v1728_v53, %v1722_v47  ;;  %vm1731_vm13 = vc.u32 %v1729_v4, %v1725_v34  ;;  %vm1753_vm14 = vc.u32 %v1751_v20, %v1747_v52 }
 0x1b5   :  { %v9716_v5 = vand.u32 2147483647, %v7804_v39  ;;  %v3327_v12 = vmul.f32 %v3326_v3, %v3324_v8  ;;  %v1724_v31 = vshrl.u32 %v1720_v23, 16  ;;  %v1732_v7 = vsel %vm1731_vm13, 1, %v9761_v55 }
 0x1b6   :  { %v1754_v29 = vsel %vm1753_vm14, 1, %v9761_v55  ;;  %v1734_v40 = vadd.s32 %v1732_v7, %v1730_v48  ;;  %v1746_v25 = vshrl.u32 %v1742_v60, 16  ;;  %v1515_v30 = vand.u32 2139095040, %v7804_v39 }
 0x1b7   :  { %v1756_v9 = vadd.s32 %v1754_v29, %v1752_v42  ;;  %v3328_v41 = vxor.u32 2147483648, %v3327_v12  ;;  %v1726_v17 = vshrl.u32 %v1721_v19, 16  ;;  %v1748_v59 = vshrl.u32 %v1743_v62, 16 }
 0x1b8   :  { %v553_v27 = vperm.slane %v7514_v35, 3  ;;  %v1735_v49 = vadd.s32 %v1734_v40, %v1724_v31  ;;  %v1516_v21 = vshrl.u32 %v1515_v30, 23  ;;  %v7831_v23 = vmul.f32 %v7338_v44, %v7221_v15  ;;  %v7861_v30 = vpop.permute.xlu1 %263 }
 0x1b9   :  { %v1757_v47 = vadd.s32 %v1756_v9, %v1746_v25  ;;  %v7833_v34 = vpop.eup %6459  ;;  %v9785_v0 = vand.u32 2147483647, %v7521_v13  ;;  %v3329_v60 = vsel %vm3208_vm7, %v3328_v41, %v3327_v12  ;;  %v1705_v19 = vsel %vm1699_vm8, %v1702_v24, %v1704_v36 }
 0x1ba   :  { %9784 = vst [vmem:[#allocation46_spill] sm:$0xff] %v7831_v23  ;;  %v1755_v62 = vadd.s32 %v1751_v20, %v1747_v52  ;;  %558 = vperm.xlu0 %6436, %v553_v27   ;;  %v1736_v61 = vadd.s32 %v1735_v49, %v1726_v17  ;;  %v7846_v15 = vmul.f32 %v7833_v34, %v7735_v14  ;;  %v1176_v44 = vmul.f32 1.442695, %v7568_v51 }
 0x1bb   :  { %vm3207_vm15 = vcmp.le.f32.partialorder %v9785_v0, 0.7853982  ;;  %v1758_v3 = vadd.s32 %v1757_v47, %v1748_v59  ;;  %v6327_v8 = vadd.s32 4294967169, %v1516_v21  ;;  %v1178_v22 = vmul.f32 1.442695, %v7714_v11 }
 0x1bc   :  { %v7842_v35 = vsel %vm3207_vm15, %v7521_v13, %v3329_v60  ;;  %9786 = vst [vmem:[#allocation47_spill] sm:$0xff] %v7846_v15  ;;  %v3333_v4 = vsel %vm3207_vm15, 0, %v3331_v56  ;;  %vm1761_vm0 = vc.u32 %v1736_v61, %v1755_v62  ;;  %v1519_v36 = vand.u32 8388607, %v9716_v5 }
 0x1bd   :  { %v3334_v16 = vmul.f32 %v7842_v35, %v7842_v35  ;;  %v1762_v24 = vadd.s32 1, %v1758_v3  ;;  %v1759_v53 = vmul.u32 %v7726_v26, %v1705_v19  ;;  %v1522_v14 = vadd.s32 1, %v6327_v8 }
 0x1be   :  { %v7856_v42 = vsub.f32 0.0, %v7004_v28  ;;  %v1198_v51 = vmul.f32 1.442695, %v7768_v38  ;;  %v5859_v56 = vadd.s32 3, %v3333_v4  ;;  %6461 = vpow2.f32 %v1176_v44 }
 0x1bf   :  { %v3335_v52 = vmul.f32 -0.001358992, %v3334_v16  ;;  %v3342_v20 = vmul.f32 -0.00019511016, %v3334_v16  ;;  %v1763_v48 = vsel %vm1761_vm0, %v1762_v24, %v1758_v3  ;;  %vm1523_vm1 = vcmp.gt.s32.totalorder %v1522_v14, 0 }
 0x1c0   :  { %v1764_v11 = vadd.s32 %v1763_v48, %v1759_v53  ;;  %v7859_v7 = vand.u32 3, %v3333_v4  ;;  %v1520_v29 = vor.u32 8388608, %v1519_v36  ;;  %v1524_v40 = vsel %vm1523_vm1, %v1522_v14, 0 }
 0x1c1   :  { %v3336_v12 = vadd.f32 0.041655596, %v3335_v52  ;;  %v3343_v31 = vadd.f32 0.008332121, %v3342_v20  ;;  %6463 = vpow2.f32 %v1178_v22  ;;  %v7864_v28 = vsub.f32 0.0, %v6878_v58 }
 0x1c2   :  { %v1765_v9 = vadd.s32 536870912, %v1764_v11  ;;  %v7868_v38 = vmul.f32 %v7856_v42, %v7856_v42  ;;  %6465 = vpow2.f32 %v1198_v51  ;;  %v5860_v41 = vand.u32 3, %v5859_v56 }
 0x1c3   :  { %v3337_v25 = vmul.f32 %v3336_v12, %v3334_v16  ;;  %v3344_v26 = vmul.f32 %v3343_v31, %v3334_v16  ;;  %v1526_v49 = vand.u32 31, %v1524_v40  ;;  %vm3352_vm2 = vcmp.eq.s32.totalorder %v7859_v7, 0 }
 0x1c4   :  { %v7870_v27 = vshrl.u32 %v1765_v9, 30  ;;  %v7875_v47 = vsub.f32 %v7731_v54, %v7572_v46  ;;  %v7877_v21 = vshll.u32 %v1520_v29, 8  ;;  %v7881_v0 = vmul.f32 %v7800_v63, %v7861_v30  ;;  %v7886_v44 = vpop.eup %6461 }
 0x1c5   :  { %v3338_v17 = vadd.f32 -0.4999988, %v3337_v25  ;;  %v3345_v59 = vadd.f32 -0.16666654, %v3344_v26  ;;  %vm3351_vm3 = vcmp.lt.s32.totalorder %v7859_v7, 2  ;;  %vm3355_vm4 = vcmp.eq.s32.totalorder %v7859_v7, 2 }
 0x1c6   :  { %v1767_v3 = vshll.u32 %v7870_v27, 30  ;;  %vm3349_vm5 = vweird.f32 %v7521_v13  ;;  %vm5861_vm6 = vcmp.lt.s32.totalorder %v5860_v41, 2  ;;  %vm5862_vm7 = vcmp.eq.s32.totalorder %v5860_v41, 0 }
 0x1c7   :  { %v3339_v60 = vmul.f32 %v3338_v17, %v3334_v16  ;;  %v3346_v19 = vmul.f32 %v3345_v59, %v3334_v16  ;;  %vm5865_vm8 = vcmp.eq.s32.totalorder %v5860_v41, 2  ;;  %v1760_v46 = vadd.s32 %v1755_v62, %v1736_v61  ;;  %v7889_v4 = vpop.eup %6463 }
 0x1c8   :  { %v7891_v24 = vsub.s32 %v1764_v11, %v1767_v3  ;;  %v7893_v16 = vsub.s32 32, %v1526_v49  ;;  %v6466_v36 = vpop.eup %6465  ;;  %v7895_v52 = vshrl.u32 %v1524_v40, 5  ;;  %v7898_v20 = vand.u32 65535, %v7877_v21 }
 0x1c9   :  { %v3340_v8 = vadd.f32 1.0, %v3339_v60  ;;  %v3347_v22 = vadd.f32 1.0, %v3346_v19  ;;  %v7901_v53 = vshrl.u32 %v7877_v21, 16  ;;  %vm1668_vm9 = vcmp.lt.s32.totalorder %v7584_v33, 0 }
 0x1ca   :  { %vm1769_vm10 = vcmp.lt.s32.totalorder %v7891_v24, 0  ;;  %v1770_v51 = vsub.s32 0, %v7891_v24  ;;  %v1529_v56 = vshll.u32 %v9759_v6, %v1526_v49  ;;  %v1532_v48 = vshll.u32 %v9763_v32, %v1526_v49 }
 0x1cb   :  { %v3348_v62 = vmul.f32 %v3347_v22, %v7842_v35  ;;  %v3356_v61 = vxor.u32 2147483648, %v3340_v8  ;;  %v1535_v12 = vshll.u32 %v9764_v57, %v1526_v49  ;;  %v1530_v35 = vshrl.u32 %v9763_v32, %v7893_v16 }
 0x1cc   :  { %v1771_v29 = vsel %vm1769_vm10, %v1770_v51, %v7891_v24  ;;  %v1533_v40 = vshrl.u32 %v9764_v57, %v7893_v16  ;;  %v1790_v26 = vsub.s32 4, %v7870_v27  ;;  %v1536_v9 = vshrl.u32 %v9765_v45, %v7893_v16 }
 0x1cd   :  { %v3353_v11 = vxor.u32 2147483648, %v3348_v62  ;;  %v1772_v25 = vclz %v1771_v29  ;;  %v1539_v17 = vshrl.u32 %v9771_v43, %v7893_v16  ;;  %v3357_v60 = vsel %vm3355_vm4, %v3356_v61, %v3348_v62 }
 0x1ce   :  { %v5867_v3 = vsel %vm5865_vm8, %v3356_v61, %v3348_v62  ;;  %v1538_v5 = vshll.u32 %v9765_v45, %v1526_v49  ;;  %v1531_v15 = vor.u32 %v1530_v35, %v1529_v56  ;;  %v1534_v23 = vor.u32 %v1533_v40, %v1532_v48 }
 0x1cf   :  { %v3354_v59 = vsel %vm3352_vm2, %v3340_v8, %v3353_v11  ;;  %v5864_v19 = vsel %vm5862_vm7, %v3340_v8, %v3353_v11  ;;  %v6331_v29 = vadd.s32 4294967294, %v1772_v25  ;;  %v9787_v62 = vand.u32 2147483647, %v7584_v33 }
 0x1d0   :  { %v3358_v22 = vsel %vm3351_vm3, %v3354_v59, %v3357_v60  ;;  %v5868_v51 = vsel %vm5861_vm6, %v5864_v19, %v5867_v3  ;;  %v1540_v41 = vor.u32 %v1539_v17, %v1538_v5  ;;  %v1537_v11 = vor.u32 %v1536_v9, %v1535_v12 }
 0x1d1   :  { %v3359_v14 = vsel %vm3349_vm5, nan, %v3358_v22  ;;  %v5869_v31 = vsel %vm3349_vm5, nan, %v5868_v51  ;;  %vm7938_vm11 = vcmp.le.f32.partialorder %v9787_v62, 0.7853982  ;;  %vm6332_vm12 = vcmp.lt.s32.totalorder %v6331_v29, 0 }
 0x1d2   :  { %v3681_v37 = vmul.f32 %v6466_v36, %v3359_v14  ;;  %v6193_v8 = vmul.f32 %v6466_v36, %v5869_v31  ;;  %v1775_v61 = vsel %vm6332_vm12, 0, %v6331_v29  ;;  %v1541_v25 = vshll.u32 %v9771_v43, %v1526_v49 }
 0x1d3   :  { %v1542_v13 = vshrl.u32 %v9757_v2, %v7893_v16  ;;  %v1776_v56 = vsub.s32 32, %v1775_v61  ;;  %v1780_v48 = vsub.s32 4294967266, %v1775_v61  ;;  %v1791_v36 = vsel %vm1668_vm9, %v1790_v26, %v7870_v27 }
 0x1d4   :  { %3697 = vst [vmem:[#allocation16 + $0x34] sm:$0xf] %v3681_v37  ;;  %vm1544_vm13 = vcmp.lt.s32.totalorder %v7895_v52, 1  ;;  %vm1546_vm14 = vcmp.lt.s32.totalorder %v7895_v52, 3  ;;  %vm1547_vm15 = vcmp.lt.s32.totalorder %v7895_v52, 4  ;;  %v1777_v49 = vshll.u32 %v7891_v24, %v1775_v61 }
 0x1d5   :  { %6209 = vst [vmem:[#allocation17 + $0x34] sm:$0xf] %v6193_v8  ;;  %v1543_v14 = vor.u32 %v1542_v13, %v1541_v25  ;;  %v1552_v5 = vsel %vm1544_vm13, %v1531_v15, %v1534_v23  ;;  %v1778_v37 = vshrl.u32 %v1760_v46, %v1776_v56  ;;  %v1781_v12 = vadd.s32 127, %v1780_v48 }
 0x1d6   :  { %v1553_v31 = vsel %vm1547_vm15, %v1540_v41, 920167782  ;;  %vm1545_vm0 = vcmp.lt.s32.totalorder %v7895_v52, 2  ;;  %v1556_v35 = vsel %vm1544_vm13, %v1534_v23, %v1537_v11  ;;  %v1528_v17 = vshrl.u32 %v9759_v6, %v7893_v16 }
 0x1d7   :  { %v1554_v27 = vsel %vm1546_vm14, %v1537_v11, %v1553_v31  ;;  %v1557_v40 = vsel %vm1547_vm15, %v1543_v14, 1326507024  ;;  %v1779_v26 = vor.u32 %v1778_v37, %v1777_v49  ;;  %v1782_v9 = vshll.u32 %v1781_v12, 23 }
 0x1d8   :  { %v1555_v46 = vsel %vm1545_vm0, %v1552_v5, %v1554_v27  ;;  %v1558_v24 = vsel %vm1546_vm14, %v1540_v41, %v1557_v40  ;;  %v1549_v22 = vsel %vm1547_vm15, %v1537_v11, 2102212464  ;;  %v7975_v8 = vsel %vm7938_vm11, 0, %v1791_v36 }
 0x1d9   :  { %v1559_v59 = vsel %vm1545_vm0, %v1556_v35, %v1558_v24  ;;  %v1585_v60 = vand.u32 65535, %v1555_v46  ;;  %v1586_v19 = vshrl.u32 %v1555_v46, 16  ;;  %v1783_v3 = vor.u32 4788187, %v1782_v9 }
 0x1da   :  { %v1563_v51 = vand.u32 65535, %v1559_v59  ;;  %v1564_v29 = vshrl.u32 %v1559_v59, 16  ;;  %v1548_v62 = vsel %vm1544_vm13, %v1528_v17, %v1531_v15  ;;  %v1786_v25 = vcvt.s32.f32 %v1779_v26  ;;  %v257_v17 = vpop.permute.xlu0 %256 }
 0x1db   :  { %v1588_v16 = vmul.u32 %v1586_v19, %v7898_v20  ;;  %v1589_v41 = vmul.u32 %v1585_v60, %v7901_v53  ;;  %v1784_v61 = vand.u32 2147483647, %v1783_v3  ;;  %v1550_v11 = vsel %vm1546_vm14, %v1534_v23, %v1549_v22 }
 0x1dc   :  { %v1566_v13 = vmul.u32 %v1564_v29, %v7898_v20  ;;  %v1567_v56 = vmul.u32 %v1563_v51, %v7901_v53  ;;  %v1587_v48 = vmul.u32 %v1585_v60, %v7898_v20  ;;  %v1590_v36 = vmul.u32 %v1586_v19, %v7901_v53 }
 0x1dd   :  { %v1591_v14 = vshll.u32 %v1588_v16, 16  ;;  %v1787_v5 = vmul.f32 %v1786_v25, %v1784_v61  ;;  %v1565_v15 = vmul.u32 %v1563_v51, %v7898_v20  ;;  %v1568_v49 = vmul.u32 %v1564_v29, %v7901_v53 }
 0x1de   :  { %v1569_v37 = vshll.u32 %v1566_v13, 16  ;;  %v1571_v12 = vshll.u32 %v1567_v56, 16  ;;  %v1593_v31 = vshll.u32 %v1589_v41, 16  ;;  %v1551_v26 = vsel %vm1545_vm0, %v1548_v62, %v1550_v11 }
 0x1df   :  { %vm1595_vm1 = vc.u32 %v1587_v48, %v1591_v14  ;;  %v1597_v27 = vadd.s32 %v1591_v14, %v1587_v48  ;;  %v1788_v35 = vxor.u32 2147483648, %v1787_v5  ;;  %v1592_v52 = vshrl.u32 %v1588_v16, 16 }
 0x1e0   :  { %vm1573_vm2 = vc.u32 %v1565_v15, %v1569_v37  ;;  %v1575_v40 = vadd.s32 %v1569_v37, %v1565_v15  ;;  %v1596_v23 = vsel %vm1595_vm1, 1, %v9761_v55  ;;  %v1570_v22 = vshrl.u32 %v1566_v13, 16 }
 0x1e1   :  { %v1574_v9 = vsel %vm1573_vm2, 1, %v9761_v55  ;;  %v1598_v46 = vadd.s32 %v1596_v23, %v1590_v36  ;;  %vm1599_vm3 = vc.u32 %v1597_v27, %v1593_v31  ;;  %v1789_v20 = vsel %vm1668_vm9, %v1788_v35, %v1787_v5 }
 0x1e2   :  { %v1576_v53 = vadd.s32 %v1574_v9, %v1568_v49  ;;  %vm1577_vm4 = vc.u32 %v1575_v40, %v1571_v12  ;;  %v1600_v24 = vsel %vm1599_vm3, 1, %v9761_v55  ;;  %v1792_v59 = vsel %vm7938_vm11, %v7584_v33, %v1789_v20 }
 0x1e3   :  { %v1578_v60 = vsel %vm1577_vm4, 1, %v9761_v55  ;;  %v1602_v19 = vadd.s32 %v1600_v24, %v1598_v46  ;;  %v1794_v3 = vmul.f32 %v1792_v59, %v1792_v59  ;;  %v9790_v29 = vand.u32 2139095040, %v7881_v0 }
 0x1e4   :  { %v1580_v51 = vadd.s32 %v1578_v60, %v1576_v53  ;;  %v1572_v61 = vshrl.u32 %v1567_v56, 16  ;;  %v1594_v25 = vshrl.u32 %v1589_v41, 16  ;;  %v8003_v48 = vsub.f32 %v7731_v54, %v257_v17 }
 0x1e5   :  { %v2132_v62 = vshrl.u32 %v9790_v29, 23  ;;  %v1603_v11 = vadd.s32 %v1602_v19, %v1592_v52  ;;  %v1795_v36 = vmul.f32 -0.001358992, %v1794_v3  ;;  %v1802_v14 = vmul.f32 -0.00019511016, %v1794_v3 }
 0x1e6   :  { %v1581_v7 = vadd.s32 %v1580_v51, %v1570_v22  ;;  %v616_v16 = vmul.f32 %v7875_v47, %v7875_v47  ;;  %v8007_v15 = vadd.s32 %v1597_v27, %v1593_v31  ;;  %v618_v49 = vmul.f32 %v8003_v48, %v8003_v48 }
 0x1e7   :  { %v6339_v5 = vadd.s32 4294967169, %v2132_v62  ;;  %v1604_v13 = vadd.s32 %v1603_v11, %v1594_v25  ;;  %v1796_v37 = vadd.f32 0.041655596, %v1795_v36  ;;  %v1803_v56 = vadd.f32 0.008332121, %v1802_v14 }
 0x1e8   :  { %v8011_v41 = vadd.s32 %v1581_v7, %v1572_v61  ;;  %v4309_v54 = vadd.s32 3, %v7975_v8  ;;  %v1605_v35 = vmul.u32 %v7877_v21, %v1551_v26  ;;  %v634_v23 = vadd.f32 %v618_v49, %v7558_v18 }
 0x1e9   :  { %v2138_v12 = vadd.s32 1, %v6339_v5  ;;  %v1608_v40 = vadd.s32 1, %v1604_v13  ;;  %v1797_v9 = vmul.f32 %v1796_v37, %v1794_v3  ;;  %v1804_v46 = vmul.f32 %v1803_v56, %v1794_v3 }
 0x1ea   :  { %vm1607_vm5 = vc.u32 %v8011_v41, %v8007_v15  ;;  %v9791_v31 = vand.u32 2147483647, %v7881_v0  ;;  %v8021_v20 = vsub.f32 0.0, %v7615_v1  ;;  %v1810_v53 = vand.u32 3, %v7975_v8 }
 0x1eb   :  { %v1609_v24 = vsel %vm1607_vm5, %v1608_v40, %v1604_v13  ;;  %vm2139_vm6 = vcmp.gt.s32.totalorder %v2138_v12, 0  ;;  %v1798_v60 = vadd.f32 -0.4999988, %v1797_v9  ;;  %v1805_v21 = vadd.f32 -0.16666654, %v1804_v46 }
 0x1ec   :  { %v2135_v27 = vand.u32 8388607, %v9791_v31  ;;  %v1610_v26 = vadd.s32 %v1609_v24, %v1605_v35  ;;  %v2140_v52 = vsel %vm2139_vm6, %v2138_v12, 0  ;;  %v8025_v18 = vadd.f32 %v616_v16, %v7868_v38 }
 0x1ed   :  { %v4310_v19 = vand.u32 3, %v4309_v54  ;;  %v2142_v22 = vand.u32 31, %v2140_v52  ;;  %v8028_v51 = vmul.f32 %v7800_v63, %v257_v17  ;;  %v1799_v29 = vmul.f32 %v1798_v60, %v1794_v3 }
 0x1ee   :  { %v1806_v62 = vmul.f32 %v1805_v21, %v1794_v3  ;;  %v1611_v61 = vadd.s32 536870912, %v1610_v26  ;;  %v2136_v25 = vor.u32 8388608, %v2135_v27  ;;  %vm1809_vm7 = vweird.f32 %v7584_v33 }
 0x1ef   :  { %vm1811_vm8 = vcmp.lt.s32.totalorder %v1810_v53, 2  ;;  %vm1812_vm9 = vcmp.eq.s32.totalorder %v1810_v53, 0  ;;  %vm1815_vm10 = vcmp.eq.s32.totalorder %v1810_v53, 2  ;;  %v1800_v8 = vadd.f32 1.0, %v1799_v29 }
 0x1f0   :  { %v1807_v11 = vadd.f32 1.0, %v1806_v62  ;;  %v1612_v36 = vshrl.u32 %v1611_v61, 30  ;;  %v2143_v14 = vsub.s32 32, %v2142_v22  ;;  %vm4311_vm11 = vcmp.lt.s32.totalorder %v4310_v19, 2 }
 0x1f1   :  { %vm4312_vm12 = vcmp.eq.s32.totalorder %v4310_v19, 0  ;;  %vm4315_vm13 = vcmp.eq.s32.totalorder %v4310_v19, 2  ;;  %v9721_v38 = vand.u32 2147483647, %v8028_v51  ;;  %v1816_v17 = vxor.u32 2147483648, %v1800_v8 }
 0x1f2   :  { %v1808_v63 = vmul.f32 %v1807_v11, %v1792_v59  ;;  %v1613_v7 = vshll.u32 %v1612_v36, 30  ;;  %v8032_v3 = vshll.u32 %v2136_v25, 8  ;;  %v8034_v5 = vshrl.u32 %v2140_v52, 5 }
 0x1f3   :  { %v2145_v16 = vshll.u32 %v9759_v6, %v2142_v22  ;;  %v2148_v13 = vshll.u32 %v9763_v32, %v2142_v22  ;;  %6467 = vrcp.f32 %v634_v23  ;;  %vm1514_vm14 = vcmp.lt.s32.totalorder %v7804_v39, 0 }
 0x1f4   :  { %v1813_v49 = vxor.u32 2147483648, %v1808_v63  ;;  %v8039_v37 = vsub.s32 %v1610_v26, %v1613_v7  ;;  %v2146_v56 = vshrl.u32 %v9763_v32, %v2143_v14  ;;  %v2151_v59 = vshll.u32 %v9764_v57, %v2142_v22 }
 0x1f5   :  { %v1817_v12 = vsel %vm1815_vm10, %v1816_v17, %v1808_v63  ;;  %v4317_v54 = vsel %vm4315_vm13, %v1816_v17, %v1808_v63  ;;  %v2149_v35 = vshrl.u32 %v9764_v57, %v2143_v14  ;;  %v2155_v40 = vshrl.u32 %v9771_v43, %v2143_v14 }
 0x1f6   :  { %v1814_v9 = vsel %vm1812_vm9, %v1800_v8, %v1813_v49  ;;  %v4314_v23 = vsel %vm4312_vm12, %v1800_v8, %v1813_v49  ;;  %vm1615_vm15 = vcmp.lt.s32.totalorder %v8039_v37, 0  ;;  %v1616_v46 = vsub.s32 0, %v8039_v37 }
 0x1f7   :  { %v1818_v31 = vsel %vm1811_vm8, %v1814_v9, %v1817_v12  ;;  %v4318_v27 = vsel %vm4311_vm11, %v4314_v23, %v4317_v54  ;;  %v2152_v24 = vshrl.u32 %v9765_v45, %v2143_v14  ;;  %v2154_v60 = vshll.u32 %v9765_v45, %v2142_v22 }
 0x1f8   :  { %v1819_v21 = vsel %vm1809_vm7, nan, %v1818_v31  ;;  %v4319_v26 = vsel %vm1809_vm7, nan, %v4318_v27  ;;  %v1617_v52 = vsel %vm1615_vm15, %v1616_v46, %v8039_v37  ;;  %v2158_v29 = vshrl.u32 %v9757_v2, %v2143_v14 }
 0x1f9   :  { %v8061_v62 = vpop.eup %6467  ;;  %v3671_v53 = vmul.f32 %v7889_v4, %v1819_v21  ;;  %v6183_v19 = vmul.f32 %v7889_v4, %v4319_v26  ;;  %v1618_v61 = vclz %v1617_v52  ;;  %v1636_v25 = vsub.s32 4, %v1612_v36 }
 0x1fa   :  { %v2147_v8 = vor.u32 %v2146_v56, %v2145_v16  ;;  %v2150_v11 = vor.u32 %v2149_v35, %v2148_v13  ;;  %v2156_v63 = vor.u32 %v2155_v40, %v2154_v60  ;;  %v2157_v17 = vshll.u32 %v9771_v43, %v2142_v22 }
 0x1fb   :  { %3687 = vst [vmem:[#allocation16 + $0xc] sm:$0xf] %v3671_v53  ;;  %v9792_v33 = vand.u32 2147483647, %v7804_v39  ;;  %v1606_v49 = vadd.s32 %v8007_v15, %v8011_v41  ;;  %v6328_v12 = vadd.s32 4294967294, %v1618_v61  ;;  %v2153_v54 = vor.u32 %v2152_v24, %v2151_v59 }
 0x1fc   :  { %v2177_v4 = vand.u32 65535, %v8032_v3  ;;  %6199 = vst [vmem:[#allocation17 + $0xc] sm:$0xf] %v6183_v19  ;;  %v2144_v16 = vshrl.u32 %v9759_v6, %v2143_v14  ;;  %v2159_v13 = vor.u32 %v2158_v29, %v2157_v17  ;;  %v2178_v22 = vshrl.u32 %v8032_v3, 16 }
 0x1fd   :  { %vm8068_vm0 = vcmp.le.f32.partialorder %v9792_v33, 0.7853982  ;;  %v1977_v56 = vand.u32 2139095040, %v8028_v51  ;;  %vm6329_vm1 = vcmp.lt.s32.totalorder %v6328_v12, 0  ;;  %v1637_v35 = vsel %vm1514_vm14, %v1636_v25, %v1612_v36 }
 0x1fe   :  { %vm2160_vm2 = vcmp.lt.s32.totalorder %v8034_v5, 1  ;;  %vm2163_vm3 = vcmp.lt.s32.totalorder %v8034_v5, 4  ;;  %v1621_v15 = vsel %vm6329_vm1, 0, %v6328_v12  ;;  %v8088_v59 = vmul.f32 %v8061_v62, %v8003_v48 }
 0x1ff   :  { %v2168_v41 = vsel %vm2160_vm2, %v2147_v8, %v2150_v11  ;;  %v2169_v14 = vsel %vm2163_vm3, %v2156_v63, 920167782  ;;  %v1622_v40 = vsub.s32 32, %v1621_v15  ;;  %v1626_v9 = vsub.s32 4294967266, %v1621_v15 }
 0x200   :  { %9795 = vst [vmem:[#allocation48_spill] sm:$0xff] %v8088_v59  ;;  %vm2162_vm4 = vcmp.lt.s32.totalorder %v8034_v5, 3  ;;  %v2172_v36 = vsel %vm2160_vm2, %v2150_v11, %v2153_v54  ;;  %v1623_v23 = vshll.u32 %v8039_v37, %v1621_v15  ;;  %vm2161_vm5 = vcmp.lt.s32.totalorder %v8034_v5, 2 }
 0x201   :  { %v2170_v46 = vsel %vm2162_vm4, %v2153_v54, %v2169_v14  ;;  %v2173_v31 = vsel %vm2163_vm3, %v2159_v13, 1326507024  ;;  %v1624_v27 = vshrl.u32 %v1606_v49, %v1622_v40  ;;  %v1627_v48 = vadd.s32 127, %v1626_v9 }
 0x202   :  { %v2171_v24 = vsel %vm2161_vm5, %v2168_v41, %v2170_v46  ;;  %v2174_v60 = vsel %vm2162_vm4, %v2156_v63, %v2173_v31  ;;  %v2165_v21 = vsel %vm2163_vm3, %v2153_v54, 2102212464  ;;  %v1639_v25 = vsel %vm8068_vm0, 0, %v1637_v35 }
 0x203   :  { %v2175_v37 = vsel %vm2161_vm5, %v2172_v36, %v2174_v60  ;;  %v2201_v26 = vand.u32 65535, %v2171_v24  ;;  %v2202_v52 = vshrl.u32 %v2171_v24, 16  ;;  %v1625_v29 = vor.u32 %v1624_v27, %v1623_v23 }
 0x204   :  { %v1628_v53 = vshll.u32 %v1627_v48, 23  ;;  %v2179_v19 = vand.u32 65535, %v2175_v37  ;;  %v2180_v61 = vshrl.u32 %v2175_v37, 16  ;;  %v2164_v17 = vsel %vm2160_vm2, %v2144_v16, %v2147_v8 }
 0x205   :  { %v2204_v33 = vmul.u32 %v2202_v52, %v2177_v4  ;;  %v2205_v63 = vmul.u32 %v2201_v26, %v2178_v22  ;;  %v2166_v12 = vsel %vm2162_vm4, %v2150_v11, %v2165_v21  ;;  %v1978_v13 = vshrl.u32 %v1977_v56, 23 }
 0x206   :  { %v1629_v49 = vor.u32 4788187, %v1628_v53  ;;  %v2182_v54 = vmul.u32 %v2180_v61, %v2177_v4  ;;  %v2183_v15 = vmul.u32 %v2179_v19, %v2178_v22  ;;  %v2203_v41 = vmul.u32 %v2201_v26, %v2177_v4 }
 0x207   :  { %v2206_v14 = vmul.u32 %v2202_v52, %v2178_v22  ;;  %v2207_v40 = vshll.u32 %v2204_v33, 16  ;;  %v1632_v36 = vcvt.s32.f32 %v1625_v29  ;;  %v2181_v23 = vmul.u32 %v2179_v19, %v2177_v4 }
 0x208   :  { %v1630_v9 = vand.u32 2147483647, %v1629_v49  ;;  %v2185_v46 = vshll.u32 %v2182_v54, 16  ;;  %v2184_v35 = vmul.u32 %v2180_v61, %v2178_v22  ;;  %v2187_v31 = vshll.u32 %v2183_v15, 16 }
 0x209   :  { %v2209_v27 = vshll.u32 %v2205_v63, 16  ;;  %vm2211_vm6 = vc.u32 %v2203_v41, %v2207_v40  ;;  %v2213_v56 = vadd.s32 %v2207_v40, %v2203_v41  ;;  %v6336_v60 = vadd.s32 4294967169, %v1978_v13 }
 0x20a   :  { %v1633_v8 = vmul.f32 %v1632_v36, %v1630_v9  ;;  %vm2189_vm7 = vc.u32 %v2181_v23, %v2185_v46  ;;  %v2191_v16 = vadd.s32 %v2185_v46, %v2181_v23  ;;  %v2212_v48 = vsel %vm2211_vm6, 1, %v9761_v55 }
 0x20b   :  { %v2190_v11 = vsel %vm2189_vm7, 1, %v9761_v55  ;;  %v2214_v24 = vadd.s32 %v2212_v48, %v2206_v14  ;;  %v4154_v37 = vadd.s32 3, %v1639_v25  ;;  %v2167_v4 = vsel %vm2161_vm5, %v2164_v17, %v2166_v12 }
 0x20c   :  { %v1634_v21 = vxor.u32 2147483648, %v1633_v8  ;;  %v2192_v26 = vadd.s32 %v2190_v11, %v2184_v35  ;;  %vm2193_vm8 = vc.u32 %v2191_v16, %v2187_v31  ;;  %vm2215_vm9 = vc.u32 %v2213_v56, %v2209_v27 }
 0x20d   :  { %v2194_v22 = vsel %vm2193_vm8, 1, %v9761_v55  ;;  %v1984_v52 = vadd.s32 1, %v6336_v60  ;;  %v2186_v53 = vshrl.u32 %v2182_v54, 16  ;;  %v2216_v61 = vsel %vm2215_vm9, 1, %v9761_v55 }
 0x20e   :  { %v1635_v29 = vsel %vm1514_vm14, %v1634_v21, %v1633_v8  ;;  %v2196_v19 = vadd.s32 %v2194_v22, %v2192_v26  ;;  %v2208_v13 = vshrl.u32 %v2204_v33, 16  ;;  %v2218_v41 = vadd.s32 %v2216_v61, %v2214_v24 }
 0x20f   :  { %v8124_v49 = vsel %vm8068_vm0, %v7804_v39, %v1635_v29  ;;  %vm1985_vm10 = vcmp.gt.s32.totalorder %v1984_v52, 0  ;;  %v2188_v17 = vshrl.u32 %v2183_v15, 16  ;;  %v2210_v40 = vshrl.u32 %v2205_v63, 16 }
 0x210   :  { %v1640_v5 = vmul.f32 %v8124_v49, %v8124_v49  ;;  %v2197_v12 = vadd.s32 %v2196_v19, %v2186_v53  ;;  %v1986_v14 = vsel %vm1985_vm10, %v1984_v52, 0  ;;  %v2219_v9 = vadd.s32 %v2218_v41, %v2208_v13 }
 0x211   :  { %v1981_v54 = vand.u32 8388607, %v9721_v38  ;;  %v1988_v36 = vand.u32 31, %v1986_v14  ;;  %v8132_v35 = vadd.s32 %v2213_v56, %v2209_v27  ;;  %v8136_v33 = vmul.f32 %v8021_v20, %v8021_v20 }
 0x212   :  { %v1641_v23 = vmul.f32 -0.001358992, %v1640_v5  ;;  %v1648_v46 = vmul.f32 -0.00019511016, %v1640_v5  ;;  %v8130_v7 = vadd.s32 %v2197_v12, %v2188_v17  ;;  %6469 = vrcp.f32 %v8025_v18 }
 0x213   :  { %v2220_v15 = vadd.s32 %v2219_v9, %v2210_v40  ;;  %v8139_v31 = vsub.s32 32, %v1988_v36  ;;  %v8141_v16 = vand.u32 3, %v1639_v25  ;;  %v8145_v48 = vand.u32 3, %v4154_v37 }
 0x214   :  { %v1642_v63 = vadd.f32 0.041655596, %v1641_v23  ;;  %v1649_v8 = vadd.f32 0.008332121, %v1648_v46  ;;  %vm2223_vm11 = vc.u32 %v8130_v7, %v8132_v35  ;;  %v2221_v27 = vmul.u32 %v8032_v3, %v2167_v4 }
 0x215   :  { %v2224_v11 = vadd.s32 1, %v2220_v15  ;;  %v1982_v56 = vor.u32 8388608, %v1981_v54  ;;  %v8148_v21 = vshrl.u32 %v1986_v14, 5  ;;  %v1991_v18 = vshll.u32 %v9759_v6, %v1988_v36 }
 0x216   :  { %v1643_v24 = vmul.f32 %v1642_v63, %v1640_v5  ;;  %v1650_v60 = vmul.f32 %v1649_v8, %v1640_v5  ;;  %v1992_v25 = vshrl.u32 %v9763_v32, %v8139_v31  ;;  %v1994_v22 = vshll.u32 %v9763_v32, %v1988_v36 }
 0x217   :  { %v2225_v26 = vsel %vm2223_vm11, %v2224_v11, %v2220_v15  ;;  %v1995_v37 = vshrl.u32 %v9764_v57, %v8139_v31  ;;  %vm1661_vm12 = vcmp.eq.s32.totalorder %v8141_v16, 2  ;;  %v1998_v4 = vshrl.u32 %v9765_v45, %v8139_v31 }
 0x218   :  { %v1644_v52 = vadd.f32 -0.4999988, %v1643_v24  ;;  %v1651_v29 = vadd.f32 -0.16666654, %v1650_v60  ;;  %v2226_v3 = vadd.s32 %v2225_v26, %v2221_v27  ;;  %v8159_v53 = vpop.eup %6469  ;;  %vm1658_vm13 = vcmp.eq.s32.totalorder %v8141_v16, 0 }
 0x219   :  { %v2000_v19 = vshll.u32 %v9765_v45, %v1988_v36  ;;  %v2001_v61 = vshrl.u32 %v9771_v43, %v8139_v31  ;;  %v2003_v13 = vshll.u32 %v9771_v43, %v1988_v36  ;;  %v2004_v41 = vshrl.u32 %v9757_v2, %v8139_v31 }
 0x21a   :  { %v1645_v17 = vmul.f32 %v1644_v52, %v1640_v5  ;;  %v1652_v12 = vmul.f32 %v1651_v29, %v1640_v5  ;;  %vm1657_vm14 = vcmp.lt.s32.totalorder %v8141_v16, 2  ;;  %vm4156_vm15 = vcmp.lt.s32.totalorder %v8145_v48, 2 }
 0x21b   :  { %v2227_v14 = vadd.s32 536870912, %v2226_v3  ;;  %v1997_v40 = vshll.u32 %v9764_v57, %v1988_v36  ;;  %v1993_v9 = vor.u32 %v1992_v25, %v1991_v18  ;;  %v8171_v54 = vor.u32 %v1995_v37, %v1994_v22 }
 0x21c   :  { %v2002_v23 = vor.u32 %v2001_v61, %v2000_v19  ;;  %v2005_v46 = vor.u32 %v2004_v41, %v2003_v13  ;;  %v1646_v15 = vadd.f32 1.0, %v1645_v17  ;;  %v1653_v63 = vadd.f32 1.0, %v1652_v12 }
 0x21d   :  { %v2228_v8 = vshrl.u32 %v2227_v14, 30  ;;  %v1999_v27 = vor.u32 %v1998_v4, %v1997_v40  ;;  %vm4157_vm0 = vcmp.eq.s32.totalorder %v8145_v48, 0  ;;  %vm4160_vm1 = vcmp.eq.s32.totalorder %v8145_v48, 2 }
 0x21e   :  { %vm2009_vm2 = vcmp.lt.s32.totalorder %v8148_v21, 4  ;;  %v8176_v5 = vshll.u32 %v1982_v56, 8  ;;  %v1654_v11 = vmul.f32 %v1653_v63, %v8124_v49  ;;  %v1662_v36 = vxor.u32 2147483648, %v1646_v15 }
 0x21f   :  { %v2229_v24 = vshll.u32 %v2228_v8, 30  ;;  %v2015_v60 = vsel %vm2009_vm2, %v2002_v23, 920167782  ;;  %vm2006_vm3 = vcmp.lt.s32.totalorder %v8148_v21, 1  ;;  %vm2007_vm4 = vcmp.lt.s32.totalorder %v8148_v21, 2 }
 0x220   :  { %vm2008_vm5 = vcmp.lt.s32.totalorder %v8148_v21, 3  ;;  %v2019_v18 = vsel %vm2009_vm2, %v2005_v46, 1326507024  ;;  %v1659_v26 = vxor.u32 2147483648, %v1654_v11  ;;  %v2014_v49 = vsel %vm2006_vm3, %v1993_v9, %v8171_v54  ;;  %v8224_v46 = vpop.permute.xlu2 %337 }
 0x221   :  { %v8186_v25 = vsub.s32 %v2226_v3, %v2229_v24  ;;  %v2018_v56 = vsel %vm2006_vm3, %v8171_v54, %v1999_v27  ;;  %v1663_v22 = vsel %vm1661_vm12, %v1662_v36, %v1654_v11  ;;  %v4162_v37 = vsel %vm4160_vm1, %v1662_v36, %v1654_v11  ;;  %9797 = vst [vmem:[#allocation50_spill] sm:$0xff] %v8224_v46 }
 0x222   :  { %v2016_v52 = vsel %vm2008_vm5, %v1999_v27, %v2015_v60  ;;  %v2020_v29 = vsel %vm2008_vm5, %v2002_v23, %v2019_v18  ;;  %v1660_v3 = vsel %vm1658_vm13, %v1646_v15, %v1659_v26  ;;  %v4159_v4 = vsel %vm4157_vm0, %v1646_v15, %v1659_v26 }
 0x223   :  { %vm2231_vm6 = vcmp.lt.s32.totalorder %v8186_v25, 0  ;;  %v2232_v19 = vsub.s32 0, %v8186_v25  ;;  %vm1655_vm7 = vweird.f32 %v7804_v39  ;;  %v1664_v61 = vsel %vm1657_vm14, %v1660_v3, %v1663_v22 }
 0x224   :  { %v4163_v13 = vsel %vm4156_vm15, %v4159_v4, %v4162_v37  ;;  %v2021_v41 = vsel %vm2007_vm4, %v2018_v56, %v2020_v29  ;;  %v8217_v17 = vmul.f32 %v8159_v53, %v7875_v47  ;;  %v1665_v12 = vsel %vm1655_vm7, nan, %v1664_v61 }
 0x225   :  { %v4164_v14 = vsel %vm1655_vm7, nan, %v4163_v13  ;;  %v2233_v40 = vsel %vm2231_vm6, %v2232_v19, %v8186_v25  ;;  %v3670_v23 = vmul.f32 %v7886_v44, %v1665_v12  ;;  %v2017_v48 = vsel %vm2007_vm4, %v2014_v49, %v2016_v52 }
 0x226   :  { %9796 = vst [vmem:[#allocation49_spill] sm:$0xff] %v8217_v17  ;;  %v6182_v39 = vmul.f32 %v7886_v44, %v4164_v14  ;;  %v2234_v16 = vclz %v2233_v40  ;;  %vm2130_vm8 = vcmp.lt.s32.totalorder %v7881_v0, 0  ;;  %v2252_v15 = vsub.s32 4, %v2228_v8 }
 0x227   :  { %v2024_v47 = vshrl.u32 %v8176_v5, 16  ;;  %v2025_v63 = vand.u32 65535, %v2021_v41  ;;  %3686 = vst [vmem:[#allocation16 + $0x8] sm:$0xf] %v3670_v23  ;;  %v1990_v36 = vshrl.u32 %v9759_v6, %v8139_v31  ;;  %v2011_v44 = vsel %vm2009_vm2, %v1999_v27, 2102212464 }
 0x228   :  { %v6340_v11 = vadd.s32 4294967294, %v2234_v16  ;;  %v2026_v24 = vshrl.u32 %v2021_v41, 16  ;;  %6198 = vst [vmem:[#allocation17 + $0x8] sm:$0xf] %v6182_v39  ;;  %v2023_v60 = vand.u32 65535, %v8176_v5  ;;  %v2048_v26 = vshrl.u32 %v2017_v48, 16 }
 0x229   :  { %v8233_v18 = vmul.u32 %v2025_v63, %v2024_v47  ;;  %v8237_v49 = vmul.f32 %v8159_v53, %v7856_v42  ;;  %v2222_v56 = vadd.s32 %v8132_v35, %v8130_v7  ;;  %v2010_v31 = vsel %vm2006_vm3, %v1990_v36, %v1993_v9 }
 0x22a   :  { %vm6341_vm9 = vcmp.lt.s32.totalorder %v6340_v11, 0  ;;  %v2047_v22 = vand.u32 65535, %v2017_v48  ;;  %v2253_v37 = vsel %vm2130_vm8, %v2252_v15, %v2228_v8  ;;  %v2012_v52 = vsel %vm2008_vm5, %v8171_v54, %v2011_v44  ;;  %v359_v15 = vpop.permute.xlu2 %358 }
 0x22b   :  { %9798 = vst [vmem:[#allocation51_spill] sm:$0xff] %v8237_v49  ;;  %v2237_v27 = vsel %vm6341_vm9, 0, %v6340_v11  ;;  %v2028_v29 = vmul.u32 %v2026_v24, %v2023_v60  ;;  %v2027_v53 = vmul.u32 %v2025_v63, %v2023_v60  ;;  %v2030_v4 = vmul.u32 %v2026_v24, %v2024_v47  ;;  %v285_v63 = vpop.permute.xlu1 %284 }
 0x22c   :  { %v2238_v3 = vsub.s32 32, %v2237_v27  ;;  %v2242_v42 = vsub.s32 4294967266, %v2237_v27  ;;  %v2239_v7 = vshll.u32 %v8186_v25, %v2237_v27  ;;  %v2033_v19 = vshll.u32 %v8233_v18, 16 }
 0x22d   :  { %v2031_v35 = vshll.u32 %v2028_v29, 16  ;;  %v2050_v9 = vmul.u32 %v2048_v26, %v2023_v60  ;;  %v2032_v41 = vshrl.u32 %v2028_v29, 16  ;;  %v2051_v12 = vmul.u32 %v2047_v22, %v2024_v47 }
 0x22e   :  { %v2240_v61 = vshrl.u32 %v2222_v56, %v2238_v3  ;;  %v2243_v13 = vadd.s32 127, %v2242_v42  ;;  %v2049_v14 = vmul.u32 %v2047_v22, %v2023_v60  ;;  %v2052_v16 = vmul.u32 %v2048_v26, %v2024_v47  ;;  %v8260_v26 = vld [vmem:[%s9672_s4] ss:$0 sm:$0xff] }
 0x22f   :  { %vm2035_vm10 = vc.u32 %v2027_v53, %v2031_v35  ;;  %v2037_v8 = vadd.s32 %v2031_v35, %v2027_v53  ;;  %v2053_v40 = vshll.u32 %v2050_v9, 16  ;;  %v2055_v25 = vshll.u32 %v2051_v12, 16  ;;  %v8266_v42 = vld [vmem:[%s9673_s5] ss:$0 sm:$0xff] }
 0x230   :  { %v2241_v54 = vor.u32 %v2240_v61, %v2239_v7  ;;  %v2244_v23 = vshll.u32 %v2243_v13, 23  ;;  %v2036_v39 = vsel %vm2035_vm10, 1, %v9761_v55  ;;  %v9719_v27 = vsub.f32 0.0, %v8217_v17 }
 0x231   :  { %v2038_v48 = vadd.s32 %v2036_v39, %v2030_v4  ;;  %vm2039_vm11 = vc.u32 %v2037_v8, %v2033_v19  ;;  %vm2057_vm12 = vc.u32 %v2049_v14, %v2053_v40  ;;  %v2059_v60 = vadd.s32 %v2053_v40, %v2049_v14 }
 0x232   :  { %v2245_v11 = vor.u32 4788187, %v2244_v23  ;;  %v2248_v36 = vcvt.s32.f32 %v2241_v54  ;;  %v2040_v44 = vsel %vm2039_vm11, 1, %v9761_v55  ;;  %v2058_v24 = vsel %vm2057_vm12, 1, %v9761_v55 }
 0x233   :  { %v2042_v56 = vadd.s32 %v2040_v44, %v2038_v48  ;;  %v2060_v22 = vadd.s32 %v2058_v24, %v2052_v16  ;;  %v8255_v47 = vmul.f32 %v8237_v49, %v359_v15  ;;  %v590_v3 = vsub.f32 %v8260_v26, %v285_v63 }
 0x234   :  { %v2246_v29 = vand.u32 2147483647, %v2245_v11  ;;  %v8269_v53 = vmul.f32 %v8266_v42, %v285_v63  ;;  %v2034_v4 = vshrl.u32 %v8233_v18, 16  ;;  %vm2061_vm13 = vc.u32 %v2059_v60, %v2055_v25 }
 0x235   :  { %9799 = vst [vmem:[#allocation52_spill] sm:$0xff] %v8255_v47  ;;  %v2043_v7 = vadd.s32 %v2042_v56, %v2032_v41  ;;  %v8274_v35 = vmul.f32 %v9719_v27, %v359_v15  ;;  %v2062_v61 = vsel %vm2061_vm13, 1, %v9761_v55  ;;  %v622_v13 = vmul.f32 %v590_v3, %v590_v3  ;;  %v8288_v15 = vpop.permute.xlu0 %277 }
 0x236   :  { %v2249_v19 = vmul.f32 %v2248_v36, %v2246_v29  ;;  %v9720_v8 = vand.u32 2147483647, %v8269_v53  ;;  %v9801_v14 = vand.u32 2147483647, %v7881_v0  ;;  %v2054_v54 = vshrl.u32 %v2050_v9, 16 }
 0x237   :  { %9800 = vst [vmem:[#allocation53_spill] sm:$0xff] %v8274_v35  ;;  %v2064_v18 = vadd.s32 %v2062_v61, %v2060_v22  ;;  %v2593_v41 = vand.u32 2139095040, %v8269_v53  ;;  %v2013_v39 = vsel %vm2007_vm4, %v2010_v31, %v2012_v52  ;;  %v2044_v16 = vadd.s32 %v2043_v7, %v2034_v4 }
 0x238   :  { %vm8280_vm14 = vcmp.le.f32.partialorder %v9801_v14, 0.7853982  ;;  %v2250_v23 = vxor.u32 2147483648, %v2249_v19  ;;  %v638_v48 = vadd.f32 %v622_v13, %v8136_v33  ;;  %v2056_v11 = vshrl.u32 %v2051_v12, 16 }
 0x239   :  { %v2255_v63 = vsel %vm8280_vm14, 0, %v2253_v37  ;;  %v2065_v36 = vadd.s32 %v2064_v18, %v2054_v54  ;;  %v2594_v44 = vshrl.u32 %v2593_v41, 23  ;;  %v2063_v24 = vadd.s32 %v2059_v60, %v2055_v25 }
 0x23a   :  { %v2251_v9 = vsel %vm2130_vm8, %v2250_v23, %v2249_v19  ;;  %6471 = vrcp.f32 %v638_v48  ;;  %v2597_v21 = vand.u32 8388607, %v9720_v8  ;;  %v8303_v37 = vsub.f32 %v8260_v26, %v8288_v15 }
 0x23b   :  { %v8299_v33 = vsel %vm8280_vm14, %v7881_v0, %v2251_v9  ;;  %v2066_v31 = vadd.s32 %v2065_v36, %v2056_v11  ;;  %v6348_v52 = vadd.s32 4294967169, %v2594_v44  ;;  %v1182_v12 = vmul.f32 1.442695, %v7544_v10 }
 0x23c   :  { %v605_v25 = vmul.f32 %v7864_v28, %v7864_v28  ;;  %v2256_v56 = vmul.f32 %v8299_v33, %v8299_v33  ;;  %vm2069_vm15 = vc.u32 %v2044_v16, %v2063_v24  ;;  %v1146_v60 = vmul.f32 %v8266_v42, %v7576_v50 }
 0x23d   :  { %v2070_v22 = vadd.s32 1, %v2066_v31  ;;  %v2600_v29 = vadd.s32 1, %v6348_v52  ;;  %v621_v4 = vmul.f32 %v8303_v37, %v8303_v37  ;;  %v4774_v61 = vadd.s32 3, %v2255_v63 }
 0x23e   :  { %v2257_v7 = vmul.f32 -0.001358992, %v2256_v56  ;;  %v2264_v19 = vmul.f32 -0.00019511016, %v2256_v56  ;;  %v2067_v10 = vmul.u32 %v8176_v5, %v2013_v39  ;;  %v2598_v14 = vor.u32 8388608, %v2597_v21  ;;  %v9805_v21 = vld [vmem:[#allocation26_spill] sm:$0xff] }
 0x23f   :  { %v2071_v13 = vsel %vm2069_vm15, %v2070_v22, %v2066_v31  ;;  %vm2601_vm0 = vcmp.gt.s32.totalorder %v2600_v29, 0  ;;  %v637_v40 = vadd.f32 %v621_v4, %v605_v25  ;;  %v1184_v11 = vmul.f32 1.442695, %v1146_v60 }
 0x240   :  { %v8315_v54 = vpop.eup %6471  ;;  %v2258_v18 = vadd.f32 0.041655596, %v2257_v7  ;;  %v2265_v41 = vadd.f32 0.008332121, %v2264_v19  ;;  %v2072_v23 = vadd.s32 %v2071_v13, %v2067_v10  ;;  %v2602_v48 = vsel %vm2601_vm0, %v2600_v29, 0 }
 0x241   :  { %v2272_v36 = vand.u32 3, %v2255_v63  ;;  %v8318_v44 = vmul.f32 %v8315_v54, %v590_v3  ;;  %v2604_v9 = vand.u32 31, %v2602_v48  ;;  %v4775_v8 = vand.u32 3, %v4774_v61 }
 0x242   :  { %v2259_v52 = vmul.f32 %v2258_v18, %v2256_v56  ;;  %v2266_v27 = vmul.f32 %v2265_v41, %v2256_v56  ;;  %v2073_v5 = vadd.s32 536870912, %v2072_v23  ;;  %6473 = vpow2.f32 %v1182_v12 }
 0x243   :  { %9804 = vst [vmem:[#allocation54_spill] sm:$0xff] %v8318_v44  ;;  %v8320_v39 = vshll.u32 %v2598_v14, 8  ;;  %v8323_v31 = vsub.f32 0.0, %v9805_v21  ;;  %6475 = vpow2.f32 %v1184_v11  ;;  %vm2274_vm1 = vcmp.eq.s32.totalorder %v2272_v36, 0 }
 0x244   :  { %v2260_v25 = vadd.f32 -0.4999988, %v2259_v52  ;;  %v2267_v22 = vadd.f32 -0.16666654, %v2266_v27  ;;  %v8325_v4 = vshrl.u32 %v2073_v5, 30  ;;  %vm2277_vm2 = vcmp.eq.s32.totalorder %v2272_v36, 2 }
 0x245   :  { %9806 = vst [vmem:[#allocation26_spill] sm:$0xff] %v8323_v31  ;;  %v8327_v3 = vsub.s32 32, %v2604_v9  ;;  %vm2273_vm3 = vcmp.lt.s32.totalorder %v2272_v36, 2  ;;  %vm4776_vm4 = vcmp.lt.s32.totalorder %v4775_v8, 2  ;;  %vm4777_vm5 = vcmp.eq.s32.totalorder %v4775_v8, 0 }
 0x246   :  { %v2261_v63 = vmul.f32 %v2260_v25, %v2256_v56  ;;  %v2268_v60 = vmul.f32 %v2267_v22, %v2256_v56  ;;  %v2075_v12 = vshll.u32 %v8325_v4, 30  ;;  %vm2271_vm6 = vweird.f32 %v7881_v0 }
 0x247   :  { %vm4780_vm7 = vcmp.eq.s32.totalorder %v4775_v8, 2  ;;  %v2068_v29 = vadd.s32 %v2063_v24, %v2044_v16  ;;  %v8332_v27 = vand.u32 65535, %v8320_v39  ;;  %v8335_v7 = vshrl.u32 %v8320_v39, 16 }
 0x248   :  { %v2262_v19 = vadd.f32 1.0, %v2261_v63  ;;  %v2269_v61 = vadd.f32 1.0, %v2268_v60  ;;  %v8337_v10 = vsub.s32 %v2072_v23, %v2075_v12  ;;  %v8339_v56 = vshrl.u32 %v2602_v48, 5  ;;  %v8341_v13 = vpop.eup %6473 }
 0x249   :  { %v2607_v14 = vshll.u32 %v9759_v6, %v2604_v9  ;;  %v2608_v18 = vshrl.u32 %v9763_v32, %v8327_v3  ;;  %v2611_v16 = vshrl.u32 %v9764_v57, %v8327_v3  ;;  %6477 = vrcp.f32 %v637_v40  ;;  %v6476_v48 = vpop.eup %6475 }
 0x24a   :  { %v2270_v24 = vmul.f32 %v2269_v61, %v8299_v33  ;;  %v2278_v41 = vxor.u32 2147483648, %v2262_v19  ;;  %vm2077_vm8 = vcmp.lt.s32.totalorder %v8337_v10, 0  ;;  %v2078_v23 = vsub.s32 0, %v8337_v10 }
 0x24b   :  { %v2610_v11 = vshll.u32 %v9763_v32, %v2604_v9  ;;  %v2613_v52 = vshll.u32 %v9764_v57, %v2604_v9  ;;  %v2614_v5 = vshrl.u32 %v9765_v45, %v8327_v3  ;;  %v2616_v25 = vshll.u32 %v9765_v45, %v2604_v9 }
 0x24c   :  { %v2275_v22 = vxor.u32 2147483648, %v2270_v24  ;;  %v2079_v40 = vsel %vm2077_vm8, %v2078_v23, %v8337_v10  ;;  %v2617_v33 = vshrl.u32 %v9771_v43, %v8327_v3  ;;  %v2620_v63 = vshrl.u32 %v9757_v2, %v8327_v3 }
 0x24d   :  { %vm1976_vm9 = vcmp.lt.s32.totalorder %v8028_v51, 0  ;;  %v2080_v60 = vclz %v2079_v40  ;;  %v2609_v12 = vor.u32 %v2608_v18, %v2607_v14  ;;  %v2612_v61 = vor.u32 %v2611_v16, %v2610_v11 }
 0x24e   :  { %v2619_v38 = vshll.u32 %v9771_v43, %v2604_v9  ;;  %v2276_v35 = vsel %vm2274_vm1, %v2262_v19, %v2275_v22  ;;  %v2279_v47 = vsel %vm2277_vm2, %v2278_v41, %v2270_v24  ;;  %v4779_v49 = vsel %vm4777_vm5, %v2262_v19, %v2275_v22 }
 0x24f   :  { %v4782_v23 = vsel %vm4780_vm7, %v2278_v41, %v2270_v24  ;;  %v8367_v17 = vpop.eup %6477  ;;  %v2280_v59 = vsel %vm2273_vm3, %v2276_v35, %v2279_v47  ;;  %v6337_v44 = vadd.s32 4294967294, %v2080_v60  ;;  %v2615_v40 = vor.u32 %v2614_v5, %v2613_v52 }
 0x250   :  { %v4783_v46 = vsel %vm4776_vm4, %v4779_v49, %v4782_v23  ;;  %v2281_v14 = vsel %vm2271_vm6, nan, %v2280_v59  ;;  %v2618_v18 = vor.u32 %v2617_v33, %v2616_v25  ;;  %v2621_v16 = vor.u32 %v2620_v63, %v2619_v38 }
 0x251   :  { %v4784_v9 = vsel %vm2271_vm6, nan, %v4783_v46  ;;  %v3674_v11 = vmul.f32 %v6476_v48, %v2281_v14  ;;  %vm6338_vm10 = vcmp.lt.s32.totalorder %v6337_v44, 0  ;;  %v2098_v24 = vsub.s32 4, %v8325_v4 }
 0x252   :  { %v6186_v19 = vmul.f32 %v6476_v48, %v4784_v9  ;;  %v2083_v41 = vsel %vm6338_vm10, 0, %v6337_v44  ;;  %vm2622_vm11 = vcmp.lt.s32.totalorder %v8339_v56, 1  ;;  %vm2623_vm12 = vcmp.lt.s32.totalorder %v8339_v56, 2 }
 0x253   :  { %vm2624_vm13 = vcmp.lt.s32.totalorder %v8339_v56, 3  ;;  %3690 = vst [vmem:[#allocation16 + $0x18] sm:$0xf] %v3674_v11  ;;  %v2084_v49 = vsub.s32 32, %v2083_v41  ;;  %v2088_v59 = vsub.s32 4294967266, %v2083_v41  ;;  %vm2625_vm14 = vcmp.lt.s32.totalorder %v8339_v56, 4 }
 0x254   :  { %v2630_v0 = vsel %vm2622_vm11, %v2609_v12, %v2612_v61  ;;  %6202 = vst [vmem:[#allocation17 + $0x18] sm:$0xf] %v6186_v19  ;;  %v2606_v38 = vshrl.u32 %v9759_v6, %v8327_v3  ;;  %v2631_v46 = vsel %vm2625_vm14, %v2618_v18, 920167782  ;;  %v2634_v47 = vsel %vm2622_vm11, %v2612_v61, %v2615_v40 }
 0x255   :  { %v2635_v35 = vsel %vm2625_vm14, %v2621_v16, 1326507024  ;;  %v2085_v8 = vshll.u32 %v8337_v10, %v2083_v41  ;;  %v2086_v36 = vshrl.u32 %v2068_v29, %v2084_v49  ;;  %v2089_v44 = vadd.s32 127, %v2088_v59 }
 0x256   :  { %v2632_v48 = vsel %vm2624_vm13, %v2615_v40, %v2631_v46  ;;  %v2099_v3 = vsel %vm1976_vm9, %v2098_v24, %v8325_v4  ;;  %v2636_v5 = vsel %vm2624_vm13, %v2618_v18, %v2635_v35  ;;  %v8402_v25 = vmul.f32 %v8367_v17, %v8303_v37 }
 0x257   :  { %v2633_v52 = vsel %vm2623_vm12, %v2630_v0, %v2632_v48  ;;  %v2087_v10 = vor.u32 %v2086_v36, %v2085_v8  ;;  %v2090_v29 = vshll.u32 %v2089_v44, 23  ;;  %v2637_v22 = vsel %vm2623_vm12, %v2634_v47, %v2636_v5 }
 0x258   :  { %9807 = vst [vmem:[#allocation55_spill] sm:$0xff] %v8402_v25  ;;  %v2663_v33 = vand.u32 65535, %v2633_v52  ;;  %v2627_v63 = vsel %vm2625_vm14, %v2615_v40, 2102212464  ;;  %v2641_v4 = vand.u32 65535, %v2637_v22  ;;  %v2642_v60 = vshrl.u32 %v2637_v22, 16 }
 0x259   :  { %v2664_v23 = vshrl.u32 %v2633_v52, 16  ;;  %v9808_v14 = vand.u32 2147483647, %v8028_v51  ;;  %v2091_v37 = vor.u32 4788187, %v2090_v29  ;;  %v8417_v16 = vmul.f32 %v8266_v42, %v8288_v15 }
 0x25a   :  { %v2667_v18 = vmul.u32 %v2663_v33, %v8335_v7  ;;  %v2626_v40 = vsel %vm2622_vm11, %v2606_v38, %v2609_v12  ;;  %v2644_v19 = vmul.u32 %v2642_v60, %v8332_v27  ;;  %v2645_v24 = vmul.u32 %v2641_v4, %v8335_v7 }
 0x25b   :  { %vm8410_vm15 = vcmp.le.f32.partialorder %v9808_v14, 0.7853982  ;;  %v2092_v41 = vand.u32 2147483647, %v2091_v37  ;;  %v2094_v49 = vcvt.s32.f32 %v2087_v10  ;;  %v2628_v59 = vsel %vm2624_vm13, %v2612_v61, %v2627_v63 }
 0x25c   :  { %v2101_v11 = vsel %vm8410_vm15, 0, %v2099_v3  ;;  %v2666_v0 = vmul.u32 %v2664_v23, %v8332_v27  ;;  %v2643_v15 = vmul.u32 %v2641_v4, %v8332_v27  ;;  %v2646_v46 = vmul.u32 %v2642_v60, %v8335_v7 }
 0x25d   :  { %v2647_v47 = vshll.u32 %v2644_v19, 16  ;;  %v2665_v35 = vmul.u32 %v2663_v33, %v8332_v27  ;;  %v2095_v8 = vmul.f32 %v2094_v49, %v2092_v41  ;;  %v2668_v12 = vmul.u32 %v2664_v23, %v8335_v7 }
 0x25e   :  { %v2669_v38 = vshll.u32 %v2666_v0, 16  ;;  %v2671_v36 = vshll.u32 %v2667_v18, 16  ;;  %v2649_v44 = vshll.u32 %v2645_v24, 16  ;;  %v2439_v3 = vand.u32 2139095040, %v8417_v16 }
 0x25f   :  { %vm2651_vm0 = vc.u32 %v2643_v15, %v2647_v47  ;;  %v2653_v48 = vadd.s32 %v2647_v47, %v2643_v15  ;;  %v2096_v61 = vxor.u32 2147483648, %v2095_v8  ;;  %v2648_v4 = vshrl.u32 %v2644_v19, 16 }
 0x260   :  { %v2652_v52 = vsel %vm2651_vm0, 1, %v9761_v55  ;;  %vm2673_vm1 = vc.u32 %v2665_v35, %v2669_v38  ;;  %v2675_v5 = vadd.s32 %v2669_v38, %v2665_v35  ;;  %v2440_v27 = vshrl.u32 %v2439_v3, 23 }
 0x261   :  { %v2654_v10 = vadd.s32 %v2652_v52, %v2646_v46  ;;  %vm2655_vm2 = vc.u32 %v2653_v48, %v2649_v44  ;;  %v2674_v29 = vsel %vm2673_vm1, 1, %v9761_v55  ;;  %v2097_v7 = vsel %vm1976_vm9, %v2096_v61, %v2095_v8 }
 0x262   :  { %v2656_v22 = vsel %vm2655_vm2, 1, %v9761_v55  ;;  %v2676_v33 = vadd.s32 %v2674_v29, %v2668_v12  ;;  %vm2677_vm3 = vc.u32 %v2675_v5, %v2671_v36  ;;  %v2100_v63 = vsel %vm8410_vm15, %v8028_v51, %v2097_v7 }
 0x263   :  { %v2658_v60 = vadd.s32 %v2656_v22, %v2654_v10  ;;  %v2678_v23 = vsel %vm2677_vm3, 1, %v9761_v55  ;;  %v2102_v14 = vmul.f32 %v2100_v63, %v2100_v63  ;;  %v2670_v37 = vshrl.u32 %v2666_v0, 16  ;;  %v9811_v10 = vld [vmem:[#allocation44_spill] sm:$0xff] }
 0x264   :  { %v2680_v41 = vadd.s32 %v2678_v23, %v2676_v33  ;;  %v6345_v49 = vadd.s32 4294967169, %v2440_v27  ;;  %v2650_v15 = vshrl.u32 %v2645_v24, 16  ;;  %v2672_v47 = vshrl.u32 %v2667_v18, 16 }
 0x265   :  { %v2659_v46 = vadd.s32 %v2658_v60, %v2648_v4  ;;  %v9726_v35 = vand.u32 2147483647, %v8417_v16  ;;  %v2103_v8 = vmul.f32 -0.001358992, %v2102_v14  ;;  %v2110_v12 = vmul.f32 -0.00019511016, %v2102_v14 }
 0x266   :  { %v2681_v38 = vadd.s32 %v2680_v41, %v2670_v37  ;;  %v2446_v44 = vadd.s32 1, %v6345_v49  ;;  %v4619_v48 = vadd.s32 3, %v2101_v11  ;;  %v2629_v9 = vsel %vm2623_vm12, %v2626_v40, %v2628_v59 }
 0x267   :  { %v2660_v19 = vadd.s32 %v2659_v46, %v2650_v15  ;;  %v2679_v3 = vadd.s32 %v2675_v5, %v2671_v36  ;;  %v2104_v61 = vadd.f32 0.041655596, %v2103_v8  ;;  %v2111_v52 = vadd.f32 0.008332121, %v2110_v12 }
 0x268   :  { %v2682_v0 = vadd.s32 %v2681_v38, %v2672_v47  ;;  %vm2447_vm4 = vcmp.gt.s32.totalorder %v2446_v44, 0  ;;  %v8446_v24 = vsub.f32 0.0, %v9811_v10  ;;  %v2443_v18 = vand.u32 8388607, %v9726_v35 }
 0x269   :  { %vm2685_vm5 = vc.u32 %v2660_v19, %v2679_v3  ;;  %v2448_v29 = vsel %vm2447_vm4, %v2446_v44, 0  ;;  %v2105_v27 = vmul.f32 %v2104_v61, %v2102_v14  ;;  %v2112_v7 = vmul.f32 %v2111_v52, %v2102_v14 }
 0x26a   :  { %v2118_v22 = vand.u32 3, %v2101_v11  ;;  %v2686_v33 = vadd.s32 1, %v2682_v0  ;;  %v8452_v56 = vmul.f32 %v8323_v31, %v8323_v31  ;;  %v4620_v40 = vand.u32 3, %v4619_v48 }
 0x26b   :  { %v2683_v59 = vmul.u32 %v8320_v39, %v2629_v9  ;;  %v2450_v36 = vand.u32 31, %v2448_v29  ;;  %v8457_v5 = vmul.f32 %v8266_v42, %v7615_v1  ;;  %v2106_v4 = vadd.f32 -0.4999988, %v2105_v27 }
 0x26c   :  { %v2113_v60 = vadd.f32 -0.16666654, %v2112_v7  ;;  %v2687_v23 = vsel %vm2685_vm5, %v2686_v33, %v2682_v0  ;;  %v8461_v37 = vmul.f32 %v8446_v24, %v8446_v24  ;;  %v2444_v41 = vor.u32 8388608, %v2443_v18 }
 0x26d   :  { %v2688_v11 = vadd.s32 %v2687_v23, %v2683_v59  ;;  %v8463_v49 = vsub.s32 32, %v2450_v36  ;;  %v2107_v15 = vmul.f32 %v2106_v4, %v2102_v14  ;;  %vm2119_vm6 = vcmp.lt.s32.totalorder %v2118_v22, 2 }
 0x26e   :  { %v2114_v46 = vmul.f32 %v2113_v60, %v2102_v14  ;;  %vm2120_vm7 = vcmp.eq.s32.totalorder %v2118_v22, 0  ;;  %vm2117_vm8 = vweird.f32 %v8028_v51  ;;  %vm2123_vm9 = vcmp.eq.s32.totalorder %v2118_v22, 2 }
 0x26f   :  { %vm4621_vm10 = vcmp.lt.s32.totalorder %v4620_v40, 2  ;;  %vm4622_vm11 = vcmp.eq.s32.totalorder %v4620_v40, 0  ;;  %v2689_v1 = vadd.s32 536870912, %v2688_v11  ;;  %v2108_v39 = vadd.f32 1.0, %v2107_v15 }
 0x270   :  { %v2115_v47 = vadd.f32 1.0, %v2114_v46  ;;  %vm4625_vm12 = vcmp.eq.s32.totalorder %v4620_v40, 2  ;;  %v2454_v8 = vshrl.u32 %v9763_v32, %v8463_v49  ;;  %v2457_v38 = vshrl.u32 %v9764_v57, %v8463_v49 }
 0x271   :  { %v2690_v12 = vshrl.u32 %v2689_v1, 30  ;;  %v2463_v14 = vshrl.u32 %v9771_v43, %v8463_v49  ;;  %v8472_v44 = vshll.u32 %v2444_v41, 8  ;;  %v2124_v9 = vxor.u32 2147483648, %v2108_v39 }
 0x272   :  { %v2116_v48 = vmul.f32 %v2115_v47, %v2100_v63  ;;  %v8474_v61 = vadd.s32 %v2679_v3, %v2660_v19  ;;  %v2453_v52 = vshll.u32 %v9759_v6, %v2450_v36  ;;  %v8477_v18 = vshrl.u32 %v2448_v29, 5 }
 0x273   :  { %v2691_v0 = vshll.u32 %v2690_v12, 30  ;;  %v2456_v27 = vshll.u32 %v9763_v32, %v2450_v36  ;;  %v2462_v7 = vshll.u32 %v9765_v45, %v2450_v36  ;;  %v2459_v4 = vshll.u32 %v9764_v57, %v2450_v36 }
 0x274   :  { %v2121_v33 = vxor.u32 2147483648, %v2116_v48  ;;  %v2455_v59 = vor.u32 %v2454_v8, %v2453_v52  ;;  %v2460_v60 = vshrl.u32 %v9765_v45, %v8463_v49  ;;  %v2466_v23 = vshrl.u32 %v9757_v2, %v8463_v49 }
 0x275   :  { %v8484_v63 = vsub.s32 %v2688_v11, %v2691_v0  ;;  %v2458_v19 = vor.u32 %v2457_v38, %v2456_v27  ;;  %v2464_v3 = vor.u32 %v2463_v14, %v2462_v7  ;;  %v2125_v41 = vsel %vm2123_vm9, %v2124_v9, %v2116_v48  ;;  %v306_v27 = vpop.permute.xlu1 %305 }
 0x276   :  { %v2122_v29 = vsel %vm2120_vm7, %v2108_v39, %v2121_v33  ;;  %v4624_v15 = vsel %vm4622_vm11, %v2108_v39, %v2121_v33  ;;  %v4627_v46 = vsel %vm4625_vm12, %v2124_v9, %v2116_v48  ;;  %vm2592_vm13 = vcmp.lt.s32.totalorder %v8269_v53, 0 }
 0x277   :  { %v2126_v1 = vsel %vm2119_vm6, %v2122_v29, %v2125_v41  ;;  %v4628_v11 = vsel %vm4621_vm10, %v4624_v15, %v4627_v46  ;;  %vm2693_vm14 = vcmp.lt.s32.totalorder %v8484_v63, 0  ;;  %v2694_v47 = vsub.s32 0, %v8484_v63 }
 0x278   :  { %v2127_v8 = vsel %vm2117_vm8, nan, %v2126_v1  ;;  %v4629_v38 = vsel %vm2117_vm8, nan, %v4628_v11  ;;  %v2461_v14 = vor.u32 %v2460_v60, %v2459_v4  ;;  %v2465_v39 = vshll.u32 %v9771_v43, %v2450_v36 }
 0x279   :  { %v3673_v48 = vmul.f32 %v8341_v13, %v2127_v8  ;;  %v6185_v22 = vmul.f32 %v8341_v13, %v4629_v38  ;;  %v2695_v40 = vsel %vm2693_vm14, %v2694_v47, %v8484_v63  ;;  %v2485_v9 = vand.u32 65535, %v8472_v44 }
 0x27a   :  { %v2696_v52 = vclz %v2695_v40  ;;  %v2467_v0 = vor.u32 %v2466_v23, %v2465_v39  ;;  %vm2468_vm15 = vcmp.lt.s32.totalorder %v8477_v18, 1  ;;  %vm2471_vm0 = vcmp.lt.s32.totalorder %v8477_v18, 4 }
 0x27b   :  { %3689 = vst [vmem:[#allocation16 + $0x14] sm:$0xf] %v3673_v48  ;;  %v2714_v51 = vsub.s32 4, %v2690_v12  ;;  %vm2470_vm1 = vcmp.lt.s32.totalorder %v8477_v18, 3  ;;  %v2476_v36 = vsel %vm2468_vm15, %v2455_v59, %v2458_v19  ;;  %v2477_v13 = vsel %vm2471_vm0, %v2464_v3, 920167782 }
 0x27c   :  { %6201 = vst [vmem:[#allocation17 + $0x14] sm:$0xf] %v6185_v22  ;;  %v6349_v7 = vadd.s32 4294967294, %v2696_v52  ;;  %vm2469_vm2 = vcmp.lt.s32.totalorder %v8477_v18, 2  ;;  %v2478_v33 = vsel %vm2470_vm1, %v2461_v14, %v2477_v13  ;;  %v2486_v4 = vshrl.u32 %v8472_v44, 16 }
 0x27d   :  { %v2479_v60 = vsel %vm2469_vm2, %v2476_v36, %v2478_v33  ;;  %v2480_v23 = vsel %vm2468_vm15, %v2458_v19, %v2461_v14  ;;  %v8522_v29 = vsub.f32 %v8260_v26, %v306_v27  ;;  %v8525_v41 = vmul.f32 %v8266_v42, %v306_v27 }
 0x27e   :  { %vm6350_vm3 = vcmp.lt.s32.totalorder %v6349_v7, 0  ;;  %v2481_v15 = vsel %vm2471_vm0, %v2467_v0, 1326507024  ;;  %v2509_v46 = vand.u32 65535, %v2479_v60  ;;  %v2510_v1 = vshrl.u32 %v2479_v60, 16 }
 0x27f   :  { %v2699_v11 = vsel %vm6350_vm3, 0, %v6349_v7  ;;  %v2715_v47 = vsel %vm2592_vm13, %v2714_v51, %v2690_v12  ;;  %v2452_v8 = vshrl.u32 %v9759_v6, %v8463_v49  ;;  %v2482_v38 = vsel %vm2470_vm1, %v2464_v3, %v2481_v15 }
 0x280   :  { %v2700_v39 = vsub.s32 32, %v2699_v11  ;;  %v2704_v48 = vsub.s32 4294967266, %v2699_v11  ;;  %v2473_v22 = vsel %vm2471_vm0, %v2461_v14, 2102212464  ;;  %v2483_v40 = vsel %vm2469_vm2, %v2480_v23, %v2482_v38 }
 0x281   :  { %v2472_v52 = vsel %vm2468_vm15, %v2452_v8, %v2455_v59  ;;  %v2487_v0 = vand.u32 65535, %v2483_v40  ;;  %v2488_v27 = vshrl.u32 %v2483_v40, 16  ;;  %v2512_v12 = vmul.u32 %v2510_v1, %v2485_v9 }
 0x282   :  { %v2701_v51 = vshll.u32 %v8484_v63, %v2699_v11  ;;  %v2702_v49 = vshrl.u32 %v8474_v61, %v2700_v39  ;;  %v2705_v36 = vadd.s32 127, %v2704_v48  ;;  %v2513_v3 = vmul.u32 %v2509_v46, %v2486_v4 }
 0x283   :  { %v9812_v13 = vand.u32 2147483647, %v8269_v53  ;;  %v2474_v14 = vsel %vm2470_vm1, %v2458_v19, %v2473_v22  ;;  %v2490_v33 = vmul.u32 %v2488_v27, %v2485_v9  ;;  %v2491_v59 = vmul.u32 %v2487_v0, %v2486_v4 }
 0x284   :  { %v625_v60 = vmul.f32 %v8522_v29, %v8522_v29  ;;  %v2703_v23 = vor.u32 %v2702_v49, %v2701_v51  ;;  %v2706_v63 = vshll.u32 %v2705_v36, 23  ;;  %v2511_v15 = vmul.u32 %v2509_v46, %v2485_v9 }
 0x285   :  { %vm8545_vm4 = vcmp.le.f32.partialorder %v9812_v13, 0.7853982  ;;  %v2515_v61 = vshll.u32 %v2512_v12, 16  ;;  %v2489_v11 = vmul.u32 %v2487_v0, %v2485_v9  ;;  %v2492_v8 = vmul.u32 %v2488_v27, %v2486_v4 }
 0x286   :  { %v2493_v38 = vshll.u32 %v2490_v33, 16  ;;  %v2514_v39 = vmul.u32 %v2510_v1, %v2486_v4  ;;  %v2707_v48 = vor.u32 4788187, %v2706_v63  ;;  %v2710_v40 = vcvt.s32.f32 %v2703_v23 }
 0x287   :  { %v2495_v13 = vshll.u32 %v2491_v59, 16  ;;  %v2517_v35 = vshll.u32 %v2513_v3, 16  ;;  %vm2519_vm6 = vc.u32 %v2511_v15, %v2515_v61  ;;  %v2521_v19 = vadd.s32 %v2515_v61, %v2511_v15  ;;  %v8558_v15 = vpop.permute.xlu0 %298 }
 0x288   :  { %vm2497_vm5 = vc.u32 %v2489_v11, %v2493_v38  ;;  %v2499_v25 = vadd.s32 %v2493_v38, %v2489_v11  ;;  %v2708_v22 = vand.u32 2147483647, %v2707_v48  ;;  %v2520_v51 = vsel %vm2519_vm6, 1, %v9761_v55 }
 0x289   :  { %v2498_v31 = vsel %vm2497_vm5, 1, %v9761_v55  ;;  %v641_v46 = vadd.f32 %v625_v60, %v8461_v37  ;;  %v2522_v9 = vadd.s32 %v2520_v51, %v2514_v39  ;;  %vm2523_vm8 = vc.u32 %v2521_v19, %v2517_v35 }
 0x28a   :  { %v2500_v49 = vadd.s32 %v2498_v31, %v2492_v8  ;;  %vm2501_vm7 = vc.u32 %v2499_v25, %v2495_v13  ;;  %v2711_v4 = vmul.f32 %v2710_v40, %v2708_v22  ;;  %v2516_v0 = vshrl.u32 %v2512_v12, 16 }
 0x28b   :  { %v2502_v1 = vsel %vm2501_vm7, 1, %v9761_v55  ;;  %v2524_v27 = vsel %vm2523_vm8, 1, %v9761_v55  ;;  %v2494_v36 = vshrl.u32 %v2490_v33, 16  ;;  %6479 = vrcp.f32 %v641_v46 }
 0x28c   :  { %v2504_v23 = vadd.s32 %v2502_v1, %v2500_v49  ;;  %v2526_v63 = vadd.s32 %v2524_v27, %v2522_v9  ;;  %v2712_v61 = vxor.u32 2147483648, %v2711_v4  ;;  %v2717_v37 = vsel %vm8545_vm4, 0, %v2715_v47 }
 0x28d   :  { %v2496_v31 = vshrl.u32 %v2491_v59, 16  ;;  %v3055_v25 = vand.u32 2139095040, %v8525_v41  ;;  %v2518_v11 = vshrl.u32 %v2513_v3, 16  ;;  %v9729_v12 = vand.u32 2147483647, %v8525_v41 }
 0x28e   :  { %v2505_v60 = vadd.s32 %v2504_v23, %v2494_v36  ;;  %v2527_v8 = vadd.s32 %v2526_v63, %v2516_v0  ;;  %v2713_v33 = vsel %vm2592_vm13, %v2712_v61, %v2711_v4  ;;  %v2475_v38 = vsel %vm2469_vm2, %v2472_v52, %v2474_v14 }
 0x28f   :  { %v3056_v39 = vshrl.u32 %v3055_v25, 23  ;;  %v8570_v48 = vsub.f32 %v8260_v26, %v8558_v15  ;;  %v2716_v47 = vsel %vm8545_vm4, %v8269_v53, %v2713_v33  ;;  %v2525_v3 = vadd.s32 %v2521_v19, %v2517_v35 }
 0x290   :  { %v2506_v59 = vadd.s32 %v2505_v60, %v2496_v31  ;;  %v2528_v40 = vadd.s32 %v2527_v8, %v2518_v11  ;;  %v2718_v13 = vmul.f32 %v2716_v47, %v2716_v47  ;;  %v5239_v22 = vadd.s32 3, %v2717_v37 }
 0x291   :  { %v6357_v51 = vadd.s32 4294967169, %v3056_v39  ;;  %v624_v46 = vmul.f32 %v8570_v48, %v8570_v48  ;;  %v8577_v18 = vpop.eup %6479  ;;  %v2529_v52 = vmul.u32 %v8472_v44, %v2475_v38  ;;  %v3059_v14 = vand.u32 8388607, %v9729_v12 }
 0x292   :  { %vm2531_vm9 = vc.u32 %v2506_v59, %v2525_v3  ;;  %v2532_v26 = vadd.s32 1, %v2528_v40  ;;  %v2719_v7 = vmul.f32 -0.001358992, %v2718_v13  ;;  %v2726_v49 = vmul.f32 -0.00019511016, %v2718_v13 }
 0x293   :  { %v8584_v35 = vmul.f32 %v8577_v18, %v8522_v29  ;;  %v3062_v19 = vadd.s32 1, %v6357_v51  ;;  %v1148_v9 = vmul.f32 %v8266_v42, %v6878_v58  ;;  %v1190_v4 = vmul.f32 1.442695, %v8457_v5 }
 0x294   :  { %v2533_v1 = vsel %vm2531_vm9, %v2532_v26, %v2528_v40  ;;  %v640_v44 = vadd.f32 %v624_v46, %v8452_v56  ;;  %v2720_v0 = vadd.f32 0.041655596, %v2719_v7  ;;  %v2727_v27 = vadd.f32 0.008332121, %v2726_v49  ;;  %v9816_v56 = vld [vmem:[#allocation45_spill] sm:$0xff] }
 0x295   :  { %9815 = vst [vmem:[#allocation44_spill] sm:$0xff] %v8584_v35  ;;  %v2534_v36 = vadd.s32 %v2533_v1, %v2529_v52  ;;  %vm3063_vm10 = vcmp.gt.s32.totalorder %v3062_v19, 0  ;;  %v2734_v23 = vand.u32 3, %v2717_v37  ;;  %v3060_v63 = vor.u32 8388608, %v3059_v14 }
 0x296   :  { %v3064_v61 = vsel %vm3063_vm10, %v3062_v19, 0  ;;  %v2721_v31 = vmul.f32 %v2720_v0, %v2718_v13  ;;  %v2728_v25 = vmul.f32 %v2727_v27, %v2718_v13  ;;  %v5240_v29 = vand.u32 3, %v5239_v22 }
 0x297   :  { %v2535_v60 = vadd.s32 536870912, %v2534_v36  ;;  %v8590_v11 = vmul.f32 1.442695, %v1148_v9  ;;  %6481 = vpow2.f32 %v1190_v4  ;;  %v3066_v33 = vand.u32 31, %v3064_v61 }
 0x298   :  { %v2722_v58 = vadd.f32 -0.4999988, %v2721_v31  ;;  %v2729_v8 = vadd.f32 -0.16666654, %v2728_v25  ;;  %v8595_v38 = vsub.f32 0.0, %v9816_v56  ;;  %vm2736_vm11 = vcmp.eq.s32.totalorder %v2734_v23, 0 }
 0x299   :  { %v8592_v5 = vshrl.u32 %v2535_v60, 30  ;;  %vm2739_vm12 = vcmp.eq.s32.totalorder %v2734_v23, 2  ;;  %v8597_v37 = vshll.u32 %v3060_v63, 8  ;;  %vm2735_vm13 = vcmp.lt.s32.totalorder %v2734_v23, 2 }
 0x29a   :  { %v2723_v39 = vmul.f32 %v2722_v58, %v2718_v13  ;;  %v2730_v40 = vmul.f32 %v2729_v8, %v2718_v13  ;;  %vm5241_vm14 = vcmp.lt.s32.totalorder %v5240_v29, 2  ;;  %vm2733_vm15 = vweird.f32 %v8269_v53 }
 0x29b   :  { %v2537_v22 = vshll.u32 %v8592_v5, 30  ;;  %vm5242_vm0 = vcmp.eq.s32.totalorder %v5240_v29, 0  ;;  %vm5245_vm1 = vcmp.eq.s32.totalorder %v5240_v29, 2  ;;  %v2530_v51 = vadd.s32 %v2525_v3, %v2506_v59 }
 0x29c   :  { %v8603_v46 = vmul.f32 %v8266_v42, %v8558_v15  ;;  %v2724_v52 = vadd.f32 1.0, %v2723_v39  ;;  %v2731_v26 = vadd.f32 1.0, %v2730_v40  ;;  %v8607_v7 = vsub.s32 32, %v3066_v33 }
 0x29d   :  { %v8605_v14 = vsub.s32 %v2534_v36, %v2537_v22  ;;  %v6482_v13 = vpop.eup %6481  ;;  %v8609_v49 = vshrl.u32 %v3064_v61, 5  ;;  %v8612_v19 = vand.u32 65535, %v8597_v37  ;;  %v8615_v9 = vshrl.u32 %v8597_v37, 16 }
 0x29e   :  { %6483 = vrcp.f32 %v640_v44  ;;  %v2732_v59 = vmul.f32 %v2731_v26, %v2716_v47  ;;  %v2740_v3 = vxor.u32 2147483648, %v2724_v52  ;;  %vm2438_vm2 = vcmp.lt.s32.totalorder %v8417_v16, 0 }
 0x29f   :  { %vm2539_vm3 = vcmp.lt.s32.totalorder %v8605_v14, 0  ;;  %v2540_v42 = vsub.s32 0, %v8605_v14  ;;  %v3069_v15 = vshll.u32 %v9759_v6, %v3066_v33  ;;  %v3072_v4 = vshll.u32 %v9763_v32, %v3066_v33 }
 0x2a0   :  { %v3075_v1 = vshll.u32 %v9764_v57, %v3066_v33  ;;  %v2737_v27 = vxor.u32 2147483648, %v2732_v59  ;;  %v3070_v47 = vshrl.u32 %v9763_v32, %v8607_v7  ;;  %v3073_v44 = vshrl.u32 %v9764_v57, %v8607_v7 }
 0x2a1   :  { %v2541_v36 = vsel %vm2539_vm3, %v2540_v42, %v8605_v14  ;;  %v2560_v61 = vsub.s32 4, %v8592_v5  ;;  %v3076_v31 = vshrl.u32 %v9765_v45, %v8607_v7  ;;  %v3079_v25 = vshrl.u32 %v9771_v43, %v8607_v7 }
 0x2a2   :  { %v2542_v63 = vclz %v2541_v36  ;;  %v2738_v60 = vsel %vm2736_vm11, %v2724_v52, %v2737_v27  ;;  %v2741_v58 = vsel %vm2739_vm12, %v2740_v3, %v2732_v59  ;;  %v5244_v8 = vsel %vm5242_vm0, %v2724_v52, %v2737_v27 }
 0x2a3   :  { %v5247_v39 = vsel %vm5245_vm1, %v2740_v3, %v2732_v59  ;;  %v2742_v22 = vsel %vm2735_vm13, %v2738_v60, %v2741_v58  ;;  %v3078_v36 = vshll.u32 %v9765_v45, %v3066_v33  ;;  %v3071_v35 = vor.u32 %v3070_v47, %v3069_v15 }
 0x2a4   :  { %v8638_v40 = vpop.eup %6483  ;;  %v5248_v26 = vsel %vm5241_vm14, %v5244_v8, %v5247_v39  ;;  %v6346_v42 = vadd.s32 4294967294, %v2542_v63  ;;  %v2743_v12 = vsel %vm2733_vm15, nan, %v2742_v22  ;;  %v3074_v56 = vor.u32 %v3073_v44, %v3072_v4 }
 0x2a5   :  { %v5249_v0 = vsel %vm2733_vm15, nan, %v5248_v26  ;;  %v3677_v52 = vmul.f32 %v6482_v13, %v2743_v12  ;;  %v9817_v59 = vand.u32 2147483647, %v8417_v16  ;;  %v3080_v29 = vor.u32 %v3079_v25, %v3078_v36 }
 0x2a6   :  { %v6189_v27 = vmul.f32 %v6482_v13, %v5249_v0  ;;  %vm6347_vm5 = vcmp.lt.s32.totalorder %v6346_v42, 0  ;;  %v3077_v63 = vor.u32 %v3076_v31, %v3075_v1  ;;  %v3081_v60 = vshll.u32 %v9771_v43, %v3066_v33 }
 0x2a7   :  { %vm8649_vm4 = vcmp.le.f32.partialorder %v9817_v59, 0.7853982  ;;  %v2545_v3 = vsel %vm6347_vm5, 0, %v6346_v42  ;;  %v3082_v53 = vshrl.u32 %v9757_v2, %v8607_v7  ;;  %3693 = vst [vmem:[#allocation16 + $0x24] sm:$0xf] %v3677_v52  ;;  %v2561_v12 = vsel %vm2438_vm2, %v2560_v61, %v8592_v5 }
 0x2a8   :  { %v2546_v15 = vsub.s32 32, %v2545_v3  ;;  %v2550_v4 = vsub.s32 4294967266, %v2545_v3  ;;  %vm3084_vm6 = vcmp.lt.s32.totalorder %v8609_v49, 1  ;;  %6205 = vst [vmem:[#allocation17 + $0x24] sm:$0xf] %v6189_v27  ;;  %vm3086_vm7 = vcmp.lt.s32.totalorder %v8609_v49, 3 }
 0x2a9   :  { %v3083_v13 = vor.u32 %v3082_v53, %v3081_v60  ;;  %vm3087_vm8 = vcmp.lt.s32.totalorder %v8609_v49, 4  ;;  %v3092_v33 = vsel %vm3084_vm6, %v3071_v35, %v3074_v56  ;;  %v2547_v1 = vshll.u32 %v8605_v14, %v2545_v3 }
 0x2aa   :  { %v2548_v0 = vshrl.u32 %v2530_v51, %v2546_v15  ;;  %v2551_v47 = vadd.s32 127, %v2550_v4  ;;  %v3093_v44 = vsel %vm3087_vm8, %v3080_v29, 920167782  ;;  %vm3085_vm9 = vcmp.lt.s32.totalorder %v8609_v49, 2  ;;  %v8734_v49 = vld [vmem:[%s9672_s4] ss:$0 sm:$0xff] }
 0x2ab   :  { %v3094_v5 = vsel %vm3086_vm7, %v3077_v63, %v3093_v44  ;;  %v3096_v61 = vsel %vm3084_vm6, %v3074_v56, %v3077_v63  ;;  %v3097_v31 = vsel %vm3087_vm8, %v3083_v13, 1326507024  ;;  %v3068_v8 = vshrl.u32 %v9759_v6, %v8607_v7 }
 0x2ac   :  { %v2549_v25 = vor.u32 %v2548_v0, %v2547_v1  ;;  %v2552_v58 = vshll.u32 %v2551_v47, 23  ;;  %v3095_v51 = vsel %vm3085_vm9, %v3092_v33, %v3094_v5  ;;  %v3098_v14 = vsel %vm3086_vm7, %v3080_v29, %v3097_v31 }
 0x2ad   :  { %v3099_v39 = vsel %vm3085_vm9, %v3096_v61, %v3098_v14  ;;  %v3125_v22 = vand.u32 65535, %v3095_v51  ;;  %v3126_v26 = vshrl.u32 %v3095_v51, 16  ;;  %v3089_v36 = vsel %vm3087_vm8, %v3077_v63, 2102212464 }
 0x2ae   :  { %v2553_v42 = vor.u32 4788187, %v2552_v58  ;;  %v3103_v52 = vand.u32 65535, %v3099_v39  ;;  %v3104_v27 = vshrl.u32 %v3099_v39, 16  ;;  %v8686_v59 = vsel %vm8649_vm4, 0, %v2561_v12 }
 0x2af   :  { %v3088_v29 = vsel %vm3084_vm6, %v3068_v8, %v3071_v35  ;;  %v3128_v7 = vmul.u32 %v3126_v26, %v8612_v19  ;;  %v3129_v3 = vmul.u32 %v3125_v22, %v8615_v9  ;;  %v2556_v53 = vcvt.s32.f32 %v2549_v25 }
 0x2b0   :  { %v2554_v60 = vand.u32 2147483647, %v2553_v42  ;;  %v3106_v15 = vmul.u32 %v3104_v27, %v8612_v19  ;;  %v3107_v4 = vmul.u32 %v3103_v52, %v8615_v9  ;;  %v3090_v63 = vsel %vm3086_vm7, %v3074_v56, %v3089_v36 }
 0x2b1   :  { %v3127_v13 = vmul.u32 %v3125_v22, %v8612_v19  ;;  %v3130_v12 = vmul.u32 %v3126_v26, %v8615_v9  ;;  %v3131_v33 = vshll.u32 %v3128_v7, 16  ;;  %v3105_v35 = vmul.u32 %v3103_v52, %v8612_v19 }
 0x2b2   :  { %v2557_v1 = vmul.f32 %v2556_v53, %v2554_v60  ;;  %v3108_v0 = vmul.u32 %v3104_v27, %v8615_v9  ;;  %v3109_v47 = vshll.u32 %v3106_v15, 16  ;;  %v3111_v44 = vshll.u32 %v3107_v4, 16 }
 0x2b3   :  { %v3133_v5 = vshll.u32 %v3129_v3, 16  ;;  %vm3135_vm10 = vc.u32 %v3127_v13, %v3131_v33  ;;  %v3137_v61 = vadd.s32 %v3131_v33, %v3127_v13  ;;  %v3132_v51 = vshrl.u32 %v3128_v7, 16 }
 0x2b4   :  { %v2558_v31 = vxor.u32 2147483648, %v2557_v1  ;;  %vm3113_vm11 = vc.u32 %v3105_v35, %v3109_v47  ;;  %v3115_v25 = vadd.s32 %v3109_v47, %v3105_v35  ;;  %v3136_v56 = vsel %vm3135_vm10, 1, %v9761_v55  ;;  %v8719_v47 = vpop.permute.xlu1 %326 }
 0x2b5   :  { %v3114_v58 = vsel %vm3113_vm11, 1, %v9761_v55  ;;  %v3138_v14 = vadd.s32 %v3136_v56, %v3130_v12  ;;  %vm3139_vm12 = vc.u32 %v3137_v61, %v3133_v5  ;;  %v8711_v42 = vmul.f32 %v8638_v40, %v8570_v48 }
 0x2b6   :  { %v2559_v19 = vsel %vm2438_vm2, %v2558_v31, %v2557_v1  ;;  %v3116_v8 = vadd.s32 %v3114_v58, %v3108_v0  ;;  %vm3117_vm13 = vc.u32 %v3115_v25, %v3111_v44  ;;  %v3140_v9 = vsel %vm3139_vm12, 1, %v9761_v55 }
 0x2b7   :  { %v2562_v39 = vsel %vm8649_vm4, %v8417_v16, %v2559_v19  ;;  %v3118_v22 = vsel %vm3117_vm13, 1, %v9761_v55  ;;  %v3142_v26 = vadd.s32 %v3140_v9, %v3138_v14  ;;  %v3110_v52 = vshrl.u32 %v3106_v15, 16 }
 0x2b8   :  { %v2564_v36 = vmul.f32 %v2562_v39, %v2562_v39  ;;  %v3120_v27 = vadd.s32 %v3118_v22, %v3116_v8  ;;  %v9820_v7 = vand.u32 2139095040, %v8603_v46  ;;  %v3112_v53 = vshrl.u32 %v3107_v4, 16 }
 0x2b9   :  { %v3134_v13 = vshrl.u32 %v3129_v3, 16  ;;  %v3143_v12 = vadd.s32 %v3142_v26, %v3132_v51  ;;  %v8717_v23 = vmul.f32 %v8315_v54, %v8021_v20  ;;  %v3091_v48 = vsel %vm3085_vm9, %v3088_v29, %v3090_v63 }
 0x2ba   :  { %v2902_v60 = vshrl.u32 %v9820_v7, 23  ;;  %v2565_v33 = vmul.f32 -0.001358992, %v2564_v36  ;;  %v2572_v1 = vmul.f32 -0.00019511016, %v2564_v36  ;;  %v3121_v35 = vadd.s32 %v3120_v27, %v3110_v52 }
 0x2bb   :  { %v8723_v15 = vadd.s32 %v3137_v61, %v3133_v5  ;;  %v3144_v44 = vadd.s32 %v3143_v12, %v3134_v13  ;;  %v9731_v4 = vand.u32 2147483647, %v8603_v46  ;;  %v612_v54 = vmul.f32 %v8595_v38, %v8595_v38  ;;  %v8754_v12 = vld [vmem:[%s9673_s5] ss:$0 sm:$0xff] }
 0x2bc   :  { %v6354_v0 = vadd.s32 4294967169, %v2902_v60  ;;  %v2566_v3 = vadd.f32 0.041655596, %v2565_v33  ;;  %v2573_v31 = vadd.f32 0.008332121, %v2572_v1  ;;  %v8726_v25 = vadd.s32 %v3121_v35, %v3112_v53 }
 0x2bd   :  { %v5084_v56 = vadd.s32 3, %v8686_v59  ;;  %v3148_v58 = vadd.s32 1, %v3144_v44  ;;  %v8738_v29 = vsub.f32 %v8734_v49, %v8719_v47  ;;  %v3145_v61 = vmul.u32 %v8597_v37, %v3091_v48 }
 0x2be   :  { %v2908_v20 = vadd.s32 1, %v6354_v0  ;;  %v2567_v63 = vmul.f32 %v2566_v3, %v2564_v36  ;;  %v2574_v5 = vmul.f32 %v2573_v31, %v2564_v36  ;;  %vm3147_vm14 = vc.u32 %v8726_v25, %v8723_v15 }
 0x2bf   :  { %v3149_v51 = vsel %vm3147_vm14, %v3148_v58, %v3144_v44  ;;  %v2905_v14 = vand.u32 8388607, %v9731_v4  ;;  %v628_v19 = vmul.f32 %v8738_v29, %v8738_v29  ;;  %v2580_v52 = vand.u32 3, %v8686_v59 }
 0x2c0   :  { %vm2909_vm15 = vcmp.gt.s32.totalorder %v2908_v20, 0  ;;  %v2568_v8 = vadd.f32 -0.4999988, %v2567_v63  ;;  %v2575_v9 = vadd.f32 -0.16666654, %v2574_v5  ;;  %v3150_v22 = vadd.s32 %v3149_v51, %v3145_v61 }
 0x2c1   :  { %v2910_v26 = vsel %vm2909_vm15, %v2908_v20, 0  ;;  %v5085_v27 = vand.u32 3, %v5084_v56  ;;  %v8748_v37 = vadd.f32 %v628_v19, %v612_v54  ;;  %6485 = vpow2.f32 %v8590_v11 }
 0x2c2   :  { %v2912_v7 = vand.u32 31, %v2910_v26  ;;  %v2569_v60 = vmul.f32 %v2568_v8, %v2564_v36  ;;  %v2576_v53 = vmul.f32 %v2575_v9, %v2564_v36  ;;  %v3151_v13 = vadd.s32 536870912, %v3150_v22 }
 0x2c3   :  { %v8758_v33 = vmul.f32 %v8754_v12, %v9811_v10  ;;  %vm2579_vm0 = vweird.f32 %v8417_v16  ;;  %v2906_v59 = vor.u32 8388608, %v2905_v14  ;;  %vm2581_vm1 = vcmp.lt.s32.totalorder %v2580_v52, 2 }
 0x2c4   :  { %v2570_v1 = vadd.f32 1.0, %v2569_v60  ;;  %v2577_v35 = vadd.f32 1.0, %v2576_v53  ;;  %v8761_v0 = vshrl.u32 %v3151_v13, 30  ;;  %v8763_v36 = vsub.s32 32, %v2912_v7 }
 0x2c5   :  { %vm2582_vm2 = vcmp.eq.s32.totalorder %v2580_v52, 0  ;;  %vm2585_vm3 = vcmp.eq.s32.totalorder %v2580_v52, 2  ;;  %vm5086_vm4 = vcmp.lt.s32.totalorder %v5085_v27, 2  ;;  %vm5087_vm5 = vcmp.eq.s32.totalorder %v5085_v27, 0 }
 0x2c6   :  { %v2578_v11 = vmul.f32 %v2577_v35, %v2562_v39  ;;  %v2586_v48 = vxor.u32 2147483648, %v2570_v1  ;;  %v3153_v44 = vshll.u32 %v8761_v0, 30  ;;  %vm5090_vm6 = vcmp.eq.s32.totalorder %v5085_v27, 2 }
 0x2c7   :  { %v8766_v10 = vshrl.u32 %v2910_v26, 5  ;;  %v2915_v3 = vshll.u32 %v9759_v6, %v2912_v7  ;;  %v8769_v31 = vshll.u32 %v2906_v59, 8  ;;  %v2916_v56 = vshrl.u32 %v9763_v32, %v8763_v36  ;;  %v6486_v39 = vpop.eup %6485 }
 0x2c8   :  { %v2583_v20 = vxor.u32 2147483648, %v2578_v11  ;;  %v8771_v54 = vsub.s32 %v3150_v22, %v3153_v44  ;;  %v2918_v58 = vshll.u32 %v9763_v32, %v2912_v7  ;;  %v2587_v63 = vsel %vm2585_vm3, %v2586_v48, %v2578_v11 }
 0x2c9   :  { %v5092_v5 = vsel %vm5090_vm6, %v2586_v48, %v2578_v11  ;;  %v2919_v61 = vshrl.u32 %v9764_v57, %v8763_v36  ;;  %v2925_v51 = vshrl.u32 %v9771_v43, %v8763_v36  ;;  %v2922_v26 = vshrl.u32 %v9765_v45, %v8763_v36 }
 0x2ca   :  { %v2584_v14 = vsel %vm2582_vm2, %v2570_v1, %v2583_v20  ;;  %v5089_v19 = vsel %vm5087_vm5, %v2570_v1, %v2583_v20  ;;  %vm3155_vm7 = vcmp.lt.s32.totalorder %v8771_v54, 0  ;;  %v3156_v8 = vsub.s32 0, %v8771_v54 }
 0x2cb   :  { %v2588_v9 = vsel %vm2581_vm1, %v2584_v14, %v2587_v63  ;;  %v5093_v22 = vsel %vm5086_vm4, %v5089_v19, %v5092_v5  ;;  %v2924_v60 = vshll.u32 %v9765_v45, %v2912_v7  ;;  %v2928_v1 = vshrl.u32 %v9757_v2, %v8763_v36 }
 0x2cc   :  { %v2589_v53 = vsel %vm2579_vm0, nan, %v2588_v9  ;;  %v5094_v13 = vsel %vm2579_vm0, nan, %v5093_v22  ;;  %v3157_v59 = vsel %vm3155_vm7, %v3156_v8, %v8771_v54  ;;  %v2921_v11 = vshll.u32 %v9764_v57, %v2912_v7 }
 0x2cd   :  { %v3676_v52 = vmul.f32 %v6486_v39, %v2589_v53  ;;  %v6188_v35 = vmul.f32 %v6486_v39, %v5094_v13  ;;  %v3158_v27 = vclz %v3157_v59  ;;  %v8797_v48 = vor.u32 %v2916_v56, %v2915_v3 }
 0x2ce   :  { %v8799_v44 = vor.u32 %v2919_v61, %v2918_v58  ;;  %v2926_v20 = vor.u32 %v2925_v51, %v2924_v60  ;;  %v2927_v63 = vshll.u32 %v9771_v43, %v2912_v7  ;;  %vm3054_vm8 = vcmp.lt.s32.totalorder %v8525_v41, 0 }
 0x2cf   :  { %3692 = vst [vmem:[#allocation16 + $0x20] sm:$0xf] %v3676_v52  ;;  %v6358_v16 = vadd.s32 4294967294, %v3158_v27  ;;  %v2923_v5 = vor.u32 %v2922_v26, %v2921_v11  ;;  %v2947_v14 = vand.u32 65535, %v8769_v31  ;;  %v9821_v39 = vand.u32 2147483647, %v8525_v41 }
 0x2d0   :  { %6204 = vst [vmem:[#allocation17 + $0x20] sm:$0xf] %v6188_v35  ;;  %v3146_v3 = vadd.s32 %v8723_v15, %v8726_v25  ;;  %v2929_v56 = vor.u32 %v2928_v1, %v2927_v63  ;;  %v2948_v7 = vshrl.u32 %v8769_v31, 16  ;;  %v8815_v58 = vmul.f32 %v8754_v12, %v8719_v47 }
 0x2d1   :  { %vm8806_vm9 = vcmp.le.f32.partialorder %v9821_v39, 0.7853982  ;;  %vm6359_vm10 = vcmp.lt.s32.totalorder %v6358_v16, 0  ;;  %v3176_v61 = vsub.s32 4, %v8761_v0  ;;  %vm2930_vm11 = vcmp.lt.s32.totalorder %v8766_v10, 1 }
 0x2d2   :  { %vm2933_vm12 = vcmp.lt.s32.totalorder %v8766_v10, 4  ;;  %v3161_v51 = vsel %vm6359_vm10, 0, %v6358_v16  ;;  %vm2931_vm13 = vcmp.lt.s32.totalorder %v8766_v10, 2  ;;  %v2938_v15 = vsel %vm2930_vm11, %v8797_v48, %v8799_v44 }
 0x2d3   :  { %v2939_v25 = vsel %vm2933_vm12, %v2926_v20, 920167782  ;;  %v3162_v47 = vsub.s32 32, %v3161_v51  ;;  %v3166_v8 = vsub.s32 4294967266, %v3161_v51  ;;  %vm2932_vm14 = vcmp.lt.s32.totalorder %v8766_v10, 3 }
 0x2d4   :  { %v2942_v9 = vsel %vm2930_vm11, %v8799_v44, %v2923_v5  ;;  %v3163_v22 = vshll.u32 %v8771_v54, %v3161_v51  ;;  %v2940_v26 = vsel %vm2932_vm14, %v2923_v5, %v2939_v25  ;;  %v2943_v60 = vsel %vm2933_vm12, %v2929_v56, 1326507024 }
 0x2d5   :  { %6487 = vrcp.f32 %v8748_v37  ;;  %v3164_v53 = vshrl.u32 %v3146_v3, %v3162_v47  ;;  %v3167_v13 = vadd.s32 127, %v3166_v8  ;;  %v2941_v59 = vsel %vm2931_vm13, %v2938_v15, %v2940_v26 }
 0x2d6   :  { %v2944_v1 = vsel %vm2932_vm14, %v2926_v20, %v2943_v60  ;;  %v3177_v54 = vsel %vm3054_vm8, %v3176_v61, %v8761_v0  ;;  %v2971_v35 = vand.u32 65535, %v2941_v59  ;;  %v2972_v27 = vshrl.u32 %v2941_v59, 16 }
 0x2d7   :  { %v2945_v52 = vsel %vm2931_vm13, %v2942_v9, %v2944_v1  ;;  %v3165_v11 = vor.u32 %v3164_v53, %v3163_v22  ;;  %v3168_v63 = vshll.u32 %v3167_v13, 23  ;;  %v2914_v39 = vshrl.u32 %v9759_v6, %v8763_v36 }
 0x2d8   :  { %v2949_v37 = vand.u32 65535, %v2945_v52  ;;  %v2950_v16 = vshrl.u32 %v2945_v52, 16  ;;  %v2974_v3 = vmul.u32 %v2972_v27, %v2947_v14  ;;  %v2975_v56 = vmul.u32 %v2971_v35, %v2948_v7 }
 0x2d9   :  { %v3169_v51 = vor.u32 4788187, %v3168_v63  ;;  %v3179_v0 = vsel %vm8806_vm9, 0, %v3177_v54  ;;  %v2935_v61 = vsel %vm2933_vm12, %v2923_v5, 2102212464  ;;  %v2973_v8 = vmul.u32 %v2971_v35, %v2947_v14 }
 0x2da   :  { %v2952_v15 = vmul.u32 %v2950_v16, %v2947_v14  ;;  %v2953_v47 = vmul.u32 %v2949_v37, %v2948_v7  ;;  %v2976_v9 = vmul.u32 %v2972_v27, %v2948_v7  ;;  %v2977_v22 = vshll.u32 %v2974_v3, 16 }
 0x2db   :  { %v8853_v25 = vpop.eup %6487  ;;  %v3170_v26 = vand.u32 2147483647, %v3169_v51  ;;  %v3172_v36 = vcvt.s32.f32 %v3165_v11  ;;  %v2951_v60 = vmul.u32 %v2949_v37, %v2947_v14  ;;  %v2954_v13 = vmul.u32 %v2950_v16, %v2948_v7 }
 0x2dc   :  { %v2955_v53 = vshll.u32 %v2952_v15, 16  ;;  %v2957_v59 = vshll.u32 %v2953_v47, 16  ;;  %v2979_v1 = vshll.u32 %v2975_v56, 16  ;;  %vm2981_vm15 = vc.u32 %v2973_v8, %v2977_v22 }
 0x2dd   :  { %v3173_v52 = vmul.f32 %v3172_v36, %v3170_v26  ;;  %v2982_v5 = vsel %vm2981_vm15, 1, %v9761_v55  ;;  %v2983_v4 = vadd.s32 %v2977_v22, %v2973_v8  ;;  %v8859_v35 = vmul.f32 %v8853_v25, %v8738_v29 }
 0x2de   :  { %vm2959_vm0 = vc.u32 %v2951_v60, %v2955_v53  ;;  %v2961_v54 = vadd.s32 %v2955_v53, %v2951_v60  ;;  %v2984_v20 = vadd.s32 %v2982_v5, %v2976_v9  ;;  %v3517_v7 = vand.u32 2139095040, %v8815_v58 }
 0x2df   :  { %v2960_v63 = vsel %vm2959_vm0, 1, %v9761_v55  ;;  %9824 = vst [vmem:[#allocation56_spill] sm:$0xff] %v8859_v35  ;;  %v3174_v27 = vxor.u32 2147483648, %v3173_v52  ;;  %v2934_v11 = vsel %vm2930_vm11, %v2914_v39, %v8797_v48  ;;  %v2956_v37 = vshrl.u32 %v2952_v15, 16 }
 0x2e0   :  { %v2962_v14 = vadd.s32 %v2960_v63, %v2954_v13  ;;  %vm2963_vm1 = vc.u32 %v2961_v54, %v2957_v59  ;;  %vm2985_vm2 = vc.u32 %v2983_v4, %v2979_v1  ;;  %v3518_v9 = vshrl.u32 %v3517_v7, 23  ;;  %v9825_v54 = vld [vmem:[#allocation43_spill] sm:$0xff] }
 0x2e1   :  { %v2964_v16 = vsel %vm2963_vm1, 1, %v9761_v55  ;;  %v3175_v51 = vsel %vm3054_vm8, %v3174_v27, %v3173_v52  ;;  %v2986_v29 = vsel %vm2985_vm2, 1, %v9761_v55  ;;  %v2936_v26 = vsel %vm2932_vm14, %v8799_v44, %v2935_v61 }
 0x2e2   :  { %v2966_v8 = vadd.s32 %v2964_v16, %v2962_v14  ;;  %v3178_v22 = vsel %vm8806_vm9, %v8525_v41, %v3175_v51  ;;  %v2978_v48 = vshrl.u32 %v2974_v3, 16  ;;  %v2988_v39 = vadd.s32 %v2986_v29, %v2984_v20 }
 0x2e3   :  { %v3180_v15 = vmul.f32 %v3178_v22, %v3178_v22  ;;  %v2958_v36 = vshrl.u32 %v2953_v47, 16  ;;  %v6366_v53 = vadd.s32 4294967169, %v3518_v9  ;;  %v2980_v13 = vshrl.u32 %v2975_v56, 16 }
 0x2e4   :  { %v2967_v60 = vadd.s32 %v2966_v8, %v2956_v37  ;;  %v8875_v59 = vadd.s32 %v2983_v4, %v2979_v1  ;;  %v2989_v52 = vadd.s32 %v2988_v39, %v2978_v48  ;;  %v8879_v5 = vmul.f32 %v7833_v34, %v9825_v54 }
 0x2e5   :  { %v3181_v19 = vmul.f32 -0.001358992, %v3180_v15  ;;  %v3188_v63 = vmul.f32 -0.00019511016, %v3180_v15  ;;  %v3524_v14 = vadd.s32 1, %v6366_v53  ;;  %v5704_v44 = vadd.s32 3, %v3179_v0 }
 0x2e6   :  { %v8881_v27 = vadd.s32 %v2967_v60, %v2958_v36  ;;  %v2937_v3 = vsel %vm2931_vm13, %v2934_v11, %v2936_v26  ;;  %v2990_v20 = vadd.s32 %v2989_v52, %v2980_v13  ;;  %v1196_v61 = vmul.f32 1.442695, %v8758_v33 }
 0x2e7   :  { %v3182_v56 = vadd.f32 0.041655596, %v3181_v19  ;;  %v3189_v4 = vadd.f32 0.008332121, %v3188_v63  ;;  %v3196_v47 = vand.u32 3, %v3179_v0  ;;  %vm3525_vm4 = vcmp.gt.s32.totalorder %v3524_v14, 0 }
 0x2e8   :  { %vm2993_vm3 = vc.u32 %v8881_v27, %v8875_v59  ;;  %v2994_v34 = vadd.s32 1, %v2990_v20  ;;  %v9826_v1 = vand.u32 2147483647, %v8815_v58  ;;  %v2991_v51 = vmul.u32 %v8769_v31, %v2937_v3 }
 0x2e9   :  { %v3183_v37 = vmul.f32 %v3182_v56, %v3180_v15  ;;  %v3190_v16 = vmul.f32 %v3189_v4, %v3180_v15  ;;  %v3526_v10 = vsel %vm3525_vm4, %v3524_v14, 0  ;;  %v5705_v11 = vand.u32 3, %v5704_v44 }
 0x2ea   :  { %v3521_v7 = vand.u32 8388607, %v9826_v1  ;;  %v2995_v8 = vsel %vm2993_vm3, %v2994_v34, %v2990_v20  ;;  %v3528_v29 = vand.u32 31, %v3526_v10  ;;  %6489 = vpow2.f32 %v1196_v61 }
 0x2eb   :  { %v3184_v33 = vadd.f32 -0.4999988, %v3183_v37  ;;  %v3191_v9 = vadd.f32 -0.16666654, %v3190_v16  ;;  %v2996_v26 = vadd.s32 %v2995_v8, %v2991_v51  ;;  %vm3197_vm5 = vcmp.lt.s32.totalorder %v3196_v47, 2 }
 0x2ec   :  { %v3522_v48 = vor.u32 8388608, %v3521_v7  ;;  %v8891_v39 = vsub.s32 32, %v3528_v29  ;;  %vm3195_vm6 = vweird.f32 %v8525_v41  ;;  %vm3198_vm7 = vcmp.eq.s32.totalorder %v3196_v47, 0 }
 0x2ed   :  { %v3185_v0 = vmul.f32 %v3184_v33, %v3180_v15  ;;  %v3192_v36 = vmul.f32 %v3191_v9, %v3180_v15  ;;  %v2997_v60 = vadd.s32 536870912, %v2996_v26  ;;  %vm3201_vm8 = vcmp.eq.s32.totalorder %v3196_v47, 2  ;;  %v8930_v47 = vpop.permute.xlu0 %319 }
 0x2ee   :  { %vm5706_vm9 = vcmp.lt.s32.totalorder %v5705_v11, 2  ;;  %vm5707_vm10 = vcmp.eq.s32.totalorder %v5705_v11, 0  ;;  %vm5710_vm11 = vcmp.eq.s32.totalorder %v5705_v11, 2  ;;  %v8896_v52 = vshrl.u32 %v3526_v10, 5 }
 0x2ef   :  { %v3186_v31 = vadd.f32 1.0, %v3185_v0  ;;  %v3193_v53 = vadd.f32 1.0, %v3192_v36  ;;  %v8894_v13 = vshrl.u32 %v2997_v60, 30  ;;  %v3531_v54 = vshll.u32 %v9759_v6, %v3528_v29 }
 0x2f0   :  { %v3532_v15 = vshrl.u32 %v9763_v32, %v8891_v39  ;;  %v8901_v19 = vshll.u32 %v3522_v48, 8  ;;  %v3534_v3 = vshll.u32 %v9763_v32, %v3528_v29  ;;  %v6490_v20 = vpop.eup %6489  ;;  %v3535_v61 = vshrl.u32 %v9764_v57, %v8891_v39 }
 0x2f1   :  { %v3194_v63 = vmul.f32 %v3193_v53, %v3178_v22  ;;  %v3202_v14 = vxor.u32 2147483648, %v3186_v31  ;;  %v2999_v44 = vshll.u32 %v8894_v13, 30  ;;  %v3537_v56 = vshll.u32 %v9764_v57, %v3528_v29 }
 0x2f2   :  { %v3540_v4 = vshll.u32 %v9765_v45, %v3528_v29  ;;  %v3541_v34 = vshrl.u32 %v9771_v43, %v8891_v39  ;;  %v3538_v22 = vshrl.u32 %v9765_v45, %v8891_v39  ;;  %v3544_v37 = vshrl.u32 %v9757_v2, %v8891_v39 }
 0x2f3   :  { %v3199_v1 = vxor.u32 2147483648, %v3194_v63  ;;  %v3000_v7 = vsub.s32 %v2996_v26, %v2999_v44  ;;  %v3203_v16 = vsel %vm3201_vm8, %v3202_v14, %v3194_v63  ;;  %v5712_v51 = vsel %vm5710_vm11, %v3202_v14, %v3194_v63 }
 0x2f4   :  { %v3533_v10 = vor.u32 %v3532_v15, %v3531_v54  ;;  %v3543_v8 = vshll.u32 %v9771_v43, %v3528_v29  ;;  %v8922_v36 = vor.u32 %v3535_v61, %v3534_v3  ;;  %v3542_v60 = vor.u32 %v3541_v34, %v3540_v4 }
 0x2f5   :  { %v3200_v33 = vsel %vm3198_vm7, %v3186_v31, %v3199_v1  ;;  %v5709_v9 = vsel %vm5707_vm10, %v3186_v31, %v3199_v1  ;;  %vm3001_vm12 = vcmp.lt.s32.totalorder %v3000_v7, 0  ;;  %v3002_v48 = vsub.s32 0, %v3000_v7 }
 0x2f6   :  { %v3204_v26 = vsel %vm3197_vm5, %v3200_v33, %v3203_v16  ;;  %v5713_v0 = vsel %vm5706_vm9, %v5709_v9, %v5712_v51  ;;  %v3545_v15 = vor.u32 %v3544_v37, %v3543_v8  ;;  %v8928_v44 = vor.u32 %v3538_v22, %v3537_v56 }
 0x2f7   :  { %v3205_v53 = vsel %vm3195_vm6, nan, %v3204_v26  ;;  %v5714_v54 = vsel %vm3195_vm6, nan, %v5713_v0  ;;  %v3003_v29 = vsel %vm3001_vm12, %v3002_v48, %v3000_v7  ;;  %v8934_v11 = vmul.f32 %v8754_v12, %v9805_v21 }
 0x2f8   :  { %v3680_v63 = vmul.f32 %v6490_v20, %v3205_v53  ;;  %v6192_v14 = vmul.f32 %v6490_v20, %v5714_v54  ;;  %v3004_v31 = vclz %v3003_v29  ;;  %vm2900_vm13 = vcmp.lt.s32.totalorder %v8603_v46, 0 }
 0x2f9   :  { %v3563_v3 = vand.u32 65535, %v8901_v19  ;;  %vm3546_vm14 = vcmp.lt.s32.totalorder %v8896_v52, 1  ;;  %vm3549_vm15 = vcmp.lt.s32.totalorder %v8896_v52, 4  ;;  %v3564_v20 = vshrl.u32 %v8901_v19, 16 }
 0x2fa   :  { %3696 = vst [vmem:[#allocation16 + $0x30] sm:$0xf] %v3680_v63  ;;  %v6355_v41 = vadd.s32 4294967294, %v3004_v31  ;;  %v3554_v61 = vsel %vm3546_vm14, %v3533_v10, %v8922_v36  ;;  %v3555_v21 = vsel %vm3549_vm15, %v3542_v60, 920167782  ;;  %v8950_v4 = vmul.f32 %v8754_v12, %v8930_v47 }
 0x2fb   :  { %6208 = vst [vmem:[#allocation17 + $0x30] sm:$0xf] %v6192_v14  ;;  %v3559_v56 = vsel %vm3549_vm15, %v3545_v15, 1326507024  ;;  %v2992_v34 = vadd.s32 %v8875_v59, %v8881_v27  ;;  %vm3548_vm1 = vcmp.lt.s32.totalorder %v8896_v52, 3  ;;  %v3558_v1 = vsel %vm3546_vm14, %v8922_v36, %v8928_v44 }
 0x2fc   :  { %vm6356_vm0 = vcmp.lt.s32.totalorder %v6355_v41, 0  ;;  %vm3547_vm2 = vcmp.lt.s32.totalorder %v8896_v52, 2  ;;  %v3556_v37 = vsel %vm3548_vm1, %v8928_v44, %v3555_v21  ;;  %v3560_v16 = vsel %vm3548_vm1, %v3542_v60, %v3559_v56 }
 0x2fd   :  { %v3007_v22 = vsel %vm6356_vm0, 0, %v6355_v41  ;;  %v3022_v27 = vsub.s32 4, %v8894_v13  ;;  %v3557_v8 = vsel %vm3547_vm2, %v3554_v61, %v3556_v37  ;;  %v3561_v9 = vsel %vm3547_vm2, %v3558_v1, %v3560_v16 }
 0x2fe   :  { %v3008_v51 = vsub.s32 32, %v3007_v22  ;;  %v3012_v59 = vsub.s32 4294967266, %v3007_v22  ;;  %v3009_v33 = vshll.u32 %v3000_v7, %v3007_v22  ;;  %v3587_v48 = vand.u32 65535, %v3557_v8 }
 0x2ff   :  { %v3588_v26 = vshrl.u32 %v3557_v8, 16  ;;  %v3565_v54 = vand.u32 65535, %v3561_v9  ;;  %v3566_v29 = vshrl.u32 %v3561_v9, 16  ;;  %v3530_v60 = vshrl.u32 %v9759_v6, %v8891_v39 }
 0x300   :  { %v3010_v0 = vshrl.u32 %v2992_v34, %v3008_v51  ;;  %v3013_v53 = vadd.s32 127, %v3012_v59  ;;  %v3591_v63 = vmul.u32 %v3587_v48, %v3564_v20  ;;  %v3360_v14 = vand.u32 2147483647, %v8950_v4 }
 0x301   :  { %v3590_v15 = vmul.u32 %v3588_v26, %v3563_v3  ;;  %v3023_v7 = vsel %vm2900_vm13, %v3022_v27, %v8894_v13  ;;  %v3568_v61 = vmul.u32 %v3566_v29, %v3563_v3  ;;  %v3550_v21 = vsel %vm3546_vm14, %v3530_v60, %v3533_v10 }
 0x302   :  { %v3011_v31 = vor.u32 %v3010_v0, %v3009_v33  ;;  %v3014_v41 = vshll.u32 %v3013_v53, 23  ;;  %v3569_v56 = vmul.u32 %v3565_v54, %v3564_v20  ;;  %v3589_v34 = vmul.u32 %v3587_v48, %v3563_v3 }
 0x303   :  { %v3593_v1 = vshll.u32 %v3590_v15, 16  ;;  %v9827_v22 = vand.u32 2147483647, %v8603_v46  ;;  %v3567_v16 = vmul.u32 %v3565_v54, %v3563_v3  ;;  %v3571_v51 = vshll.u32 %v3568_v61, 16 }
 0x304   :  { %v3015_v37 = vor.u32 4788187, %v3014_v41  ;;  %v3592_v59 = vmul.u32 %v3588_v26, %v3564_v20  ;;  %v3018_v8 = vcvt.s32.f32 %v3011_v31  ;;  %v3570_v33 = vmul.u32 %v3566_v29, %v3564_v20 }
 0x305   :  { %vm8980_vm3 = vcmp.le.f32.partialorder %v9827_v22, 0.7853982  ;;  %v3573_v13 = vshll.u32 %v3569_v56, 16  ;;  %v3595_v27 = vshll.u32 %v3591_v63, 16  ;;  %vm3575_vm4 = vc.u32 %v3567_v16, %v3571_v51 }
 0x306   :  { %v3016_v9 = vand.u32 2147483647, %v3015_v37  ;;  %v3577_v10 = vadd.s32 %v3571_v51, %v3567_v16  ;;  %vm3597_vm5 = vc.u32 %v3589_v34, %v3593_v1  ;;  %v3576_v48 = vsel %vm3575_vm4, 1, %v9761_v55 }
 0x307   :  { %v3598_v0 = vsel %vm3597_vm5, 1, %v9761_v55  ;;  %v3599_v53 = vadd.s32 %v3593_v1, %v3589_v34  ;;  %v3363_v60 = vand.u32 2139095040, %v8950_v4  ;;  %v3578_v41 = vadd.s32 %v3576_v48, %v3570_v33 }
 0x308   :  { %v3019_v22 = vmul.f32 %v3018_v8, %v3016_v9  ;;  %vm3579_vm6 = vc.u32 %v3577_v10, %v3573_v13  ;;  %v3600_v3 = vadd.s32 %v3598_v0, %v3592_v59  ;;  %v3551_v20 = vsel %vm3549_vm15, %v8928_v44, 2102212464 }
 0x309   :  { %v3580_v26 = vsel %vm3579_vm6, 1, %v9761_v55  ;;  %vm3601_vm7 = vc.u32 %v3599_v53, %v3595_v27  ;;  %v3364_v54 = vshrl.u32 %v3363_v60, 23  ;;  %v3572_v31 = vshrl.u32 %v3568_v61, 16 }
 0x30a   :  { %v3020_v29 = vxor.u32 2147483648, %v3019_v22  ;;  %v3582_v37 = vadd.s32 %v3580_v26, %v3578_v41  ;;  %v3602_v16 = vsel %vm3601_vm7, 1, %v9761_v55  ;;  %v3594_v34 = vshrl.u32 %v3590_v15, 16 }
 0x30b   :  { %v3604_v1 = vadd.s32 %v3602_v16, %v3600_v3  ;;  %v6363_v51 = vadd.s32 4294967169, %v3364_v54  ;;  %v8994_v8 = vmul.f32 %v8577_v18, %v8446_v24  ;;  %v3552_v44 = vsel %vm3548_vm1, %v8922_v36, %v3551_v20  ;;  %v9830_v54 = vld [vmem:[#allocation28_spill] sm:$0xff] }
 0x30c   :  { %v3021_v59 = vsel %vm2900_vm13, %v3020_v29, %v3019_v22  ;;  %v3574_v33 = vshrl.u32 %v3569_v56, 16  ;;  %v3583_v13 = vadd.s32 %v3582_v37, %v3572_v31  ;;  %v3596_v15 = vshrl.u32 %v3591_v63, 16  ;;  %v9831_v29 = vld [vmem:[#allocation30_spill] sm:$0xff] }
 0x30d   :  { %v3024_v61 = vsel %vm8980_vm3, %v8603_v46, %v3021_v59  ;;  %v3605_v9 = vadd.s32 %v3604_v1, %v3594_v34  ;;  %v3370_v10 = vadd.s32 1, %v6363_v51  ;;  %v3025_v24 = vsel %vm8980_vm3, 0, %v3023_v7 }
 0x30e   :  { %v3026_v18 = vmul.f32 %v3024_v61, %v3024_v61  ;;  %v9006_v48 = vadd.s32 %v3583_v13, %v3574_v33  ;;  %v9008_v0 = vadd.s32 %v3599_v53, %v3595_v27  ;;  %v1194_v60 = vmul.f32 1.442695, %v8934_v11  ;;  %v9832_v13 = vld [vmem:[#allocation39_spill] sm:$0xff] }
 0x30f   :  { %v3553_v36 = vsel %vm3547_vm2, %v3550_v21, %v3552_v44  ;;  %v3606_v56 = vadd.s32 %v3605_v9, %v3596_v15  ;;  %vm3371_vm8 = vcmp.gt.s32.totalorder %v3370_v10, 0  ;;  %v9014_v22 = vsub.f32 0.0, %v7576_v50 }
 0x310   :  { %v3027_v63 = vmul.f32 -0.001358992, %v3026_v18  ;;  %v3034_v41 = vmul.f32 -0.00019511016, %v3026_v18  ;;  %vm3609_vm9 = vc.u32 %v9006_v48, %v9008_v0  ;;  %v5549_v7 = vadd.s32 3, %v3025_v24 }
 0x311   :  { %v3610_v39 = vadd.s32 1, %v3606_v56  ;;  %v3367_v27 = vand.u32 8388607, %v3360_v14  ;;  %v3372_v53 = vsel %vm3371_vm8, %v3370_v10, 0  ;;  %v3607_v52 = vmul.u32 %v8901_v19, %v3553_v36  ;;  %v9043_v10 = vpop.permute.xlu2 %379 }
 0x312   :  { %v3028_v11 = vadd.f32 0.041655596, %v3027_v63  ;;  %v3035_v3 = vadd.f32 0.008332121, %v3034_v41  ;;  %v3374_v21 = vand.u32 31, %v3372_v53  ;;  %v9023_v50 = vsub.f32 %v8734_v49, %v7861_v30 }
 0x313   :  { %v3042_v20 = vand.u32 3, %v3025_v24  ;;  %v3611_v26 = vsel %vm3609_vm9, %v3610_v39, %v3606_v56  ;;  %v9027_v31 = vmul.f32 %v9831_v29, %v9830_v54  ;;  %6491 = vpow2.f32 %v1194_v60 }
 0x314   :  { %v3029_v37 = vmul.f32 %v3028_v11, %v3026_v18  ;;  %v3036_v16 = vmul.f32 %v3035_v3, %v3026_v18  ;;  %v3612_v34 = vadd.s32 %v3611_v26, %v3607_v52  ;;  %v5550_v1 = vand.u32 3, %v5549_v7 }
 0x315   :  { %v3368_v51 = vor.u32 8388608, %v3367_v27  ;;  %v9029_v33 = vsub.s32 32, %v3374_v21  ;;  %v9033_v30 = vmul.f32 %v9014_v22, %v9014_v22  ;;  %v9037_v15 = vsub.f32 %v8734_v49, %v9832_v13 }
 0x316   :  { %v3030_v59 = vadd.f32 -0.4999988, %v3029_v37  ;;  %v3037_v44 = vadd.f32 -0.16666654, %v3036_v16  ;;  %v3613_v19 = vadd.s32 536870912, %v3612_v34  ;;  %v9041_v9 = vmul.f32 %v9023_v50, %v9023_v50 }
 0x317   :  { %vm3044_vm10 = vcmp.eq.s32.totalorder %v3042_v20, 0  ;;  %vm3043_vm11 = vcmp.lt.s32.totalorder %v3042_v20, 2  ;;  %vm3047_vm12 = vcmp.eq.s32.totalorder %v3042_v20, 2  ;;  %vm3041_vm13 = vweird.f32 %v8603_v46 }
 0x318   :  { %v3031_v24 = vmul.f32 %v3030_v59, %v3026_v18  ;;  %v3038_v60 = vmul.f32 %v3037_v44, %v3026_v18  ;;  %v9045_v36 = vshrl.u32 %v3613_v19, 30  ;;  %vm5551_vm14 = vcmp.lt.s32.totalorder %v5550_v1, 2 }
 0x319   :  { %vm5552_vm15 = vcmp.eq.s32.totalorder %v5550_v1, 0  ;;  %vm5555_vm0 = vcmp.eq.s32.totalorder %v5550_v1, 2  ;;  %v9048_v49 = vshll.u32 %v3368_v51, 8  ;;  %v3378_v7 = vshrl.u32 %v9763_v32, %v9029_v33  ;;  %v6492_v39 = vpop.eup %6491 }
 0x31a   :  { %v3032_v56 = vadd.f32 1.0, %v3031_v24  ;;  %v3039_v63 = vadd.f32 1.0, %v3038_v60  ;;  %v3615_v41 = vshll.u32 %v9045_v36, 30  ;;  %v9053_v18 = vshrl.u32 %v3372_v53, 5 }
 0x31b   :  { %v3381_v27 = vshrl.u32 %v9764_v57, %v9029_v33  ;;  %v3384_v11 = vshrl.u32 %v9765_v45, %v9029_v33  ;;  %v3387_v3 = vshrl.u32 %v9771_v43, %v9029_v33  ;;  %v3377_v29 = vshll.u32 %v9759_v6, %v3374_v21 }
 0x31c   :  { %v3040_v52 = vmul.f32 %v3039_v63, %v3024_v61  ;;  %v3048_v26 = vxor.u32 2147483648, %v3032_v56  ;;  %v9061_v54 = vsub.s32 %v3612_v34, %v3615_v41  ;;  %v3380_v37 = vshll.u32 %v9763_v32, %v3374_v21  ;;  %v9078_v63 = vpop.permute.xlu2 %400 }
 0x31d   :  { %v3383_v53 = vshll.u32 %v9764_v57, %v3374_v21  ;;  %v3386_v16 = vshll.u32 %v9765_v45, %v3374_v21  ;;  %v3389_v51 = vshll.u32 %v9771_v43, %v3374_v21  ;;  %v3379_v44 = vor.u32 %v3378_v7, %v3377_v29 }
 0x31e   :  { %v3045_v59 = vxor.u32 2147483648, %v3040_v52  ;;  %vm3617_vm1 = vcmp.lt.s32.totalorder %v9061_v54, 0  ;;  %v3390_v61 = vshrl.u32 %v9757_v2, %v9029_v33  ;;  %v3618_v34 = vsub.s32 0, %v9061_v54 }
 0x31f   :  { %v3382_v19 = vor.u32 %v3381_v27, %v3380_v37  ;;  %v3385_v13 = vor.u32 %v3384_v11, %v3383_v53  ;;  %v3388_v24 = vor.u32 %v3387_v3, %v3386_v16  ;;  %v3049_v57 = vsel %vm3047_vm12, %v3048_v26, %v3040_v52 }
 0x320   :  { %v3046_v32 = vsel %vm3044_vm10, %v3032_v56, %v3045_v59  ;;  %v5554_v45 = vsel %vm5552_vm15, %v3032_v56, %v3045_v59  ;;  %v5557_v43 = vsel %vm5555_vm0, %v3048_v26, %v3040_v52  ;;  %v3619_v2 = vsel %vm3617_vm1, %v3618_v34, %v9061_v54 }
 0x321   :  { %v3050_v21 = vsel %vm3043_vm11, %v3046_v32, %v3049_v57  ;;  %v5558_v60 = vsel %vm5551_vm14, %v5554_v45, %v5557_v43  ;;  %vm3392_vm2 = vcmp.lt.s32.totalorder %v9053_v18, 1  ;;  %v3620_v27 = vclz %v3619_v2 }
 0x322   :  { %v3051_v41 = vsel %vm3041_vm13, nan, %v3050_v21  ;;  %v5559_v7 = vsel %vm3041_vm13, nan, %v5558_v60  ;;  %v3391_v56 = vor.u32 %v3390_v61, %v3389_v51  ;;  %vm3395_vm3 = vcmp.lt.s32.totalorder %v9053_v18, 4 }
 0x323   :  { %v3679_v11 = vmul.f32 %v6492_v39, %v3051_v41  ;;  %v6191_v3 = vmul.f32 %v6492_v39, %v5559_v7  ;;  %v3400_v20 = vsel %vm3392_vm2, %v3379_v44, %v3382_v19  ;;  %v3608_v1 = vadd.s32 %v9008_v0, %v9006_v48 }
 0x324   :  { %v6367_v52 = vadd.s32 4294967294, %v3620_v27  ;;  %vm3394_vm4 = vcmp.lt.s32.totalorder %v9053_v18, 3  ;;  %v3401_v26 = vsel %vm3395_vm3, %v3388_v24, 920167782  ;;  %vm3393_vm5 = vcmp.lt.s32.totalorder %v9053_v18, 2  ;;  %v9843_v18 = vld [vmem:[#allocation35_spill] sm:$0xff] }
 0x325   :  { %3695 = vst [vmem:[#allocation16 + $0x2c] sm:$0xf] %v3679_v11  ;;  %v3402_v46 = vsel %vm3394_vm4, %v3385_v13, %v3401_v26  ;;  %v3404_v39 = vsel %vm3392_vm2, %v3382_v19, %v3385_v13  ;;  %v3409_v29 = vand.u32 65535, %v9048_v49  ;;  %v3405_v0 = vsel %vm3395_vm3, %v3391_v56, 1326507024  ;;  %v9117_v11 = vpop.permute.xlu2 %421 }
 0x326   :  { %6207 = vst [vmem:[#allocation17 + $0x2c] sm:$0xf] %v6191_v3  ;;  %vm6368_vm6 = vcmp.lt.s32.totalorder %v6367_v52, 0  ;;  %v3403_v48 = vsel %vm3393_vm5, %v3400_v20, %v3402_v46  ;;  %v3410_v37 = vshrl.u32 %v9048_v49, 16  ;;  %v3406_v16 = vsel %vm3394_vm4, %v3388_v24, %v3405_v0 }
 0x327   :  { %v3623_v53 = vsel %vm6368_vm6, 0, %v6367_v52  ;;  %v3433_v51 = vand.u32 65535, %v3403_v48  ;;  %v3434_v59 = vshrl.u32 %v3403_v48, 16  ;;  %v3376_v32 = vshrl.u32 %v9759_v6, %v9029_v33 }
 0x328   :  { %v3624_v61 = vsub.s32 32, %v3623_v53  ;;  %v3628_v34 = vsub.s32 4294967266, %v3623_v53  ;;  %v3407_v57 = vsel %vm3393_vm5, %v3404_v39, %v3406_v16  ;;  %v3397_v45 = vsel %vm3395_vm3, %v3385_v13, 2102212464 }
 0x329   :  { %v3411_v43 = vand.u32 65535, %v3407_v57  ;;  %v3412_v21 = vshrl.u32 %v3407_v57, 16  ;;  %v3436_v60 = vmul.u32 %v3434_v59, %v3409_v29  ;;  %v3625_v2 = vshll.u32 %v9061_v54, %v3623_v53 }
 0x32a   :  { %v3626_v41 = vshrl.u32 %v3608_v1, %v3624_v61  ;;  %v3629_v24 = vadd.s32 127, %v3628_v34  ;;  %v3437_v7 = vmul.u32 %v3433_v51, %v3410_v37  ;;  %v3638_v27 = vsub.s32 4, %v9045_v36 }
 0x32b   :  { %v3396_v56 = vsel %vm3392_vm2, %v3376_v32, %v3379_v44  ;;  %v3414_v6 = vmul.u32 %v3412_v21, %v3409_v29  ;;  %v3415_v33 = vmul.u32 %v3411_v43, %v3410_v37  ;;  %v3398_v13 = vsel %vm3394_vm4, %v3382_v19, %v3397_v45 }
 0x32c   :  { %v3627_v3 = vor.u32 %v3626_v41, %v3625_v2  ;;  %v3630_v20 = vshll.u32 %v3629_v24, 23  ;;  %v3439_v52 = vshll.u32 %v3436_v60, 16  ;;  %vm3516_vm7 = vcmp.lt.s32.totalorder %v8815_v58, 0 }
 0x32d   :  { %v3413_v54 = vmul.u32 %v3411_v43, %v3409_v29  ;;  %v3417_v1 = vshll.u32 %v3414_v6, 16  ;;  %v3435_v26 = vmul.u32 %v3433_v51, %v3409_v29  ;;  %v3438_v46 = vmul.u32 %v3434_v59, %v3410_v37 }
 0x32e   :  { %v9833_v39 = vand.u32 2147483647, %v8815_v58  ;;  %v3631_v48 = vor.u32 4788187, %v3630_v20  ;;  %v3416_v0 = vmul.u32 %v3412_v21, %v3410_v37  ;;  %v3419_v53 = vshll.u32 %v3415_v33, 16 }
 0x32f   :  { %v3441_v16 = vshll.u32 %v3437_v7, 16  ;;  %vm3421_vm9 = vc.u32 %v3413_v54, %v3417_v1  ;;  %v3423_v61 = vadd.s32 %v3417_v1, %v3413_v54  ;;  %vm3443_vm10 = vc.u32 %v3435_v26, %v3439_v52  ;;  %v9837_v54 = vld [vmem:[#allocation42_spill] sm:$0xff] }
 0x330   :  { %vm9124_vm8 = vcmp.le.f32.partialorder %v9833_v39, 0.7853982  ;;  %v3445_v19 = vadd.s32 %v3439_v52, %v3435_v26  ;;  %v3632_v34 = vand.u32 2147483647, %v3631_v48  ;;  %v3634_v32 = vcvt.s32.f32 %v3627_v3  ;;  %v9838_v26 = vld [vmem:[#allocation29_spill] sm:$0xff] }
 0x331   :  { %v3422_v57 = vsel %vm3421_vm9, 1, %v9761_v55  ;;  %v3444_v29 = vsel %vm3443_vm10, 1, %v9761_v55  ;;  %vm3425_vm11 = vc.u32 %v3423_v61, %v3419_v53  ;;  %v3440_v37 = vshrl.u32 %v3436_v60, 16 }
 0x332   :  { %v3424_v51 = vadd.s32 %v3422_v57, %v3416_v0  ;;  %v3446_v59 = vadd.s32 %v3444_v29, %v3438_v46  ;;  %vm3447_vm12 = vc.u32 %v3445_v19, %v3441_v16  ;;  %v3635_v45 = vmul.f32 %v3634_v32, %v3632_v34  ;;  %v9839_v46 = vld [vmem:[#allocation32_spill] sm:$0xff]  ;;  %v9842_v57 = vld [vmem:[#allocation34_spill] sm:$0xff] }
 0x333   :  { %v3426_v43 = vsel %vm3425_vm11, 1, %v9761_v55  ;;  %v3448_v21 = vsel %vm3447_vm12, 1, %v9761_v55  ;;  %v3418_v2 = vshrl.u32 %v3414_v6, 16  ;;  %v9134_v3 = vmul.f32 %v8853_v25, %v8595_v38  ;;  %v443_v6 = vpop.permute.xlu2 %442 }
 0x334   :  { %v3428_v41 = vadd.s32 %v3426_v43, %v3424_v51  ;;  %v3450_v24 = vadd.s32 %v3448_v21, %v3446_v59  ;;  %v3636_v20 = vxor.u32 2147483648, %v3635_v45  ;;  %v3420_v52 = vshrl.u32 %v3415_v33, 16  ;;  %v9846_v21 = vld [vmem:[#allocation41_spill] sm:$0xff] }
 0x335   :  { %9836 = vst [vmem:[#allocation43_spill] sm:$0xff] %v9134_v3  ;;  %v9138_v1 = vmul.f32 %v8061_v62, %v9837_v54  ;;  %v9142_v39 = vmul.f32 %v9839_v46, %v9838_v26  ;;  %v3442_v48 = vshrl.u32 %v3437_v7, 16  ;;  %v9732_v0 = vsub.f32 0.0, %v8859_v35  ;;  %v9847_v54 = vld [vmem:[#allocation38_spill] sm:$0xff]  ;;  %v9848_v46 = vld [vmem:[#allocation45_spill] sm:$0xff] }
 0x336   :  { %v3429_v60 = vadd.s32 %v3428_v41, %v3418_v2  ;;  %v3451_v55 = vadd.s32 %v3450_v24, %v3440_v37  ;;  %v3637_v38 = vsel %vm3516_vm7, %v3636_v20, %v3635_v45  ;;  %v3399_v25 = vsel %vm3393_vm5, %v3396_v56, %v3398_v13  ;;  %v9845_v13 = vld [vmem:[#allocation37_spill] sm:$0xff]  ;;  %v6515_v37 = vld [vmem:[%s9672_s4] ss:$0 sm:$0xff]  ;;  %s6257_s4 = sshll.u32 %s9677_s9, 4  ;;  %s6258_s4 = int_to_ptr.hbm [resolvable:$true] %s6257_s4 }
 0x337   :  { %v9149_v33 = vadd.s32 %v3445_v19, %v3441_v16  ;;  %v9152_v62 = vmul.f32 %v9134_v3, %v443_v6  ;;  %v3640_v53 = vsel %vm9124_vm8, %v8815_v58, %v3637_v38  ;;  %v9161_v34 = vmul.f32 %v9732_v0, %v443_v6  ;;  %v9866_v3 = vld [vmem:[#allocation36_spill] sm:$0xff] }
 0x338   :  { %v9157_v7 = vadd.s32 %v3429_v60, %v3420_v52  ;;  %v3452_v61 = vadd.s32 %v3451_v55, %v3442_v48  ;;  %v3642_v32 = vmul.f32 %v3640_v53, %v3640_v53  ;;  %v9165_v56 = vmul.f32 %v9843_v18, %v9842_v57  ;;  %v9849_v57 = vld [vmem:[#allocation27_spill] sm:$0xff] }
 0x339   :  { %9840 = vst [vmem:[#allocation28_spill] sm:$0xff] %v9152_v62  ;;  %v9168_v16 = vsub.f32 0.0, %v9845_v13  ;;  %v635_v19 = vadd.f32 %v9041_v9, %v9033_v30  ;;  %v3453_v45 = vmul.u32 %v9048_v49, %v3399_v25  ;;  %v623_v43 = vmul.f32 %v9037_v15, %v9037_v15 }
 0x33a   :  { %9841 = vst [vmem:[#allocation30_spill] sm:$0xff] %v9161_v34  ;;  %vm3455_vm13 = vc.u32 %v9157_v7, %v9149_v33  ;;  %v3456_v29 = vadd.s32 1, %v3452_v61  ;;  %v3643_v51 = vmul.f32 -0.001358992, %v3642_v32  ;;  %v3650_v59 = vmul.f32 -0.00019511016, %v3642_v32 }
 0x33b   :  { %9844 = vst [vmem:[#allocation39_spill] sm:$0xff] %v9165_v56  ;;  %v9181_v2 = vsub.f32 %v6515_v37, %v9846_v21  ;;  %v3639_v30 = vsel %vm3516_vm7, %v3638_v27, %v9045_v36  ;;  %v9190_v20 = vmul.f32 %v8367_v17, %v7864_v28  ;;  %v607_v52 = vmul.f32 %v9168_v16, %v9168_v16 }
 0x33c   :  { %v3457_v9 = vsel %vm3455_vm13, %v3456_v29, %v3452_v61  ;;  %v3644_v41 = vadd.f32 0.041655596, %v3643_v51  ;;  %v3651_v24 = vadd.f32 0.008332121, %v3650_v59  ;;  %v9195_v26 = vsub.f32 0.0, %v9847_v54  ;;  %v9214_v59 = vpop.permute.xlu1 %351 }
 0x33d   :  { %v3458_v49 = vadd.s32 %v3457_v9, %v3453_v45  ;;  %v1155_v60 = vmul.f32 %v8754_v12, %v9848_v46  ;;  %6493 = vrcp.f32 %v635_v19  ;;  %v3641_v36 = vsel %vm9124_vm8, 0, %v3639_v30  ;;  %v6516_v45 = vld [vmem:[%s9673_s5] ss:$0 sm:$0xff]  ;;  %s6784_s5 = smov [#allocation17]  }
 0x33e   :  { %v3645_v27 = vmul.f32 %v3644_v41, %v3642_v32  ;;  %v3652_v48 = vmul.f32 %v3651_v24, %v3642_v32  ;;  %v626_v28 = vmul.f32 %v9181_v2, %v9181_v2  ;;  %v9204_v17 = vsub.f32 %v6515_v37, %v8930_v47  ;;  %v9224_v24 = vpop.permute.xlu0 %344  ;;  %v9850_v46 = vld [vmem:[#allocation26_spill] sm:$0xff]  ;;  %s9464_s3 = sshll.u32 %s6784_s5, 4  ;;  %s6268_s5 = sshll.u32 %s6789_s2, 4  ;;  %s6282_s3 = int_to_ptr.vmem [resolvable:$true] %s9464_s3  ;;  %s6269_s5 = int_to_ptr.vmem [resolvable:$true] %s6268_s5 }
 0x33f   :  { %v3459_v55 = vadd.s32 536870912, %v3458_v49  ;;  %v639_v6 = vadd.f32 %v623_v43, %v607_v52  ;;  %v9209_v12 = vsub.f32 0.0, %v9849_v57  ;;  %v610_v44 = vmul.f32 %v9195_v26, %v9195_v26 }
 0x340   :  { %v3646_v38 = vadd.f32 -0.4999988, %v3645_v27  ;;  %v3653_v25 = vadd.f32 -0.16666654, %v3652_v48  ;;  %v1202_v18 = vmul.f32 1.442695, %v1155_v60  ;;  %v1154_v43 = vmul.f32 %v6516_v45, %v9849_v57 }
 0x341   :  { %v9206_v61 = vshrl.u32 %v3459_v55, 30  ;;  %v6169_v13 = vadd.s32 3, %v3641_v36  ;;  %v642_v37 = vadd.f32 %v626_v28, %v610_v44  ;;  %v3658_v21 = vand.u32 3, %v3641_v36 }
 0x342   :  { %v3647_v19 = vmul.f32 %v3646_v38, %v3642_v32  ;;  %v3654_v29 = vmul.f32 %v3653_v25, %v3642_v32  ;;  %v627_v30 = vmul.f32 %v9204_v17, %v9204_v17  ;;  %6495 = vrcp.f32 %v639_v6 }
 0x343   :  { %v3461_v51 = vshll.u32 %v9206_v61, 30  ;;  %v6494_v47 = vpop.eup %6493  ;;  %v611_v52 = vmul.f32 %v9209_v12, %v9209_v12  ;;  %6497 = vpow2.f32 %v1202_v18  ;;  %v6170_v54 = vand.u32 3, %v6169_v13 }
 0x344   :  { %v3648_v9 = vadd.f32 1.0, %v3647_v19  ;;  %v3655_v41 = vadd.f32 1.0, %v3654_v29  ;;  %v9230_v60 = vmul.f32 %v8638_v40, %v9850_v46  ;;  %6499 = vrcp.f32 %v642_v37  ;;  %v373_v37 = vpop.permute.xlu1 %372 }
 0x345   :  { %v9222_v32 = vsub.s32 %v3458_v49, %v3461_v51  ;;  %v9235_v49 = vmul.f32 %v6494_v47, %v9023_v50  ;;  %vm3659_vm15 = vcmp.lt.s32.totalorder %v3658_v21, 2  ;;  %v643_v55 = vadd.f32 %v627_v30, %v611_v52 }
 0x346   :  { %v3656_v36 = vmul.f32 %v3655_v41, %v3640_v53  ;;  %v3664_v27 = vxor.u32 2147483648, %v3648_v9  ;;  %vm3660_vm0 = vcmp.eq.s32.totalorder %v3658_v21, 0  ;;  %vm3663_vm1 = vcmp.eq.s32.totalorder %v3658_v21, 2  ;;  %v9248_v21 = vpop.permute.xlu0 %365 }
 0x347   :  { %vm3463_vm14 = vcmp.lt.s32.totalorder %v9222_v32, 0  ;;  %v3464_v48 = vsub.s32 0, %v9222_v32  ;;  %9851 = vst [vmem:[#allocation42_spill] sm:$0xff] %v9235_v49  ;;  %vm6171_vm2 = vcmp.lt.s32.totalorder %v6170_v54, 2  ;;  %vm6172_vm3 = vcmp.eq.s32.totalorder %v6170_v54, 0 }
 0x348   :  { %v3661_v28 = vxor.u32 2147483648, %v3656_v36  ;;  %vm6175_vm4 = vcmp.eq.s32.totalorder %v6170_v54, 2  ;;  %v9238_v53 = vpop.eup %6495  ;;  %v3665_v25 = vsel %vm3663_vm1, %v3664_v27, %v3656_v36  ;;  %vm3657_vm5 = vweird.f32 %v8815_v58  ;;  %v9852_v54 = vld [vmem:[#allocation40_spill] sm:$0xff] }
 0x349   :  { %v3465_v6 = vsel %vm3463_vm14, %v3464_v48, %v9222_v32  ;;  %v6177_v44 = vsel %vm6175_vm4, %v3664_v27, %v3656_v36  ;;  %v6498_v18 = vpop.eup %6497  ;;  %v1200_v29 = vmul.f32 1.442695, %v1154_v43  ;;  %6501 = vrcp.f32 %v643_v55 }
 0x34a   :  { %v3466_v40 = vclz %v3465_v6  ;;  %v3662_v38 = vsel %vm3660_vm0, %v3648_v9, %v3661_v28  ;;  %v6174_v57 = vsel %vm6172_vm3, %v3648_v9, %v3661_v28  ;;  %v9242_v30 = vpop.eup %6499  ;;  %v9735_v9 = vsub.f32 0.0, %v9852_v54 }
 0x34b   :  { %v3666_v50 = vsel %vm3659_vm15, %v3662_v38, %v3665_v25  ;;  %v6178_v13 = vsel %vm6171_vm2, %v6174_v57, %v6177_v44  ;;  %v9246_v46 = vmul.f32 %v6494_v47, %v9014_v22  ;;  %v9733_v36 = vsub.f32 0.0, %v9235_v49  ;;  %v9854_v47 = vld [vmem:[#allocation54_spill] sm:$0xff]  ;;  %v9855_v25 = vld [vmem:[#allocation44_spill] sm:$0xff] }
 0x34c   :  { %v6364_v19 = vadd.s32 4294967294, %v3466_v40  ;;  %v3667_v51 = vsel %vm3657_vm5, nan, %v3666_v50  ;;  %v6179_v45 = vsel %vm3657_vm5, nan, %v6178_v13  ;;  %v3454_v43 = vadd.s32 %v9149_v33, %v9157_v7  ;;  %v9856_v57 = vld [vmem:[#allocation50_spill] sm:$0xff] }
 0x34d   :  { %v3683_v41 = vmul.f32 %v6498_v18, %v3667_v51  ;;  %v6195_v52 = vmul.f32 %v6498_v18, %v6179_v45  ;;  %9853 = vst [vmem:[#allocation29_spill] sm:$0xff] %v9246_v46  ;;  %6503 = vpow2.f32 %v1200_v29  ;;  %v9255_v55 = vmul.f32 %v9238_v53, %v9037_v15  ;;  %v9857_v44 = vld [vmem:[#allocation46_spill] sm:$0xff] }
 0x34e   :  { %vm6365_vm6 = vcmp.lt.s32.totalorder %v6364_v19, 0  ;;  %v9259_v22 = vmul.f32 %v9242_v30, %v9181_v2  ;;  %v9734_v28 = vsub.f32 0.0, %v9854_v47  ;;  %v9736_v33 = vsub.f32 0.0, %v9855_v25 }
 0x34f   :  { %v3469_v58 = vsel %vm6365_vm6, 0, %v6364_v19  ;;  %3699 = vst [vmem:[#allocation16 + $0x3c] sm:$0xf] %v3683_v41  ;;  %v9264_v7 = vpop.eup %6501  ;;  %v9268_v18 = vmul.f32 %v9857_v44, %v9856_v57  ;;  %v9273_v15 = vmul.f32 %v9735_v9, %v9856_v57  ;;  %v9277_v2 = vmul.f32 %v9246_v46, %v9043_v10  ;;  %v394_v57 = vpop.permute.xlu1 %393 }
 0x350   :  { %v3470_v27 = vsub.s32 32, %v3469_v58  ;;  %v3474_v48 = vsub.s32 4294967266, %v3469_v58  ;;  %6211 = vst [vmem:[#allocation17 + $0x3c] sm:$0xf] %v6195_v52  ;;  %v3471_v6 = vshll.u32 %v9222_v32, %v3469_v58  ;;  %v3484_v32 = vsub.s32 4, %v9206_v61 }
 0x351   :  { %9858 = vst [vmem:[#allocation32_spill] sm:$0xff] %v9277_v2  ;;  %v9283_v50 = vmul.f32 %v9733_v36, %v9043_v10  ;;  %v9287_v13 = vmul.f32 %v8717_v23, %v9078_v63  ;;  %v9292_v51 = vmul.f32 %v9734_v28, %v9078_v63  ;;  %vm9296_vm7 = vcmp.le.f32.partialorder %v3360_v14, 0.7853982  ;;  %v9862_v10 = vld [vmem:[#allocation47_spill] sm:$0xff]  ;;  %v9325_v36 = vpop.permute.xlu0 %386 }
 0x352   :  { %v3472_v40 = vshrl.u32 %v3454_v43, %v3470_v27  ;;  %v3475_v38 = vadd.s32 127, %v3474_v48  ;;  %vm3362_vm8 = vcmp.lt.s32.totalorder %v8950_v4, 0  ;;  %v695_v41 = vsub.f32 0.0, %v9862_v10 }
 0x353   :  { %9859 = vst [vmem:[#allocation34_spill] sm:$0xff] %v9283_v50  ;;  %v9304_v52 = vmul.f32 %v9264_v7, %v9204_v17  ;;  %v9308_v43 = vmul.f32 %v8994_v8, %v9117_v11  ;;  %v9313_v14 = vmul.f32 %v9736_v33, %v9117_v11  ;;  %v9315_v63 = vpop.eup %6503  ;;  %v3485_v27 = vsel %vm3362_vm8, %v3484_v32, %v9206_v61  ;;  %v9865_v33 = vld [vmem:[#allocation33_spill] sm:$0xff] }
 0x354   :  { %v3473_v19 = vor.u32 %v3472_v40, %v3471_v6  ;;  %v3476_v29 = vshll.u32 %v3475_v38, 23  ;;  %v711_v17 = vmul.f32 %v8879_v5, %v9214_v59  ;;  %v759_v48 = vmul.f32 %v695_v41, %v9214_v59  ;;  %v9863_v6 = vld [vmem:[#allocation31_spill] sm:$0xff]  ;;  %v468_v38 = vpop.permute.xlu2 %467  ;;  %v9864_v59 = vld [vmem:[#allocation48_spill] sm:$0xff] }
 0x355   :  { %v9739_v40 = vsub.f32 0.0, %v9863_v6  ;;  %v727_v0 = vmul.f32 %v695_v41, %v468_v38  ;;  %v775_v11 = vmul.f32 %v8879_v5, %v468_v38  ;;  %v9329_v28 = vmul.f32 %v9027_v31, %v9224_v24 }
 0x356   :  { %v3477_v58 = vor.u32 4788187, %v3476_v29  ;;  %v3480_v10 = vcvt.s32.f32 %v3473_v19  ;;  %v698_v32 = vsub.f32 0.0, %v9864_v59  ;;  %vm837_vm9 = vcmask 1043456  }
 0x357   :  { %v9334_v61 = vmul.f32 %v9739_v40, %v9224_v24  ;;  %v3487_v19 = vsel %vm9296_vm7, 0, %v3485_v27  ;;  %v743_v41 = vsub.f32 %v711_v17, %v727_v0  ;;  %v791_v5 = vadd.f32 %v775_v11, %v759_v48  ;;  %v415_v34 = vpop.permute.xlu1 %414 }
 0x358   :  { %v3478_v29 = vand.u32 2147483647, %v3477_v58  ;;  %v714_v58 = vmul.f32 %v9138_v1, %v373_v37  ;;  %v762_v38 = vmul.f32 %v698_v32, %v373_v37  ;;  %v6014_v27 = vadd.s32 3, %v3487_v19 }
 0x359   :  { %807 = vst [vmem:[#allocation10 + $0x8] sm:$0xf] %v743_v41  ;;  %v852_v24 = vsel %vm837_vm9, %v743_v41, 0.0  ;;  %v1003_v59 = vsel %vm837_vm9, %v791_v5, 0.0  ;;  %v9354_v41 = vmul.f32 %v9242_v30, %v9195_v26  ;;  %v408_v40 = vpop.permute.xlu0 %407  ;;  %vm3503_vm0 = vweird.f32 %v8950_v4 }
 0x35a   :  { %v3481_v9 = vmul.f32 %v3480_v10, %v3478_v29  ;;  %v9346_v29 = vmul.f32 %v9238_v53, %v9168_v16  ;;  %823 = vst [vmem:[#allocation11 + $0x8] sm:$0xf] %v791_v5  ;;  %v853_v0 = vrot.slane %v852_v24, 4  ;;  %v1004_v17 = vrot.slane %v1003_v59, 4  ;;  %v9867_v10 = vld [vmem:[#allocation55_spill] sm:$0xff] }
 0x35b   :  { %v9362_v53 = vand.u32 3, %v3487_v19  ;;  %v9368_v11 = vand.u32 3, %v6014_v27  ;;  %v9372_v19 = vmul.f32 %v9264_v7, %v9209_v12  ;;  %v9385_v12 = vmul.f32 %v9190_v20, %v394_v57 }
 0x35c   :  { %v3482_v35 = vxor.u32 2147483648, %v3481_v9  ;;  %v854_v5 = vadd.f32 %v853_v0, %v852_v24  ;;  %v1005_v37 = vadd.f32 %v1004_v17, %v1003_v59  ;;  %v489_v62 = vpop.permute.xlu2 %488  ;;  %v9869_v7 = vsub.f32 0.0, %v9867_v10 }
 0x35d   :  { %v778_v26 = vmul.f32 %v9138_v1, %v489_v62  ;;  %v9868_v1 = vsub.f32 0.0, %v9865_v33  ;;  %vm3509_vm10 = vcmp.eq.s32.totalorder %v9362_v53, 2  ;;  %vm6020_vm11 = vcmp.eq.s32.totalorder %v9368_v11, 2 }
 0x35e   :  { %v3483_v48 = vsel %vm3362_vm8, %v3482_v35, %v3481_v9  ;;  %v730_v9 = vmul.f32 %v698_v32, %v489_v62  ;;  %v855_v45 = vrot.slane %v854_v5, 2  ;;  %v9376_v32 = vmul.f32 %v9142_v39, %v9248_v21 }
 0x35f   :  { %v9360_v16 = vsel %vm9296_vm7, %v8950_v4, %v3483_v48  ;;  %v1006_v48 = vrot.slane %v1005_v37, 2  ;;  %v794_v17 = vadd.f32 %v778_v26, %v762_v38  ;;  %v9381_v62 = vmul.f32 %v9868_v1, %v9248_v21 }
 0x360   :  { %v3488_v35 = vmul.f32 %v9360_v16, %v9360_v16  ;;  %v746_v0 = vsub.f32 %v714_v58, %v730_v9  ;;  %v856_v27 = vadd.f32 %v855_v45, %v854_v5  ;;  %v9389_v58 = vmul.f32 %v9869_v7, %v394_v57 }
 0x361   :  { %v1007_v38 = vadd.f32 %v1006_v48, %v1005_v37  ;;  %v9393_v9 = vmul.f32 %v9165_v56, %v9325_v36  ;;  %826 = vst [vmem:[#allocation11 + $0x14] sm:$0xf] %v794_v17  ;;  %v1024_v5 = vsel %vm837_vm9, %v794_v17, 0.0  ;;  %v9872_v37 = vsub.f32 0.0, %v9866_v3 }
 0x362   :  { %v3489_v24 = vmul.f32 -0.001358992, %v3488_v35  ;;  %v3496_v59 = vmul.f32 -0.00019511016, %v3488_v35  ;;  %9870 = vst [vmem:[#allocation35_spill] sm:$0xff] %v9389_v58  ;;  %v873_v21 = vsel %vm837_vm9, %v746_v0, 0.0  ;;  %v9405_v1 = vmul.f32 %v9230_v60, %v415_v34 }
 0x363   :  { %810 = vst [vmem:[#allocation10 + $0x14] sm:$0xf] %v746_v0  ;;  %v857_v57 = vrot.slane %v856_v27, 1  ;;  %v9402_v48 = vmul.f32 %v9872_v37, %v9325_v36  ;;  %v9874_v0 = vsub.f32 0.0, %v8711_v42  ;;  %vm3506_vm12 = vcmp.eq.s32.totalorder %v9362_v53, 0 }
 0x364   :  { %v3490_v50 = vadd.f32 0.041655596, %v3489_v24  ;;  %v3497_v2 = vadd.f32 0.008332121, %v3496_v59  ;;  %9871 = vst [vmem:[#allocation37_spill] sm:$0xff] %v9393_v9  ;;  %v874_v24 = vrot.slane %v873_v21, 4  ;;  %v719_v36 = vmul.f32 %v9346_v29, %v408_v40 }
 0x365   :  { %v1025_v59 = vrot.slane %v1024_v5, 4  ;;  %9873 = vst [vmem:[#allocation41_spill] sm:$0xff] %v9402_v48  ;;  %v9409_v17 = vmul.f32 %v9874_v0, %v415_v34  ;;  %vm6017_vm13 = vcmp.eq.s32.totalorder %v9368_v11, 0  ;;  %v1008_v3 = vrot.slane %v1007_v38, 1  ;;  %v429_v34 = vpop.permute.xlu0 %428 }
 0x366   :  { %v3491_v26 = vmul.f32 %v3490_v50, %v3488_v35  ;;  %v3498_v45 = vmul.f32 %v3497_v2, %v3488_v35  ;;  %v538_v2 = vpop.permute.xlu2 %537  ;;  %v436_v50 = vpop.permute.xlu1 %435  ;;  %v875_v9 = vadd.f32 %v874_v24, %v873_v21  ;;  %v9875_v37 = vsub.f32 0.0, %v9855_v25 }
 0x367   :  { %v1026_v56 = vadd.f32 %v1025_v59, %v1024_v5  ;;  %v785_v46 = vmul.f32 %v8994_v8, %v538_v2  ;;  %vm3505_vm14 = vcmp.lt.s32.totalorder %v9362_v53, 2  ;;  %vm6016_vm15 = vcmp.lt.s32.totalorder %v9368_v11, 2 }
 0x368   :  { %v3492_v7 = vadd.f32 -0.4999988, %v3491_v26  ;;  %v3499_v30 = vadd.f32 -0.16666654, %v3498_v45  ;;  %v737_v48 = vmul.f32 %v9875_v37, %v538_v2  ;;  %v876_v21 = vrot.slane %v875_v9, 2 }
 0x369   :  { %v1027_v5 = vrot.slane %v1026_v56, 2  ;;  %v9420_v26 = vadd.f32 %v857_v57, %v856_v27  ;;  %v9876_v45 = vsub.f32 0.0, %v9255_v55  ;;  %v801_v8 = vadd.f32 %v785_v46, %v9313_v14 }
 0x36a   :  { %v3493_v0 = vmul.f32 %v3492_v7, %v3488_v35  ;;  %v3500_v49 = vmul.f32 %v3499_v30, %v3488_v35  ;;  %v753_v25 = vsub.f32 %v9308_v43, %v737_v48  ;;  %v877_v35 = vadd.f32 %v876_v21, %v875_v9 }
 0x36b   :  { %v767_v24 = vmul.f32 %v9876_v45, %v408_v40  ;;  %v1028_v30 = vadd.f32 %v1027_v5, %v1026_v56  ;;  %v9426_v7 = vadd.f32 %v1008_v3, %v1007_v38  ;;  %v1073_v58 = vsel %vm837_vm9, %v801_v8, 0.0  ;;  %833 = vst [vmem:[#allocation11 + $0x30] sm:$0xf] %v801_v8 }
 0x36c   :  { %v3494_v59 = vadd.f32 1.0, %v3493_v0  ;;  %v3501_v2 = vadd.f32 1.0, %v3500_v49  ;;  %817 = vst [vmem:[#allocation10 + $0x30] sm:$0xf] %v753_v25  ;;  %v922_v37 = vsel %vm837_vm9, %v753_v25, 0.0  ;;  %v9431_v27 = vmul.f32 %v9372_v19, %v436_v50 }
 0x36d   :  { %9877 = vst [vmem:[#allocation38_spill] sm:$0xff] %v9426_v7  ;;  %v878_v43 = vrot.slane %v877_v35, 1  ;;  %v9879_v46 = vsub.f32 0.0, %v9304_v52  ;;  %v923_v56 = vrot.slane %v922_v37, 4  ;;  %v1074_v3 = vrot.slane %v1073_v58, 4 }
 0x36e   :  { %9878 = vst [vmem:[#allocation45_spill] sm:$0xff] %v9431_v27  ;;  %v3502_v40 = vmul.f32 %v3501_v2, %v9360_v16  ;;  %v3510_v57 = vxor.u32 2147483648, %v3494_v59  ;;  %v9439_v14 = vmul.f32 %v9354_v41, %v429_v34  ;;  %v9881_v38 = vsub.f32 0.0, %v9259_v22  ;;  %v524_v48 = vpop.permute.xlu2 %523  ;;  %v461_v0 = vpop.permute.xlu1 %460 }
 0x36f   :  { %v9436_v49 = vmul.f32 %v9879_v46, %v436_v50  ;;  %v1029_v50 = vrot.slane %v1028_v30, 1  ;;  %v9449_v45 = vadd.f32 %v878_v43, %v877_v35  ;;  %v924_v25 = vadd.f32 %v923_v56, %v922_v37 }
 0x370   :  { %v9443_v9 = vmul.f32 %v9881_v38, %v429_v34  ;;  %v3507_v21 = vxor.u32 2147483648, %v3502_v40  ;;  %v3511_v16 = vsel %vm3509_vm10, %v3510_v57, %v3502_v40  ;;  %v6022_v5 = vsel %vm6020_vm11, %v3510_v57, %v3502_v40  ;;  %v454_v40 = vpop.permute.xlu0 %453 }
 0x371   :  { %9880 = vst [vmem:[#allocation27_spill] sm:$0xff] %v9436_v49  ;;  %v1075_v8 = vadd.f32 %v1074_v3, %v1073_v58  ;;  %v9882_v2 = vsub.f32 0.0, %v9255_v55  ;;  %v783_v7 = vmul.f32 %v9346_v29, %v524_v48  ;;  %v9883_v49 = vsub.f32 0.0, %v9863_v6 }
 0x372   :  { %v3508_v34 = vsel %vm3506_vm12, %v3494_v59, %v3507_v21  ;;  %v6019_v38 = vsel %vm6017_vm13, %v3494_v59, %v3507_v21  ;;  %v925_v37 = vrot.slane %v924_v25, 2  ;;  %v774_v21 = vmul.f32 %v9027_v31, %v461_v0 }
 0x373   :  { %v735_v46 = vmul.f32 %v9882_v2, %v524_v48  ;;  %v726_v27 = vmul.f32 %v9883_v49, %v461_v0  ;;  %v3512_v35 = vsel %vm3505_vm14, %v3508_v34, %v3511_v16  ;;  %v6023_v58 = vsel %vm6016_vm15, %v6019_v38, %v6022_v5 }
 0x374   :  { %v1076_v55 = vrot.slane %v1075_v8, 2  ;;  %v3513_v6 = vsel %vm3503_vm0, nan, %v3512_v35  ;;  %v6024_v29 = vsel %vm3503_vm0, nan, %v6023_v58  ;;  %v799_v11 = vadd.f32 %v783_v7, %v767_v24 }
 0x375   :  { %v751_v53 = vsub.f32 %v719_v36, %v735_v46  ;;  %v3682_v59 = vmul.f32 %v9315_v63, %v3513_v6  ;;  %v6194_v57 = vmul.f32 %v9315_v63, %v6024_v29  ;;  %v926_v43 = vadd.f32 %v925_v37, %v924_v25 }
 0x376   :  { %v1077_v49 = vadd.f32 %v1076_v55, %v1075_v8  ;;  %v1059_v3 = vsel %vm837_vm9, %v799_v11, 0.0  ;;  %v742_v48 = vsub.f32 %v9329_v28, %v726_v27  ;;  %v9480_v4 = vadd.f32 %v1029_v50, %v1028_v30  ;;  %v531_v27 = vpop.permute.xlu2 %530  ;;  %831 = vst [vmem:[#allocation11 + $0x28] sm:$0xf] %v799_v11  ;;  %v482_v6 = vpop.permute.xlu1 %481 }
 0x377   :  { %815 = vst [vmem:[#allocation10 + $0x28] sm:$0xf] %v751_v53  ;;  %v908_v56 = vsel %vm837_vm9, %v751_v53, 0.0  ;;  %v927_v36 = vrot.slane %v926_v43, 1  ;;  %v1060_v7 = vrot.slane %v1059_v3, 4  ;;  %v790_v63 = vadd.f32 %v774_v21, %v9334_v61 }
 0x378   :  { %3698 = vst [vmem:[#allocation16 + $0x38] sm:$0xf] %v3682_v59  ;;  %v909_v24 = vrot.slane %v908_v56, 4  ;;  %v845_v16 = vsel %vm837_vm9, %v742_v48, 0.0  ;;  %v9884_v5 = vsub.f32 0.0, %v9852_v54  ;;  %v773_v28 = vmul.f32 %v9857_v44, %v454_v40  ;;  %v475_v11 = vpop.permute.xlu0 %474 }
 0x379   :  { %6210 = vst [vmem:[#allocation17 + $0x38] sm:$0xf] %v6194_v57  ;;  %v9487_v31 = vadd.f32 %v927_v36, %v926_v43  ;;  %v1078_v0 = vrot.slane %v1077_v49, 1  ;;  %v1061_v50 = vadd.f32 %v1060_v7, %v1059_v3  ;;  %v846_v61 = vrot.slane %v845_v16, 4 }
 0x37a   :  { %v725_v25 = vmul.f32 %v9884_v5, %v454_v40  ;;  %v910_v30 = vadd.f32 %v909_v24, %v908_v56  ;;  %6289 = dma.vmem_to_hbm [thread:$0]  %s6282_s3, 1024, %s6284_s19, [#allocation18], %s6772_s25, %s6772_s25, %s6773_s26   ;;  %806 = vst [vmem:[#allocation10 + $0x4] sm:$0xf] %v742_v48  ;;  %v996_v8 = vsel %vm837_vm9, %v790_v63, 0.0  ;;  %v789_v2 = vadd.f32 %v773_v28, %v9273_v15 }
 0x37b   :  { %v1062_v46 = vrot.slane %v1061_v50, 2  ;;  %822 = vst [vmem:[#allocation11 + $0x4] sm:$0xf] %v790_v63  ;;  %v997_v34 = vrot.slane %v996_v8, 4  ;;  %v9885_v38 = vsub.f32 0.0, %v8711_v42  ;;  %v847_v58 = vadd.f32 %v846_v61, %v845_v16 }
 0x37c   :  { %v741_v54 = vsub.f32 %v9268_v18, %v725_v25  ;;  %v911_v44 = vrot.slane %v910_v30, 2  ;;  %v989_v55 = vsel %vm837_vm9, %v789_v2, 0.0  ;;  %v784_v40 = vmul.f32 %v9230_v60, %v531_v27  ;;  %821 = vst [vmem:[#allocation11] sm:$0xf] %v789_v2 }
 0x37d   :  { %v736_v35 = vmul.f32 %v9885_v38, %v531_v27  ;;  %v1063_v18 = vadd.f32 %v1062_v46, %v1061_v50  ;;  %v998_v53 = vadd.f32 %v997_v34, %v996_v8  ;;  %v848_v59 = vrot.slane %v847_v58, 2 }
 0x37e   :  { %805 = vst [vmem:[#allocation10] sm:$0xf] %v741_v54  ;;  %v838_v37 = vsel %vm837_vm9, %v741_v54, 0.0  ;;  %v912_v29 = vadd.f32 %v911_v44, %v910_v30  ;;  %vm966_vm1 = vcmask 1041409   ;;  %v990_v57 = vrot.slane %v989_v55, 4 }
 0x37f   :  { %v839_v15 = vrot.slane %v838_v37, 4  ;;  %v752_v42 = vsub.f32 %v9405_v1, %v736_v35  ;;  %v800_v43 = vadd.f32 %v784_v40, %v9409_v17  ;;  %v1064_v3 = vrot.slane %v1063_v18, 1 }
 0x380   :  { %v913_v56 = vrot.slane %v912_v29, 1  ;;  %v999_v48 = vrot.slane %v998_v53, 2  ;;  %v849_v36 = vadd.f32 %v848_v59, %v847_v58  ;;  %v991_v60 = vadd.f32 %v990_v57, %v989_v55 }
 0x381   :  { %v840_v21 = vadd.f32 %v839_v15, %v838_v37  ;;  %816 = vst [vmem:[#allocation10 + $0x2c] sm:$0xf] %v752_v42  ;;  %v915_v24 = vsel %vm837_vm9, %v752_v42, 0.0  ;;  %v1066_v7 = vsel %vm837_vm9, %v800_v43, 0.0  ;;  %v9504_v63 = vadd.f32 %v1078_v0, %v1077_v49  ;;  %v9887_v42 = vld [vmem:[#allocation49_spill] sm:$0xff] }
 0x382   :  { %v9506_v16 = vadd.f32 %v913_v56, %v912_v29  ;;  %v1000_v5 = vadd.f32 %v999_v48, %v998_v53  ;;  %832 = vst [vmem:[#allocation11 + $0x2c] sm:$0xf] %v800_v43  ;;  %v850_v1 = vrot.slane %v849_v36, 1  ;;  %v992_v17 = vrot.slane %v991_v60, 2  ;;  %v517_v29 = vpop.permute.xlu1 %516 }
 0x383   :  { %v841_v25 = vrot.slane %v840_v21, 2  ;;  %v916_v28 = vrot.slane %v915_v24, 4  ;;  %v1067_v27 = vrot.slane %v1066_v7, 4  ;;  %v9886_v61 = vsub.f32 0.0, %v9865_v33 }
 0x384   :  { %v1001_v30 = vrot.slane %v1000_v5, 1  ;;  %v777_v54 = vmul.f32 %v9142_v39, %v482_v6  ;;  %v9511_v2 = vadd.f32 %v1064_v3, %v1063_v18  ;;  %v993_v49 = vadd.f32 %v992_v17, %v991_v60  ;;  %v510_v18 = vpop.permute.xlu0 %509  ;;  %v9889_v3 = vld [vmem:[#allocation51_spill] sm:$0xff]  ;;  %v9891_v17 = vld [vmem:[#allocation53_spill] sm:$0xff] }
 0x385   :  { %v842_v50 = vadd.f32 %v841_v25, %v840_v21  ;;  %v729_v8 = vmul.f32 %v9886_v61, %v482_v6  ;;  %v917_v0 = vadd.f32 %v916_v28, %v915_v24  ;;  %v1068_v44 = vadd.f32 %v1067_v27, %v1066_v7  ;;  %v9890_v25 = vld [vmem:[#allocation52_spill] sm:$0xff] }
 0x386   :  { %v851_v46 = vadd.f32 %v850_v1, %v849_v36  ;;  %v793_v35 = vadd.f32 %v777_v54, %v9381_v62  ;;  %v1002_v58 = vadd.f32 %v1001_v30, %v1000_v5  ;;  %v994_v37 = vrot.slane %v993_v49, 1 }
 0x387   :  { %v843_v34 = vrot.slane %v842_v50, 1  ;;  %v745_v38 = vsub.f32 %v9376_v32, %v729_v8  ;;  %v918_v55 = vrot.slane %v917_v0, 2  ;;  %v1069_v40 = vrot.slane %v1068_v44, 2 }
 0x388   :  { %v1017_v6 = vsel %vm837_vm9, %v793_v35, 0.0  ;;  %vm968_vm2 = vcmask 1042434   ;;  %v995_v53 = vadd.f32 %v994_v37, %v993_v49  ;;  %825 = vst [vmem:[#allocation11 + $0x10] sm:$0xf] %v793_v35  ;;  %v9888_v43 = vsub.f32 0.0, %v9887_v42 }
 0x389   :  { %v844_v33 = vadd.f32 %v843_v34, %v842_v50  ;;  %809 = vst [vmem:[#allocation10 + $0x10] sm:$0xf] %v745_v38  ;;  %v866_v39 = vsel %vm837_vm9, %v745_v38, 0.0  ;;  %v919_v15 = vadd.f32 %v918_v55, %v917_v0  ;;  %v1070_v59 = vadd.f32 %v1069_v40, %v1068_v44 }
 0x38a   :  { %v867_v32 = vrot.slane %v866_v39, 4  ;;  %v1018_v57 = vrot.slane %v1017_v6, 4  ;;  %v728_v56 = vmul.f32 %v9888_v43, %v475_v11  ;;  %v776_v48 = vmul.f32 %v9889_v3, %v475_v11 }
 0x38b   :  { %v967_v62 = vsel %vm966_vm1, %v851_v46, %v844_v33  ;;  %v9522_v21 = vsel %vm966_vm1, %v1002_v58, %v995_v53  ;;  %v920_v36 = vrot.slane %v919_v15, 1  ;;  %v1071_v60 = vrot.slane %v1070_v59, 1 }
 0x38c   :  { %v868_v24 = vadd.f32 %v867_v32, %v866_v39  ;;  %v1019_v7 = vadd.f32 %v1018_v57, %v1017_v6  ;;  %v9526_v5 = vsel %vm968_vm2, %v9420_v26, %v967_v62  ;;  %v744_v1 = vsub.f32 %v9890_v25, %v728_v56  ;;  %v9894_v62 = vld [vmem:[#allocation35_spill] sm:$0xff] }
 0x38d   :  { %v792_v28 = vadd.f32 %v776_v48, %v9891_v17  ;;  %v9530_v27 = vadd.f32 %v920_v36, %v919_v15  ;;  %v9532_v30 = vadd.f32 %v1071_v60, %v1070_v59  ;;  %v9892_v50 = vsub.f32 0.0, %v9854_v47 }
 0x38e   :  { %v869_v11 = vrot.slane %v868_v24, 2  ;;  %v1020_v8 = vrot.slane %v1019_v7, 2  ;;  %808 = vst [vmem:[#allocation10 + $0xc] sm:$0xf] %v744_v1  ;;  %v859_v54 = vsel %vm837_vm9, %v744_v1, 0.0  ;;  %v782_v26 = vmul.f32 %v8717_v23, %v517_v29 }
 0x38f   :  { %v734_v61 = vmul.f32 %v9892_v50, %v517_v29  ;;  %v1010_v49 = vsel %vm837_vm9, %v792_v28, 0.0  ;;  %824 = vst [vmem:[#allocation11 + $0xc] sm:$0xf] %v792_v28  ;;  %v860_v44 = vrot.slane %v859_v54, 4  ;;  %vm970_vm3 = vcmask 1043459   ;;  %v496_v29 = vpop.permute.xlu1 %495 }
 0x390   :  { %v870_v0 = vadd.f32 %v869_v11, %v868_v24  ;;  %v1011_v46 = vrot.slane %v1010_v49, 4  ;;  %v1021_v38 = vadd.f32 %v1020_v8, %v1019_v7  ;;  %v798_v35 = vadd.f32 %v782_v26, %v9292_v51  ;;  %v545_v51 = vpop.permute.xlu0 %544  ;;  %v9897_v8 = vld [vmem:[#allocation29_spill] sm:$0xff] }
 0x391   :  { %v750_v34 = vsub.f32 %v9287_v13, %v734_v61  ;;  %v9893_v47 = vsub.f32 0.0, %v9867_v10  ;;  %v781_v37 = vmul.f32 %v9190_v20, %v510_v18  ;;  %v861_v40 = vadd.f32 %v860_v44, %v859_v54 }
 0x392   :  { %v871_v55 = vrot.slane %v870_v0, 1  ;;  %v1012_v33 = vadd.f32 %v1011_v46, %v1010_v49  ;;  %v1022_v39 = vrot.slane %v1021_v38, 1  ;;  %830 = vst [vmem:[#allocation11 + $0x24] sm:$0xf] %v798_v35  ;;  %v1052_v13 = vsel %vm837_vm9, %v798_v35, 0.0  ;;  %v9899_v35 = vld [vmem:[#allocation34_spill] sm:$0xff] }
 0x393   :  { %v733_v58 = vmul.f32 %v9893_v47, %v510_v18  ;;  %814 = vst [vmem:[#allocation10 + $0x24] sm:$0xf] %v750_v34  ;;  %v901_v23 = vsel %vm837_vm9, %v750_v34, 0.0  ;;  %v862_v10 = vrot.slane %v861_v40, 2  ;;  %v1053_v32 = vrot.slane %v1052_v13, 4  ;;  %v9898_v34 = vld [vmem:[#allocation32_spill] sm:$0xff] }
 0x394   :  { %v902_v6 = vrot.slane %v901_v23, 4  ;;  %v872_v15 = vadd.f32 %v871_v55, %v870_v0  ;;  %v1013_v59 = vrot.slane %v1012_v33, 2  ;;  %v1023_v20 = vadd.f32 %v1022_v39, %v1021_v38 }
 0x395   :  { %v749_v53 = vsub.f32 %v9385_v12, %v733_v58  ;;  %v797_v57 = vadd.f32 %v781_v37, %v9894_v62  ;;  %v863_v56 = vadd.f32 %v862_v10, %v861_v40  ;;  %v1054_v48 = vadd.f32 %v1053_v32, %v1052_v13 }
 0x396   :  { %v903_v18 = vadd.f32 %v902_v6, %v901_v23  ;;  %v9551_v43 = vsel %vm966_vm1, %v9449_v45, %v872_v15  ;;  %v1014_v3 = vadd.f32 %v1013_v59, %v1012_v33  ;;  %v9555_v12 = vsel %vm966_vm1, %v9480_v4, %v1023_v20  ;;  %v9895_v45 = vld [vmem:[#allocation42_spill] sm:$0xff] }
 0x397   :  { %813 = vst [vmem:[#allocation10 + $0x20] sm:$0xf] %v749_v53  ;;  %v894_v42 = vsel %vm837_vm9, %v749_v53, 0.0  ;;  %v1045_v24 = vsel %vm837_vm9, %v797_v57, 0.0  ;;  %v864_v7 = vrot.slane %v863_v56, 1  ;;  %v1055_v1 = vrot.slane %v1054_v48, 2  ;;  %v503_v23 = vpop.permute.xlu1 %502 }
 0x398   :  { %v904_v36 = vrot.slane %v903_v18, 2  ;;  %829 = vst [vmem:[#allocation11 + $0x20] sm:$0xf] %v797_v57  ;;  %v895_v60 = vrot.slane %v894_v42, 4  ;;  %v1015_v25 = vrot.slane %v1014_v3, 1  ;;  %v1046_v17 = vrot.slane %v1045_v24, 4  ;;  %v552_v53 = vpop.permute.xlu0 %551 }
 0x399   :  { %v9896_v50 = vsub.f32 0.0, %v9895_v45  ;;  %v779_v54 = vmul.f32 %v9897_v8, %v496_v29  ;;  %v865_v49 = vadd.f32 %v864_v7, %v863_v56  ;;  %v1056_v4 = vadd.f32 %v1055_v1, %v1054_v48  ;;  %v9903_v48 = vld [vmem:[#allocation39_spill] sm:$0xff]  ;;  %v9905_v45 = vld [vmem:[#allocation41_spill] sm:$0xff] }
 0x39a   :  { %v905_v28 = vadd.f32 %v904_v36, %v903_v18  ;;  %v896_v11 = vadd.f32 %v895_v60, %v894_v42  ;;  %v9561_v26 = vadd.f32 %v1015_v25, %v1014_v3  ;;  %v1047_v0 = vadd.f32 %v1046_v17, %v1045_v24  ;;  %v9901_v18 = vld [vmem:[#allocation36_spill] sm:$0xff]  ;;  %v9904_v25 = vld [vmem:[#allocation37_spill] sm:$0xff] }
 0x39b   :  { %v731_v61 = vmul.f32 %v9896_v50, %v496_v29  ;;  %v795_v47 = vadd.f32 %v779_v54, %v9899_v35  ;;  %v971_v58 = vsel %vm970_vm3, %v865_v49, %v9526_v5  ;;  %v1057_v37 = vrot.slane %v1056_v4, 1 }
 0x39c   :  { %v906_v44 = vrot.slane %v905_v28, 1  ;;  %v897_v46 = vrot.slane %v896_v11, 2  ;;  %v1048_v55 = vrot.slane %v1047_v0, 2  ;;  %v9900_v40 = vsub.f32 0.0, %v9259_v22  ;;  %985 = vst [vmem:[#allocation13] sm:$0xf] %v971_v58 }
 0x39d   :  { %v747_v38 = vsub.f32 %v9898_v34, %v731_v61  ;;  %v1031_v13 = vsel %vm837_vm9, %v795_v47, 0.0  ;;  %v1058_v15 = vadd.f32 %v1057_v37, %v1056_v4  ;;  %827 = vst [vmem:[#allocation11 + $0x18] sm:$0xf] %v795_v47  ;;  %v786_v22 = vmul.f32 %v9354_v41, %v545_v51 }
 0x39e   :  { %v738_v33 = vmul.f32 %v9900_v40, %v545_v51  ;;  %v907_v29 = vadd.f32 %v906_v44, %v905_v28  ;;  %v898_v39 = vadd.f32 %v897_v46, %v896_v11  ;;  %v1049_v10 = vadd.f32 %v1048_v55, %v1047_v0 }
 0x39f   :  { %v880_v6 = vsel %vm837_vm9, %v747_v38, 0.0  ;;  %811 = vst [vmem:[#allocation10 + $0x18] sm:$0xf] %v747_v38  ;;  %v1032_v32 = vrot.slane %v1031_v13, 4  ;;  %v9902_v62 = vsub.f32 0.0, %v9901_v18  ;;  %v780_v36 = vmul.f32 %v9903_v48, %v503_v23  ;;  %v9911_v48 = vld [vmem:[#allocation28_spill] sm:$0xff] }
 0x3a0   :  { %v881_v59 = vrot.slane %v880_v6, 4  ;;  %v899_v5 = vrot.slane %v898_v39, 1  ;;  %v754_v20 = vsub.f32 %v9439_v14, %v738_v33  ;;  %v1050_v42 = vrot.slane %v1049_v10, 1  ;;  %v559_v33 = vpop.permute.xlu0 %558 }
 0x3a1   :  { %v732_v57 = vmul.f32 %v9902_v62, %v503_v23  ;;  %v1033_v3 = vadd.f32 %v1032_v32, %v1031_v13  ;;  %v802_v24 = vadd.f32 %v786_v22, %v9443_v9  ;;  %v796_v50 = vadd.f32 %v780_v36, %v9905_v45  ;;  %v9908_v32 = vld [vmem:[#allocation27_spill] sm:$0xff] }
 0x3a2   :  { %v882_v56 = vadd.f32 %v881_v59, %v880_v6  ;;  %v900_v60 = vadd.f32 %v899_v5, %v898_v39  ;;  %818 = vst [vmem:[#allocation10 + $0x34] sm:$0xf] %v754_v20  ;;  %v929_v7 = vsel %vm837_vm9, %v754_v20, 0.0  ;;  %v1051_v17 = vadd.f32 %v1050_v42, %v1049_v10  ;;  %v9907_v6 = vld [vmem:[#allocation45_spill] sm:$0xff]  ;;  %v9909_v20 = vld [vmem:[#allocation56_spill] sm:$0xff] }
 0x3a3   :  { %v748_v1 = vsub.f32 %v9904_v25, %v732_v57  ;;  %v1034_v28 = vrot.slane %v1033_v3, 2  ;;  %v930_v41 = vrot.slane %v929_v7, 4  ;;  %834 = vst [vmem:[#allocation11 + $0x34] sm:$0xf] %v802_v24  ;;  %v1080_v11 = vsel %vm837_vm9, %v802_v24, 0.0 }
 0x3a4   :  { %v883_v14 = vrot.slane %v882_v56, 2  ;;  %v975_v51 = vsel %vm966_vm1, %v907_v29, %v900_v60  ;;  %v9588_v8 = vsel %vm966_vm1, %v1058_v15, %v1051_v17  ;;  %v1081_v0 = vrot.slane %v1080_v11, 4  ;;  %828 = vst [vmem:[#allocation11 + $0x1c] sm:$0xf] %v796_v50  ;;  %v9912_v60 = vld [vmem:[#allocation43_spill] sm:$0xff] }
 0x3a5   :  { %v887_v61 = vsel %vm837_vm9, %v748_v1, 0.0  ;;  %v9585_v9 = vsel %vm968_vm2, %v9506_v16, %v975_v51  ;;  %v1035_v49 = vadd.f32 %v1034_v28, %v1033_v3  ;;  %812 = vst [vmem:[#allocation10 + $0x1c] sm:$0xf] %v748_v1  ;;  %v931_v4 = vadd.f32 %v930_v41, %v929_v7  ;;  %v9913_v41 = vld [vmem:[#allocation30_spill] sm:$0xff] }
 0x3a6   :  { %v884_v54 = vadd.f32 %v883_v14, %v882_v56  ;;  %v888_v44 = vrot.slane %v887_v61, 4  ;;  %v1038_v46 = vsel %vm837_vm9, %v796_v50, 0.0  ;;  %v9906_v47 = vsub.f32 0.0, %v9304_v52 }
 0x3a7   :  { %v1036_v38 = vrot.slane %v1035_v49, 1  ;;  %v1039_v35 = vrot.slane %v1038_v46, 4  ;;  %v932_v16 = vrot.slane %v931_v4, 2  ;;  %v1082_v37 = vadd.f32 %v1081_v0, %v1080_v11 }
 0x3a8   :  { %v885_v34 = vrot.slane %v884_v54, 1  ;;  %v739_v58 = vmul.f32 %v9906_v47, %v552_v53  ;;  %v889_v55 = vadd.f32 %v888_v44, %v887_v61  ;;  %v787_v40 = vmul.f32 %v9372_v19, %v552_v53 }
 0x3a9   :  { %v1037_v29 = vadd.f32 %v1036_v38, %v1035_v49  ;;  %v1040_v39 = vadd.f32 %v1039_v35, %v1038_v46  ;;  %v933_v15 = vadd.f32 %v932_v16, %v931_v4  ;;  %v1083_v10 = vrot.slane %v1082_v37, 2 }
 0x3aa   :  { %v886_v23 = vadd.f32 %v885_v34, %v884_v54  ;;  %v755_v13 = vsub.f32 %v9907_v6, %v739_v58  ;;  %v890_v59 = vrot.slane %v889_v55, 2  ;;  %v803_v5 = vadd.f32 %v787_v40, %v9908_v32  ;;  %v9914_v58 = vld [vmem:[#allocation38_spill] sm:$0xff] }
 0x3ab   :  { %v1041_v19 = vrot.slane %v1040_v39, 2  ;;  %v9910_v22 = vsub.f32 0.0, %v9909_v20  ;;  %v934_v62 = vrot.slane %v933_v15, 1  ;;  %v1084_v57 = vadd.f32 %v1083_v10, %v1082_v37 }
 0x3ac   :  { %v973_v52 = vsel %vm968_vm2, %v886_v23, %v9551_v43  ;;  %819 = vst [vmem:[#allocation10 + $0x38] sm:$0xf] %v755_v13  ;;  %v936_v53 = vsel %vm837_vm9, %v755_v13, 0.0  ;;  %v891_v42 = vadd.f32 %v890_v59, %v889_v55  ;;  %v1087_v3 = vsel %vm837_vm9, %v803_v5, 0.0 }
 0x3ad   :  { %v740_v18 = vmul.f32 %v9910_v22, %v559_v33  ;;  %835 = vst [vmem:[#allocation11 + $0x38] sm:$0xf] %v803_v5  ;;  %v937_v56 = vrot.slane %v936_v53, 4  ;;  %v1042_v43 = vadd.f32 %v1041_v19, %v1040_v39  ;;  %v788_v24 = vmul.f32 %v9912_v60, %v559_v33 }
 0x3ae   :  { %v935_v7 = vadd.f32 %v934_v62, %v933_v15  ;;  %v1085_v25 = vrot.slane %v1084_v57, 1  ;;  %v892_v1 = vrot.slane %v891_v42, 1  ;;  %v1088_v28 = vrot.slane %v1087_v3, 4 }
 0x3af   :  { %v756_v36 = vsub.f32 %v9911_v48, %v740_v18  ;;  %v938_v17 = vadd.f32 %v937_v56, %v936_v53  ;;  %v1043_v14 = vrot.slane %v1042_v43, 1  ;;  %v804_v51 = vadd.f32 %v788_v24, %v9913_v41 }
 0x3b0   :  { %v978_v45 = vsel %vm966_vm1, %v935_v7, %v9487_v31  ;;  %v1086_v50 = vadd.f32 %v1085_v25, %v1084_v57  ;;  %v893_v61 = vadd.f32 %v892_v1, %v891_v42  ;;  %v1089_v4 = vadd.f32 %v1088_v28, %v1087_v3 }
 0x3b1   :  { %820 = vst [vmem:[#allocation10 + $0x3c] sm:$0xf] %v756_v36  ;;  %v943_v11 = vsel %vm837_vm9, %v756_v36, 0.0  ;;  %v939_v54 = vrot.slane %v938_v17, 2  ;;  %v1044_v49 = vadd.f32 %v1043_v14, %v1042_v43  ;;  %v1094_v44 = vsel %vm837_vm9, %v804_v51, 0.0 }
 0x3b2   :  { %6224 = dma.vmem_to_hbm [thread:$0]  %s6217_s20, 1024, %s6219_s23, [#allocation4], %s6772_s25, %s6772_s25, %s6773_s26   ;;  %836 = vst [vmem:[#allocation11 + $0x3c] sm:$0xf] %v804_v51  ;;  %v944_v0 = vrot.slane %v943_v11, 4  ;;  %v1126_v46 = vsel %vm966_vm1, %v1086_v50, %v9504_v63  ;;  %v974_v34 = vsel %vm970_vm3, %v893_v61, %v973_v52  ;;  %v1095_v31 = vrot.slane %v1094_v44, 4 }
 0x3b3   :  { %v940_v38 = vadd.f32 %v939_v54, %v938_v17  ;;  %6237 = dma.vmem_to_hbm [thread:$0]  %s6230_s27, 1024, %s6232_s29, [#allocation12], %s6772_s25, %s6772_s25, %s6773_s26   ;;  %986 = vst [vmem:[#allocation13 + $0x4] sm:$0xf] %v974_v34  ;;  %v1090_v35 = vrot.slane %v1089_v4, 2  ;;  %v1118_v16 = vsel %vm968_vm2, %v9914_v58, %v9522_v21  ;;  %v1121_v37 = vsel %vm968_vm2, %v1037_v29, %v9555_v12 }
 0x3b4   :  { %v945_v47 = vadd.f32 %v944_v0, %v943_v11  ;;  %v1096_v63 = vadd.f32 %v1095_v31, %v1094_v44  ;;  %v1119_v40 = vsel %vm970_vm3, %v9561_v26, %v1118_v16  ;;  %v1122_v33 = vsel %vm970_vm3, %v1044_v49, %v1121_v37 }
 0x3b5   :  { %v941_v55 = vrot.slane %v940_v38, 1  ;;  %v1091_v23 = vadd.f32 %v1090_v35, %v1089_v4  ;;  %v1124_v6 = vsel %vm968_vm2, %v9511_v2, %v9588_v8  ;;  %1133 = vst [vmem:[#allocation14] sm:$0xf] %v1119_v40  ;;  %v977_v21 = vsel %vm970_vm3, %v9530_v27, %v9585_v9 }
 0x3b6   :  { %v946_v39 = vrot.slane %v945_v47, 2  ;;  %v1097_v12 = vrot.slane %v1096_v63, 2  ;;  %v1125_v29 = vsel %vm970_vm3, %v9532_v30, %v1124_v6  ;;  %1134 = vst [vmem:[#allocation14 + $0x4] sm:$0xf] %v1122_v33 }
 0x3b7   :  { %v942_v13 = vadd.f32 %v941_v55, %v940_v38  ;;  %v1092_v26 = vrot.slane %v1091_v23, 1  ;;  %1135 = vst [vmem:[#allocation14 + $0x8] sm:$0xf] %v1125_v29 }
 0x3b8   :  { %v947_v15 = vadd.f32 %v946_v39, %v945_v47  ;;  %v1098_v59 = vadd.f32 %v1097_v12, %v1096_v63  ;;  %987 = vst [vmem:[#allocation13 + $0x8] sm:$0xf] %v977_v21 }
 0x3b9   :  { %v979_v10 = vsel %vm968_vm2, %v942_v13, %v978_v45  ;;  %v1093_v32 = vadd.f32 %v1092_v26, %v1091_v23 }
 0x3ba   :  { %v948_v2 = vrot.slane %v947_v15, 1  ;;  %v1099_v27 = vrot.slane %v1098_v59, 1 }
 0x3bb   :  { %v1127_v9 = vsel %vm968_vm2, %v1093_v32, %v1126_v46 }
 0x3bc   :  { %v949_v30 = vadd.f32 %v948_v2, %v947_v15  ;;  %v1100_v8 = vadd.f32 %v1099_v27, %v1098_v59 }
 0x3be   :  { %v980_v5 = vsel %vm970_vm3, %v949_v30, %v979_v10  ;;  %v1128_v52 = vsel %vm970_vm3, %v1100_v8, %v1127_v9 }
 0x3bf   :  { %988 = vst [vmem:[#allocation13 + $0xc] sm:$0xf] %v980_v5 }
 0x3c0   :  { %1136 = vst [vmem:[#allocation14 + $0xc] sm:$0xf] %v1128_v52  ;;  %6250 = dma.vmem_to_hbm [thread:$0]  %s6243_s30, 256, %s6245_s12, [#allocation12], %s6772_s25, %s6772_s25, %s6773_s26  }
 0x3c1   :  { %6263 = dma.vmem_to_hbm [thread:$0]  %s6256_s14, 256, %s6258_s4, [#allocation15], %s6772_s25, %s6772_s25, %s6773_s26  }
 0x3c2   :  { %6276 = dma.vmem_to_hbm [thread:$0]  %s6269_s5, 1024, %s6271_s18, [#allocation15], %s6772_s25, %s6772_s25, %s6773_s26  }
 0x3c3   :  { %6763 = dma.done.wait [#allocation4], 1024  }
 0x3c4   :  { %6764 = vsyncadd [#allocation4], 4294966272 }
 0x3c5   :  { %6765 = dma.done.wait [#allocation12], 1280  }
 0x3c6   :  { %6766 = vsyncadd [#allocation12], 4294966016 }
 0x3c7   :  { %6767 = dma.done.wait [#allocation15], 1280  }
 0x3c8   :  { %6768 = vsyncadd [#allocation15], 4294966016 }
 0x3c9   :  { %6769 = dma.done.wait [#allocation18], 1024  }
 0x3ca   :  { %6770 = vsyncadd [#allocation18], 4294966272 }
 0x3cb   :  { %6314 = vsyncpa [#allocation3], 1 }
 0x3cc   :  { %6315 = vsyncpa [#allocation6], 1 }
 0x3cd   :  { %6316 = vsyncpa [#allocation9], 1 }
 0x3ce   :  { %6317 = vsyncpa [#allocation4], 1 }
 0x3cf   :  { %6318 = vsyncpa [#allocation12], 1 }
 0x3d0   :  { %6319 = vsyncpa [#allocation15], 1 }
 0x3d1   :  { %6320 = vsyncpa [#allocation18], 1 }

</bundles_post_ra>
